<compile_context>
chip_gen: v7x
topology: tpu7x:2x2x1
jax: 0.10.0
libtpu: 0.0.40
codegen_flags: <defaults>
</compile_context>

<pallas_src>
import jax
import jax.numpy as jnp
import numpy as np
from jax import lax
from jax.experimental import pallas as pl
from jax.experimental.pallas import tpu as pltpu

_HI = jax.lax.Precision.HIGHEST  # reference-only


# ----------------------------------------------------------------------------
# Fused FP-block kernel: 3-NN interp + split-weight first conv + MLP stack
# ----------------------------------------------------------------------------
def _make_fp_kernel(has_pts1, n_layers, relu_flags):
    def kernel(*refs):
        it = iter(refs)
        xyz1_ref = next(it)                          # (1, tn, 3)  f32 queries
        xyz2_ref = next(it)                          # (1, 3, S)   f32 sources
        pts2_ref = next(it)                          # (1, S, D)   source feats
        pts1_ref = next(it) if has_pts1 else None    # (1, tn, C1) skip feats
        w_bot_ref = next(it)                         # (D, H0)  bf16
        w_top_ref = next(it) if has_pts1 else None   # (C1, H0) bf16
        b0_ref = next(it)                            # (1, H0)  f32
        rest = [(next(it), next(it)) for _ in range(n_layers - 1)]
        out_ref = next(it)                           # (1, tn, C_last)

        x1 = xyz1_ref[0]                             # (tn, 3)
        x2 = xyz2_ref[0]                             # (3, S)
        p2 = pts2_ref[0]                             # (S, D)
        tn = x1.shape[0]
        s = x2.shape[1]

        # Exact-f32 squared distances on the VPU (K=3 would waste the MXU).
        d0 = x1[:, 0:1] - x2[0:1, :]
        d1 = x1[:, 1:2] - x2[1:2, :]
        d2 = x1[:, 2:3] - x2[2:3, :]
        d = d0 * d0 + d1 * d1 + d2 * d2              # (tn, S)

        # 3-NN inverse-distance weights by iterative min extraction
        # (tie-break on lowest column index, matching stable top_k).
        # TODO(synk): assumes S >= 3 source points (same as the torch code).
        col = lax.broadcasted_iota(jnp.int32, (tn, s), 1)
        w = jnp.zeros((tn, s), jnp.float32)
        dd = d
        for _ in range(3):
            dmin = jnp.min(dd, axis=-1, keepdims=True)
            first = jnp.min(jnp.where(dd == dmin, col, s), axis=-1,
                            keepdims=True)
            hit = col == first
            recip = 1.0 / (dmin + 1e-8)
            w = w + hit.astype(jnp.float32) * recip
            dd = jnp.where(hit, jnp.float32(jnp.inf), dd)
        w = w * pl.reciprocal(jnp.sum(w, axis=-1, keepdims=True), approx=True)

        # Interpolation (stays in VMEM) + first conv layer with split weights
        # (this replaces concat([pts1, interp]) @ W0).
        interp = jnp.dot(w.astype(jnp.bfloat16), p2.astype(jnp.bfloat16),
                         preferred_element_type=jnp.float32)          # (tn, D)
        y = jnp.dot(interp.astype(jnp.bfloat16), w_bot_ref[...],
                    preferred_element_type=jnp.float32)
        if has_pts1:
            y = y + jnp.dot(pts1_ref[0].astype(jnp.bfloat16), w_top_ref[...],
                            preferred_element_type=jnp.float32)
        y = y + b0_ref[...]
        if relu_flags[0]:
            y = jnp.maximum(y, 0.0)

        # Remaining pointwise conv (+folded BN, +ReLU) layers, VMEM-resident.
        for li, (w_ref, b_ref) in enumerate(rest):
            y = jnp.dot(y.astype(jnp.bfloat16), w_ref[...],
                        preferred_element_type=jnp.float32) + b_ref[...]
            if relu_flags[li + 1]:
                y = jnp.maximum(y, 0.0)

        out_ref[0] = y.astype(out_ref.dtype)

    return kernel


def _choose_tile(n, cap=256):
    if n <= cap:
        return n
    t = cap - cap % 16
    while t >= 16:
        if n % t == 0:
            return t
        t -= 16
    return n


def fused_fp_block(xyz1_bnc, xyz2_bcs, pts2, pts1, layers, relu_flags,
                   out_dtype, *, tile_cap=256):
    """One pallas_call: 3-NN interp + optional skip features + MLP stack."""
    bsz, n, _ = xyz1_bnc.shape
    s = xyz2_bcs.shape[2]
    d = pts2.shape[-1]
    tn = _choose_tile(n, tile_cap)
    has_pts1 = pts1 is not None
    c1 = pts1.shape[-1] if has_pts1 else 0
    cout = layers[-1][0].shape[1]

    w0, b0 = layers[0]
    inputs = [xyz1_bnc, xyz2_bcs, pts2]
    in_specs = [
        pl.BlockSpec((1, tn, 3), lambda i, j: (i, j, 0)),
        pl.BlockSpec((1, 3, s), lambda i, j: (i, 0, 0)),
        pl.BlockSpec((1, s, d), lambda i, j: (i, 0, 0)),
    ]
    if has_pts1:
        inputs.append(pts1.astype(jnp.bfloat16))
        in_specs.append(pl.BlockSpec((1, tn, c1), lambda i, j: (i, j, 0)))
    # First-layer weight split so the concat never materializes.
    w_bot = w0[c1:].astype(jnp.bfloat16)
    inputs.append(w_bot)
    in_specs.append(pl.BlockSpec(w_bot.shape, lambda i, j: (0, 0)))
    if has_pts1:
        w_top = w0[:c1].astype(jnp.bfloat16)
        inputs.append(w_top)
        in_specs.append(pl.BlockSpec(w_top.shape, lambda i, j: (0, 0)))
    inputs.append(b0)
    in_specs.append(pl.BlockSpec(b0.shape, lambda i, j: (0, 0)))
    for wl, bl in layers[1:]:
        wl = wl.astype(jnp.bfloat16)
        inputs.append(wl)
        in_specs.append(pl.BlockSpec(wl.shape, lambda i, j: (0, 0)))
        inputs.append(bl)
        in_specs.append(pl.BlockSpec(bl.shape, lambda i, j: (0, 0)))

    flops = 2 * bsz * n * s * (4 + d)
    for wl, _ in layers:
        flops += 2 * bsz * n * wl.shape[0] * wl.shape[1]
    bytes_accessed = sum(int(a.size) * a.dtype.itemsize for a in inputs)
    bytes_accessed += bsz * n * cout * jnp.dtype(out_dtype).itemsize

    return pl.pallas_call(
        _make_fp_kernel(has_pts1, len(layers), tuple(relu_flags)),
        out_shape=jax.ShapeDtypeStruct((bsz, n, cout), out_dtype),
        grid=(bsz, n // tn),
        in_specs=in_specs,
        out_specs=pl.BlockSpec((1, tn, cout), lambda i, j: (i, j, 0)),
        compiler_params=pltpu.CompilerParams(
            dimension_semantics=("parallel", "parallel"),
            vmem_limit_bytes=48 * 1024 * 1024),
        cost_estimate=pl.CostEstimate(flops=int(flops), transcendentals=0,
                                      bytes_accessed=int(bytes_accessed)),
    )(*inputs)


# ----------------------------------------------------------------------------
# Parameter construction (deterministic, eval-mode BN folded into conv)
# ----------------------------------------------------------------------------
def _fold_conv_bn(key, cin, cout, with_bn=True):
    k1, k2, k3, k4 = jax.random.split(key, 4)
    w = 0.05 * jax.random.normal(k1, (cin, cout), jnp.float32)
    b = 0.05 * jax.random.normal(k2, (cout,), jnp.float32)
    if with_bn:
        gamma = 1.0 + 0.1 * jax.random.normal(k3, (cout,), jnp.float32)
        beta = 0.1 * jax.random.normal(k4, (cout,), jnp.float32)
        mean = jnp.zeros((cout,), jnp.float32)
        var = jnp.ones((cout,), jnp.float32)
        scale = gamma * lax.rsqrt(var + 1e-5)
        w = w * scale[None, :]
        b = scale * (b - mean) + beta
    return w, b.reshape(1, cout)


def init_decoder_params(key, num_class):
    params = {}
    specs = {
        "fp4": (768, [256, 256]),
        "fp3": (384, [256, 256]),
        "fp2": (320, [256, 128]),
        "fp1": (128, [128, 128, 128]),
    }
    for name, (cin, mlp) in specs.items():
        layers = []
        last = cin
        for cout in mlp:
            key, sub = jax.random.split(key)
            layers.append(_fold_conv_bn(sub, last, cout))
            last = cout
        params[name] = layers
    key, k1, k2 = jax.random.split(key, 3)
    params["head"] = [
        _fold_conv_bn(k1, 128, 128, with_bn=True),          # conv1 + bn1
        _fold_conv_bn(k2, 128, num_class, with_bn=False),   # conv_out
    ]
    return params


# ----------------------------------------------------------------------------
# Forward pass: 4 fused pallas_calls (fp4, fp3, fp2, fp1+head)
# ----------------------------------------------------------------------------
def decoder_forward(params, l0_xyz, l0_points, l1_xyz, l1_points, l2_xyz,
                    l2_points, l3_xyz, l3_points, l4_xyz, l4_points):
    del l0_points  # forward() passes None as points1 to fp1
    t = lambda a: jnp.transpose(a, (0, 2, 1))
    bf = lambda a: a.astype(jnp.bfloat16)

    r2 = (True, True)
    l3p = fused_fp_block(t(l3_xyz), l4_xyz, bf(t(l4_points)), t(l3_points),
                         params["fp4"], r2, jnp.bfloat16)
    l2p = fused_fp_block(t(l2_xyz), l3_xyz, l3p, t(l2_points),
                         params["fp3"], r2, jnp.bfloat16)
    l1p = fused_fp_block(t(l1_xyz), l2_xyz, l2p, t(l1_points),
                         params["fp2"], r2, jnp.bfloat16)

    # fp1 + classifier head fused into one kernel.  conv_out is zero-padded to
    # 128 output lanes so the final store is lane-dense (sliced back below).
    num_class = params["head"][1][0].shape[1]
    ncp = ((num_class + 127) // 128) * 128
    wo, bo = params["head"][1]
    wo_pad = jnp.zeros((wo.shape[0], ncp), jnp.float32).at[:, :num_class].set(wo)
    bo_pad = jnp.zeros((1, ncp), jnp.float32).at[:, :num_class].set(bo)
    head_layers = list(params["fp1"]) + [params["head"][0], (wo_pad, bo_pad)]
    relu = (True,) * (len(head_layers) - 1) + (False,)
    # TODO(synk): nn.Dropout(drop1) is eval-mode identity here (no RNG mask).
    logits = fused_fp_block(t(l0_xyz), l1_xyz, l1p, None,
                            head_layers, relu, jnp.float32)
    return jnp.transpose(logits[..., :num_class], (0, 2, 1))  # [B, C, N0]


# ----------------------------------------------------------------------------
# Pure-JAX f32 reference (same folded params) for correctness check
# ----------------------------------------------------------------------------
def _ref_interp(xyz1_bnc, xyz2_bcs, pts2_bnc):
    x2 = jnp.transpose(xyz2_bcs, (0, 2, 1))
    diff = xyz1_bnc[:, :, None, :] - x2[:, None, :, :]
    dist = jnp.sum(diff * diff, axis=-1)                       # (B, N, S)
    neg_top, idx = lax.top_k(-dist, 3)
    recip = 1.0 / (-neg_top + 1e-8)
    wgt = recip / jnp.sum(recip, -1, keepdims=True)
    gathered = jax.vmap(lambda p, i: p[i])(pts2_bnc, idx)      # (B, N, 3, D)
    return jnp.sum(gathered * wgt[..., None], axis=2)


def _ref_pointwise(x, w, b, relu):
    y = jnp.einsum("bnc,cd->bnd", x, w, precision=_HI) + b
    return jnp.maximum(y, 0.0) if relu else y


def _ref_fp(xyz1_bcn, xyz2_bcs, pts1_bnc, pts2_bnc, layers):
    interp = _ref_interp(jnp.transpose(xyz1_bcn, (0, 2, 1)), xyz2_bcs, pts2_bnc)
    x = interp if pts1_bnc is None else jnp.concatenate([pts1_bnc, interp], -1)
    for w, b in layers:
        x = _ref_pointwise(x, w, b, True)
    return x


def reference_forward(params, l0_xyz, l0_points, l1_xyz, l1_points, l2_xyz,
                      l2_points, l3_xyz, l3_points, l4_xyz, l4_points):
    del l0_points
    t = lambda a: jnp.transpose(a, (0, 2, 1))
    l3p = _ref_fp(l3_xyz, l4_xyz, t(l3_points), t(l4_points), params["fp4"])
    l2p = _ref_fp(l2_xyz, l3_xyz, t(l2_points), l3p, params["fp3"])
    l1p = _ref_fp(l1_xyz, l2_xyz, t(l1_points), l2p, params["fp2"])
    l0p = _ref_fp(l0_xyz, l1_xyz, None, l1p, params["fp1"])
    w1, b1 = params["head"][0]
    x = _ref_pointwise(l0p, w1, b1, True)
    wo, bo = params["head"][1]
    x = _ref_pointwise(x, wo, bo, False)
    return jnp.transpose(x, (0, 2, 1))


# ----------------------------------------------------------------------------
if __name__ == "__main__":
    key = jax.random.PRNGKey(0)
    B = 2
    N0, N1, N2, N3, N4 = 64, 32, 16, 8, 4
    C1, C2, C3, C4 = 64, 128, 256, 512      # so FP in-channels are 320/384/768
    num_class = 13

    keys = jax.random.split(key, 10)
    l0_xyz = jax.random.normal(keys[0], (B, 3, N0), jnp.float32)
    l1_xyz = jax.random.normal(keys[1], (B, 3, N1), jnp.float32)
    l2_xyz = jax.random.normal(keys[2], (B, 3, N2), jnp.float32)
    l3_xyz = jax.random.normal(keys[3], (B, 3, N3), jnp.float32)
    l4_xyz = jax.random.normal(keys[4], (B, 3, N4), jnp.float32)
    l0_points = None  # PointNet2 forward passes None as points1 to fp1
    l1_points = jax.random.normal(keys[5], (B, C1, N1), jnp.float32)
    l2_points = jax.random.normal(keys[6], (B, C2, N2), jnp.float32)
    l3_points = jax.random.normal(keys[7], (B, C3, N3), jnp.float32)
    l4_points = jax.random.normal(keys[8], (B, C4, N4), jnp.float32)

    params = init_decoder_params(keys[9], num_class)

    fwd = jax.jit(decoder_forward)
    out = fwd(params, l0_xyz, l0_points, l1_xyz, l1_points, l2_xyz, l2_points,
              l3_xyz, l3_points, l4_xyz, l4_points)
    out = jax.block_until_ready(out)
    assert out.shape == (B, num_class, N0), out.shape

    ref = jax.block_until_ready(
        reference_forward(params, l0_xyz, l0_points, l1_xyz, l1_points,
                          l2_xyz, l2_points, l3_xyz, l3_points, l4_xyz,
                          l4_points))
    # bf16 MXU matmuls (f32 accumulation) in the kernel vs. an f32 reference.
    np.testing.assert_allclose(np.asarray(out), np.asarray(ref),
                               rtol=2e-2, atol=2e-2)
    print("KERNEL_OK")
</pallas_src>

<mosaic_0001>
module attributes {stable_mosaic.version = 11 : i64} {
  func.func @kernel(%arg0: i32, %arg1: i32, %arg2: memref<1x8x3xf32, #tpu.memory_space<vmem>>, %arg3: memref<1x3x4xf32, #tpu.memory_space<vmem>>, %arg4: memref<1x4x512xbf16, #tpu.memory_space<vmem>>, %arg5: memref<1x8x256xbf16, #tpu.memory_space<vmem>>, %arg6: memref<512x256xbf16, #tpu.memory_space<vmem>>, %arg7: memref<256x256xbf16, #tpu.memory_space<vmem>>, %arg8: memref<1x256xf32, #tpu.memory_space<vmem>>, %arg9: memref<256x256xbf16, #tpu.memory_space<vmem>>, %arg10: memref<1x256xf32, #tpu.memory_space<vmem>>, %arg11: memref<1x8x256xbf16, #tpu.memory_space<vmem>>) attributes {dimension_semantics = [#tpu.dimension_semantics<parallel>, #tpu.dimension_semantics<parallel>], iteration_bounds = array<i64: 2, 1>, scalar_prefetch = 0 : i64, scratch_operands = 0 : i64, tpu.core_type = #tpu.core_type<tc>, window_params = [{transform_indices = @transform_0, window_bounds = array<i64: 1, 8, 3>}, {transform_indices = @transform_1, window_bounds = array<i64: 1, 3, 4>}, {transform_indices = @transform_2, window_bounds = array<i64: 1, 4, 512>}, {transform_indices = @transform_3, window_bounds = array<i64: 1, 8, 256>}, {pipeline_mode = #tpu.pipeline_mode<synchronous>, transform_indices = @transform_4, window_bounds = array<i64: 512, 256>}, {pipeline_mode = #tpu.pipeline_mode<synchronous>, transform_indices = @transform_5, window_bounds = array<i64: 256, 256>}, {pipeline_mode = #tpu.pipeline_mode<synchronous>, transform_indices = @transform_6, window_bounds = array<i64: 1, 256>}, {pipeline_mode = #tpu.pipeline_mode<synchronous>, transform_indices = @transform_7, window_bounds = array<i64: 256, 256>}, {pipeline_mode = #tpu.pipeline_mode<synchronous>, transform_indices = @transform_8, window_bounds = array<i64: 1, 256>}, {transform_indices = @transform_9, window_bounds = array<i64: 1, 8, 256>}]} {
    %c0 = arith.constant 0 : index
    %c0_0 = arith.constant 0 : index
    %c0_1 = arith.constant 0 : index
    %0 = vector.load %arg2[%c0, %c0_0, %c0_1] : memref<1x8x3xf32, #tpu.memory_space<vmem>>, vector<1x8x3xf32>
    %1 = vector.shape_cast %0 : vector<1x8x3xf32> to vector<8x3xf32>
    %c0_2 = arith.constant 0 : index
    %c0_3 = arith.constant 0 : index
    %c0_4 = arith.constant 0 : index
    %2 = vector.load %arg3[%c0_2, %c0_3, %c0_4] : memref<1x3x4xf32, #tpu.memory_space<vmem>>, vector<1x3x4xf32>
    %3 = vector.shape_cast %2 : vector<1x3x4xf32> to vector<3x4xf32>
    %c0_5 = arith.constant 0 : index
    %c0_6 = arith.constant 0 : index
    %c0_7 = arith.constant 0 : index
    %4 = vector.load %arg4[%c0_5, %c0_6, %c0_7] : memref<1x4x512xbf16, #tpu.memory_space<vmem>>, vector<1x4x512xbf16>
    %5 = vector.shape_cast %4 : vector<1x4x512xbf16> to vector<4x512xbf16>
    %6 = vector.extract_strided_slice %1 {offsets = [0, 0], sizes = [8, 1], strides = [1, 1]} : vector<8x3xf32> to vector<8x1xf32>
    %7 = vector.extract_strided_slice %3 {offsets = [0, 0], sizes = [1, 4], strides = [1, 1]} : vector<3x4xf32> to vector<1x4xf32>
    %8 = vector.broadcast %6 : vector<8x1xf32> to vector<8x4xf32>
    %9 = vector.broadcast %7 : vector<1x4xf32> to vector<8x4xf32>
    %10 = arith.subf %8, %9 : vector<8x4xf32>
    %11 = vector.extract_strided_slice %1 {offsets = [0, 1], sizes = [8, 1], strides = [1, 1]} : vector<8x3xf32> to vector<8x1xf32>
    %12 = vector.extract_strided_slice %3 {offsets = [1, 0], sizes = [1, 4], strides = [1, 1]} : vector<3x4xf32> to vector<1x4xf32>
    %13 = vector.broadcast %11 : vector<8x1xf32> to vector<8x4xf32>
    %14 = vector.broadcast %12 : vector<1x4xf32> to vector<8x4xf32>
    %15 = arith.subf %13, %14 : vector<8x4xf32>
    %16 = vector.extract_strided_slice %1 {offsets = [0, 2], sizes = [8, 1], strides = [1, 1]} : vector<8x3xf32> to vector<8x1xf32>
    %17 = vector.extract_strided_slice %3 {offsets = [2, 0], sizes = [1, 4], strides = [1, 1]} : vector<3x4xf32> to vector<1x4xf32>
    %18 = vector.broadcast %16 : vector<8x1xf32> to vector<8x4xf32>
    %19 = vector.broadcast %17 : vector<1x4xf32> to vector<8x4xf32>
    %20 = arith.subf %18, %19 : vector<8x4xf32>
    %21 = arith.mulf %10, %10 : vector<8x4xf32>
    %22 = arith.mulf %15, %15 : vector<8x4xf32>
    %23 = arith.addf %21, %22 : vector<8x4xf32>
    %24 = arith.mulf %20, %20 : vector<8x4xf32>
    %25 = arith.addf %23, %24 : vector<8x4xf32>
    %26 = tpu.iota {dimensions = array<i32: 1>} : vector<8x4xi32>
    %cst = arith.constant 0.000000e+00 : f32
    %27 = vector.broadcast %cst : f32 to vector<8x4xf32>
    %cst_8 = arith.constant dense<0x7F800000> : vector<8xf32>
    %28 = vector.multi_reduction <minimumf>, %25, %cst_8 [1] : vector<8x4xf32> to vector<8xf32>
    %29 = vector.shape_cast %28 : vector<8xf32> to vector<8x1xf32>
    %30 = vector.broadcast %29 : vector<8x1xf32> to vector<8x4xf32>
    %31 = arith.cmpf oeq, %25, %30 : vector<8x4xf32>
    %c4_i32 = arith.constant 4 : i32
    %32 = vector.broadcast %c4_i32 : i32 to vector<8x4xi32>
    %33 = arith.select %31, %26, %32 : vector<8x4xi1>, vector<8x4xi32>
    %cst_9 = arith.constant dense<2147483647> : vector<8xi32>
    %34 = vector.multi_reduction <minsi>, %33, %cst_9 [1] : vector<8x4xi32> to vector<8xi32>
    %35 = vector.shape_cast %34 : vector<8xi32> to vector<8x1xi32>
    %36 = vector.broadcast %35 : vector<8x1xi32> to vector<8x4xi32>
    %37 = arith.cmpi eq, %26, %36 : vector<8x4xi32>
    %cst_10 = arith.constant 9.99999993E-9 : f32
    %38 = vector.broadcast %cst_10 : f32 to vector<8x1xf32>
    %39 = arith.addf %29, %38 : vector<8x1xf32>
    %cst_11 = arith.constant 1.000000e+00 : f32
    %40 = vector.broadcast %cst_11 : f32 to vector<8x1xf32>
    %41 = arith.divf %40, %39 : vector<8x1xf32>
    %42 = arith.extui %37 : vector<8x4xi1> to vector<8x4xi32>
    %43 = arith.sitofp %42 : vector<8x4xi32> to vector<8x4xf32>
    %44 = vector.broadcast %41 : vector<8x1xf32> to vector<8x4xf32>
    %45 = arith.mulf %43, %44 : vector<8x4xf32>
    %46 = arith.addf %27, %45 : vector<8x4xf32>
    %cst_12 = arith.constant 0x7F800000 : f32
    %47 = vector.broadcast %cst_12 : f32 to vector<8x4xf32>
    %48 = arith.select %37, %47, %25 : vector<8x4xi1>, vector<8x4xf32>
    %cst_13 = arith.constant dense<0x7F800000> : vector<8xf32>
    %49 = vector.multi_reduction <minimumf>, %48, %cst_13 [1] : vector<8x4xf32> to vector<8xf32>
    %50 = vector.shape_cast %49 : vector<8xf32> to vector<8x1xf32>
    %51 = vector.broadcast %50 : vector<8x1xf32> to vector<8x4xf32>
    %52 = arith.cmpf oeq, %48, %51 : vector<8x4xf32>
    %c4_i32_14 = arith.constant 4 : i32
    %53 = vector.broadcast %c4_i32_14 : i32 to vector<8x4xi32>
    %54 = arith.select %52, %26, %53 : vector<8x4xi1>, vector<8x4xi32>
    %cst_15 = arith.constant dense<2147483647> : vector<8xi32>
    %55 = vector.multi_reduction <minsi>, %54, %cst_15 [1] : vector<8x4xi32> to vector<8xi32>
    %56 = vector.shape_cast %55 : vector<8xi32> to vector<8x1xi32>
    %57 = vector.broadcast %56 : vector<8x1xi32> to vector<8x4xi32>
    %58 = arith.cmpi eq, %26, %57 : vector<8x4xi32>
    %cst_16 = arith.constant 9.99999993E-9 : f32
    %59 = vector.broadcast %cst_16 : f32 to vector<8x1xf32>
    %60 = arith.addf %50, %59 : vector<8x1xf32>
    %cst_17 = arith.constant 1.000000e+00 : f32
    %61 = vector.broadcast %cst_17 : f32 to vector<8x1xf32>
    %62 = arith.divf %61, %60 : vector<8x1xf32>
    %63 = arith.extui %58 : vector<8x4xi1> to vector<8x4xi32>
    %64 = arith.sitofp %63 : vector<8x4xi32> to vector<8x4xf32>
    %65 = vector.broadcast %62 : vector<8x1xf32> to vector<8x4xf32>
    %66 = arith.mulf %64, %65 : vector<8x4xf32>
    %67 = arith.addf %46, %66 : vector<8x4xf32>
    %cst_18 = arith.constant 0x7F800000 : f32
    %68 = vector.broadcast %cst_18 : f32 to vector<8x4xf32>
    %69 = arith.select %58, %68, %48 : vector<8x4xi1>, vector<8x4xf32>
    %cst_19 = arith.constant dense<0x7F800000> : vector<8xf32>
    %70 = vector.multi_reduction <minimumf>, %69, %cst_19 [1] : vector<8x4xf32> to vector<8xf32>
    %71 = vector.shape_cast %70 : vector<8xf32> to vector<8x1xf32>
    %72 = vector.broadcast %71 : vector<8x1xf32> to vector<8x4xf32>
    %73 = arith.cmpf oeq, %69, %72 : vector<8x4xf32>
    %c4_i32_20 = arith.constant 4 : i32
    %74 = vector.broadcast %c4_i32_20 : i32 to vector<8x4xi32>
    %75 = arith.select %73, %26, %74 : vector<8x4xi1>, vector<8x4xi32>
    %cst_21 = arith.constant dense<2147483647> : vector<8xi32>
    %76 = vector.multi_reduction <minsi>, %75, %cst_21 [1] : vector<8x4xi32> to vector<8xi32>
    %77 = vector.shape_cast %76 : vector<8xi32> to vector<8x1xi32>
    %78 = vector.broadcast %77 : vector<8x1xi32> to vector<8x4xi32>
    %79 = arith.cmpi eq, %26, %78 : vector<8x4xi32>
    %cst_22 = arith.constant 9.99999993E-9 : f32
    %80 = vector.broadcast %cst_22 : f32 to vector<8x1xf32>
    %81 = arith.addf %71, %80 : vector<8x1xf32>
    %cst_23 = arith.constant 1.000000e+00 : f32
    %82 = vector.broadcast %cst_23 : f32 to vector<8x1xf32>
    %83 = arith.divf %82, %81 : vector<8x1xf32>
    %84 = arith.extui %79 : vector<8x4xi1> to vector<8x4xi32>
    %85 = arith.sitofp %84 : vector<8x4xi32> to vector<8x4xf32>
    %86 = vector.broadcast %83 : vector<8x1xf32> to vector<8x4xf32>
    %87 = arith.mulf %85, %86 : vector<8x4xf32>
    %88 = arith.addf %67, %87 : vector<8x4xf32>
    %cst_24 = arith.constant dense<0.000000e+00> : vector<8xf32>
    %89 = vector.multi_reduction <add>, %88, %cst_24 [1] : vector<8x4xf32> to vector<8xf32>
    %90 = vector.shape_cast %89 : vector<8xf32> to vector<8x1xf32>
    %91 = tpu.reciprocal %90 {approx = true} : vector<8x1xf32> -> vector<8x1xf32>
    %92 = vector.broadcast %91 : vector<8x1xf32> to vector<8x4xf32>
    %93 = arith.mulf %88, %92 : vector<8x4xf32>
    %94 = arith.truncf %93 : vector<8x4xf32> to vector<8x4xbf16>
    %cst_25 = arith.constant dense<0.000000e+00> : vector<8x512xf32>
    %95 = tpu.matmul %94, %5, %cst_25 {dimension_numbers = #tpu.dot_dimension_numbers<[1], [0], [0], [1], [0, 0, 1, 1], [], []>} : vector<8x4xbf16>, vector<4x512xbf16>, vector<8x512xf32> -> vector<8x512xf32>
    %96 = arith.truncf %95 : vector<8x512xf32> to vector<8x512xbf16>
    %c0_26 = arith.constant 0 : index
    %c0_27 = arith.constant 0 : index
    %97 = vector.load %arg6[%c0_26, %c0_27] : memref<512x256xbf16, #tpu.memory_space<vmem>>, vector<512x256xbf16>
    %cst_28 = arith.constant dense<0.000000e+00> : vector<8x256xf32>
    %98 = tpu.matmul %96, %97, %cst_28 {dimension_numbers = #tpu.dot_dimension_numbers<[1], [0], [0], [1], [0, 0, 1, 1], [], []>} : vector<8x512xbf16>, vector<512x256xbf16>, vector<8x256xf32> -> vector<8x256xf32>
    %c0_29 = arith.constant 0 : index
    %c0_30 = arith.constant 0 : index
    %c0_31 = arith.constant 0 : index
    %99 = vector.load %arg5[%c0_29, %c0_30, %c0_31] : memref<1x8x256xbf16, #tpu.memory_space<vmem>>, vector<1x8x256xbf16>
    %100 = vector.shape_cast %99 : vector<1x8x256xbf16> to vector<8x256xbf16>
    %c0_32 = arith.constant 0 : index
    %c0_33 = arith.constant 0 : index
    %101 = vector.load %arg7[%c0_32, %c0_33] : memref<256x256xbf16, #tpu.memory_space<vmem>>, vector<256x256xbf16>
    %cst_34 = arith.constant dense<0.000000e+00> : vector<8x256xf32>
    %102 = tpu.matmul %100, %101, %cst_34 {dimension_numbers = #tpu.dot_dimension_numbers<[1], [0], [0], [1], [0, 0, 1, 1], [], []>} : vector<8x256xbf16>, vector<256x256xbf16>, vector<8x256xf32> -> vector<8x256xf32>
    %103 = arith.addf %98, %102 : vector<8x256xf32>
    %c0_35 = arith.constant 0 : index
    %c0_36 = arith.constant 0 : index
    %104 = vector.load %arg8[%c0_35, %c0_36] : memref<1x256xf32, #tpu.memory_space<vmem>>, vector<1x256xf32>
    %105 = vector.broadcast %104 : vector<1x256xf32> to vector<8x256xf32>
    %106 = arith.addf %103, %105 : vector<8x256xf32>
    %cst_37 = arith.constant 0.000000e+00 : f32
    %107 = vector.broadcast %cst_37 : f32 to vector<8x256xf32>
    %108 = arith.maximumf %106, %107 : vector<8x256xf32>
    %109 = arith.truncf %108 : vector<8x256xf32> to vector<8x256xbf16>
    %c0_38 = arith.constant 0 : index
    %c0_39 = arith.constant 0 : index
    %110 = vector.load %arg9[%c0_38, %c0_39] : memref<256x256xbf16, #tpu.memory_space<vmem>>, vector<256x256xbf16>
    %cst_40 = arith.constant dense<0.000000e+00> : vector<8x256xf32>
    %111 = tpu.matmul %109, %110, %cst_40 {dimension_numbers = #tpu.dot_dimension_numbers<[1], [0], [0], [1], [0, 0, 1, 1], [], []>} : vector<8x256xbf16>, vector<256x256xbf16>, vector<8x256xf32> -> vector<8x256xf32>
    %c0_41 = arith.constant 0 : index
    %c0_42 = arith.constant 0 : index
    %112 = vector.load %arg10[%c0_41, %c0_42] : memref<1x256xf32, #tpu.memory_space<vmem>>, vector<1x256xf32>
    %113 = vector.broadcast %112 : vector<1x256xf32> to vector<8x256xf32>
    %114 = arith.addf %111, %113 : vector<8x256xf32>
    %cst_43 = arith.constant 0.000000e+00 : f32
    %115 = vector.broadcast %cst_43 : f32 to vector<8x256xf32>
    %116 = arith.maximumf %114, %115 : vector<8x256xf32>
    %117 = arith.truncf %116 : vector<8x256xf32> to vector<8x256xbf16>
    %c0_44 = arith.constant 0 : index
    %c0_45 = arith.constant 0 : index
    %c0_46 = arith.constant 0 : index
    %118 = vector.load %arg11[%c0_44, %c0_45, %c0_46] : memref<1x8x256xbf16, #tpu.memory_space<vmem>>, vector<1x8x256xbf16>
    %119 = vector.shape_cast %118 : vector<1x8x256xbf16> to vector<8x256xbf16>
    %120 = vector.shape_cast %117 : vector<8x256xbf16> to vector<1x8x256xbf16>
    tpu.vector_store %arg11[%c0_44, %c0_45, %c0_46], %120 {strides = array<i32>} : memref<1x8x256xbf16, #tpu.memory_space<vmem>>, vector<1x8x256xbf16>,
    return
  }
  func.func @transform_0(%arg0: i32, %arg1: i32) -> (i32, i32, i32) {
    %c0_i32 = arith.constant 0 : i32
    %c0_i32_0 = arith.constant 0 : i32
    return %arg0, %arg1, %c0_i32 : i32, i32, i32
  }
  func.func @transform_1(%arg0: i32, %arg1: i32) -> (i32, i32, i32) {
    %c0_i32 = arith.constant 0 : i32
    %c0_i32_0 = arith.constant 0 : i32
    %c0_i32_1 = arith.constant 0 : i32
    return %arg0, %c0_i32, %c0_i32_0 : i32, i32, i32
  }
  func.func @transform_2(%arg0: i32, %arg1: i32) -> (i32, i32, i32) {
    %c0_i32 = arith.constant 0 : i32
    %c0_i32_0 = arith.constant 0 : i32
    %c0_i32_1 = arith.constant 0 : i32
    return %arg0, %c0_i32, %c0_i32_0 : i32, i32, i32
  }
  func.func @transform_3(%arg0: i32, %arg1: i32) -> (i32, i32, i32) {
    %c0_i32 = arith.constant 0 : i32
    %c0_i32_0 = arith.constant 0 : i32
    return %arg0, %arg1, %c0_i32 : i32, i32, i32
  }
  func.func @transform_4(%arg0: i32, %arg1: i32) -> (i32, i32) {
    %c0_i32 = arith.constant 0 : i32
    %c0_i32_0 = arith.constant 0 : i32
    %c0_i32_1 = arith.constant 0 : i32
    return %c0_i32, %c0_i32_0 : i32, i32
  }
  func.func @transform_5(%arg0: i32, %arg1: i32) -> (i32, i32) {
    %c0_i32 = arith.constant 0 : i32
    %c0_i32_0 = arith.constant 0 : i32
    %c0_i32_1 = arith.constant 0 : i32
    return %c0_i32, %c0_i32_0 : i32, i32
  }
  func.func @transform_6(%arg0: i32, %arg1: i32) -> (i32, i32) {
    %c0_i32 = arith.constant 0 : i32
    %c0_i32_0 = arith.constant 0 : i32
    %c0_i32_1 = arith.constant 0 : i32
    return %c0_i32, %c0_i32_0 : i32, i32
  }
  func.func @transform_7(%arg0: i32, %arg1: i32) -> (i32, i32) {
    %c0_i32 = arith.constant 0 : i32
    %c0_i32_0 = arith.constant 0 : i32
    %c0_i32_1 = arith.constant 0 : i32
    return %c0_i32, %c0_i32_0 : i32, i32
  }
  func.func @transform_8(%arg0: i32, %arg1: i32) -> (i32, i32) {
    %c0_i32 = arith.constant 0 : i32
    %c0_i32_0 = arith.constant 0 : i32
    %c0_i32_1 = arith.constant 0 : i32
    return %c0_i32, %c0_i32_0 : i32, i32
  }
  func.func @transform_9(%arg0: i32, %arg1: i32) -> (i32, i32, i32) {
    %c0_i32 = arith.constant 0 : i32
    %c0_i32_0 = arith.constant 0 : i32
    return %arg0, %arg1, %c0_i32 : i32, i32, i32
  }
}

module attributes {stable_mosaic.version = 11 : i64} {
  func.func @kernel(%arg0: i32, %arg1: i32, %arg2: memref<1x16x3xf32, #tpu.memory_space<vmem>>, %arg3: memref<1x3x8xf32, #tpu.memory_space<vmem>>, %arg4: memref<1x8x256xbf16, #tpu.memory_space<vmem>>, %arg5: memref<1x16x128xbf16, #tpu.memory_space<vmem>>, %arg6: memref<256x256xbf16, #tpu.memory_space<vmem>>, %arg7: memref<128x256xbf16, #tpu.memory_space<vmem>>, %arg8: memref<1x256xf32, #tpu.memory_space<vmem>>, %arg9: memref<256x256xbf16, #tpu.memory_space<vmem>>, %arg10: memref<1x256xf32, #tpu.memory_space<vmem>>, %arg11: memref<1x16x256xbf16, #tpu.memory_space<vmem>>) attributes {dimension_semantics = [#tpu.dimension_semantics<parallel>, #tpu.dimension_semantics<parallel>], iteration_bounds = array<i64: 2, 1>, scalar_prefetch = 0 : i64, scratch_operands = 0 : i64, tpu.core_type = #tpu.core_type<tc>, window_params = [{transform_indices = @transform_0, window_bounds = array<i64: 1, 16, 3>}, {transform_indices = @transform_1, window_bounds = array<i64: 1, 3, 8>}, {transform_indices = @transform_2, window_bounds = array<i64: 1, 8, 256>}, {transform_indices = @transform_3, window_bounds = array<i64: 1, 16, 128>}, {pipeline_mode = #tpu.pipeline_mode<synchronous>, transform_indices = @transform_4, window_bounds = array<i64: 256, 256>}, {pipeline_mode = #tpu.pipeline_mode<synchronous>, transform_indices = @transform_5, window_bounds = array<i64: 128, 256>}, {pipeline_mode = #tpu.pipeline_mode<synchronous>, transform_indices = @transform_6, window_bounds = array<i64: 1, 256>}, {pipeline_mode = #tpu.pipeline_mode<synchronous>, transform_indices = @transform_7, window_bounds = array<i64: 256, 256>}, {pipeline_mode = #tpu.pipeline_mode<synchronous>, transform_indices = @transform_8, window_bounds = array<i64: 1, 256>}, {transform_indices = @transform_9, window_bounds = array<i64: 1, 16, 256>}]} {
    %c0 = arith.constant 0 : index
    %c0_0 = arith.constant 0 : index
    %c0_1 = arith.constant 0 : index
    %0 = vector.load %arg2[%c0, %c0_0, %c0_1] : memref<1x16x3xf32, #tpu.memory_space<vmem>>, vector<1x16x3xf32>
    %1 = vector.shape_cast %0 : vector<1x16x3xf32> to vector<16x3xf32>
    %c0_2 = arith.constant 0 : index
    %c0_3 = arith.constant 0 : index
    %c0_4 = arith.constant 0 : index
    %2 = vector.load %arg3[%c0_2, %c0_3, %c0_4] : memref<1x3x8xf32, #tpu.memory_space<vmem>>, vector<1x3x8xf32>
    %3 = vector.shape_cast %2 : vector<1x3x8xf32> to vector<3x8xf32>
    %c0_5 = arith.constant 0 : index
    %c0_6 = arith.constant 0 : index
    %c0_7 = arith.constant 0 : index
    %4 = vector.load %arg4[%c0_5, %c0_6, %c0_7] : memref<1x8x256xbf16, #tpu.memory_space<vmem>>, vector<1x8x256xbf16>
    %5 = vector.shape_cast %4 : vector<1x8x256xbf16> to vector<8x256xbf16>
    %6 = vector.extract_strided_slice %1 {offsets = [0, 0], sizes = [16, 1], strides = [1, 1]} : vector<16x3xf32> to vector<16x1xf32>
    %7 = vector.extract_strided_slice %3 {offsets = [0, 0], sizes = [1, 8], strides = [1, 1]} : vector<3x8xf32> to vector<1x8xf32>
    %8 = vector.broadcast %6 : vector<16x1xf32> to vector<16x8xf32>
    %9 = vector.broadcast %7 : vector<1x8xf32> to vector<16x8xf32>
    %10 = arith.subf %8, %9 : vector<16x8xf32>
    %11 = vector.extract_strided_slice %1 {offsets = [0, 1], sizes = [16, 1], strides = [1, 1]} : vector<16x3xf32> to vector<16x1xf32>
    %12 = vector.extract_strided_slice %3 {offsets = [1, 0], sizes = [1, 8], strides = [1, 1]} : vector<3x8xf32> to vector<1x8xf32>
    %13 = vector.broadcast %11 : vector<16x1xf32> to vector<16x8xf32>
    %14 = vector.broadcast %12 : vector<1x8xf32> to vector<16x8xf32>
    %15 = arith.subf %13, %14 : vector<16x8xf32>
    %16 = vector.extract_strided_slice %1 {offsets = [0, 2], sizes = [16, 1], strides = [1, 1]} : vector<16x3xf32> to vector<16x1xf32>
    %17 = vector.extract_strided_slice %3 {offsets = [2, 0], sizes = [1, 8], strides = [1, 1]} : vector<3x8xf32> to vector<1x8xf32>
    %18 = vector.broadcast %16 : vector<16x1xf32> to vector<16x8xf32>
    %19 = vector.broadcast %17 : vector<1x8xf32> to vector<16x8xf32>
    %20 = arith.subf %18, %19 : vector<16x8xf32>
    %21 = arith.mulf %10, %10 : vector<16x8xf32>
    %22 = arith.mulf %15, %15 : vector<16x8xf32>
    %23 = arith.addf %21, %22 : vector<16x8xf32>
    %24 = arith.mulf %20, %20 : vector<16x8xf32>
    %25 = arith.addf %23, %24 : vector<16x8xf32>
    %26 = tpu.iota {dimensions = array<i32: 1>} : vector<16x8xi32>
    %cst = arith.constant 0.000000e+00 : f32
    %27 = vector.broadcast %cst : f32 to vector<16x8xf32>
    %cst_8 = arith.constant dense<0x7F800000> : vector<16xf32>
    %28 = vector.multi_reduction <minimumf>, %25, %cst_8 [1] : vector<16x8xf32> to vector<16xf32>
    %29 = vector.shape_cast %28 : vector<16xf32> to vector<16x1xf32>
    %30 = vector.broadcast %29 : vector<16x1xf32> to vector<16x8xf32>
    %31 = arith.cmpf oeq, %25, %30 : vector<16x8xf32>
    %c8_i32 = arith.constant 8 : i32
    %32 = vector.broadcast %c8_i32 : i32 to vector<16x8xi32>
    %33 = arith.select %31, %26, %32 : vector<16x8xi1>, vector<16x8xi32>
    %cst_9 = arith.constant dense<2147483647> : vector<16xi32>
    %34 = vector.multi_reduction <minsi>, %33, %cst_9 [1] : vector<16x8xi32> to vector<16xi32>
    %35 = vector.shape_cast %34 : vector<16xi32> to vector<16x1xi32>
    %36 = vector.broadcast %35 : vector<16x1xi32> to vector<16x8xi32>
    %37 = arith.cmpi eq, %26, %36 : vector<16x8xi32>
    %cst_10 = arith.constant 9.99999993E-9 : f32
    %38 = vector.broadcast %cst_10 : f32 to vector<16x1xf32>
    %39 = arith.addf %29, %38 : vector<16x1xf32>
    %cst_11 = arith.constant 1.000000e+00 : f32
    %40 = vector.broadcast %cst_11 : f32 to vector<16x1xf32>
    %41 = arith.divf %40, %39 : vector<16x1xf32>
    %42 = arith.extui %37 : vector<16x8xi1> to vector<16x8xi32>
    %43 = arith.sitofp %42 : vector<16x8xi32> to vector<16x8xf32>
    %44 = vector.broadcast %41 : vector<16x1xf32> to vector<16x8xf32>
    %45 = arith.mulf %43, %44 : vector<16x8xf32>
    %46 = arith.addf %27, %45 : vector<16x8xf32>
    %cst_12 = arith.constant 0x7F800000 : f32
    %47 = vector.broadcast %cst_12 : f32 to vector<16x8xf32>
    %48 = arith.select %37, %47, %25 : vector<16x8xi1>, vector<16x8xf32>
    %cst_13 = arith.constant dense<0x7F800000> : vector<16xf32>
    %49 = vector.multi_reduction <minimumf>, %48, %cst_13 [1] : vector<16x8xf32> to vector<16xf32>
    %50 = vector.shape_cast %49 : vector<16xf32> to vector<16x1xf32>
    %51 = vector.broadcast %50 : vector<16x1xf32> to vector<16x8xf32>
    %52 = arith.cmpf oeq, %48, %51 : vector<16x8xf32>
    %c8_i32_14 = arith.constant 8 : i32
    %53 = vector.broadcast %c8_i32_14 : i32 to vector<16x8xi32>
    %54 = arith.select %52, %26, %53 : vector<16x8xi1>, vector<16x8xi32>
    %cst_15 = arith.constant dense<2147483647> : vector<16xi32>
    %55 = vector.multi_reduction <minsi>, %54, %cst_15 [1] : vector<16x8xi32> to vector<16xi32>
    %56 = vector.shape_cast %55 : vector<16xi32> to vector<16x1xi32>
    %57 = vector.broadcast %56 : vector<16x1xi32> to vector<16x8xi32>
    %58 = arith.cmpi eq, %26, %57 : vector<16x8xi32>
    %cst_16 = arith.constant 9.99999993E-9 : f32
    %59 = vector.broadcast %cst_16 : f32 to vector<16x1xf32>
    %60 = arith.addf %50, %59 : vector<16x1xf32>
    %cst_17 = arith.constant 1.000000e+00 : f32
    %61 = vector.broadcast %cst_17 : f32 to vector<16x1xf32>
    %62 = arith.divf %61, %60 : vector<16x1xf32>
    %63 = arith.extui %58 : vector<16x8xi1> to vector<16x8xi32>
    %64 = arith.sitofp %63 : vector<16x8xi32> to vector<16x8xf32>
    %65 = vector.broadcast %62 : vector<16x1xf32> to vector<16x8xf32>
    %66 = arith.mulf %64, %65 : vector<16x8xf32>
    %67 = arith.addf %46, %66 : vector<16x8xf32>
    %cst_18 = arith.constant 0x7F800000 : f32
    %68 = vector.broadcast %cst_18 : f32 to vector<16x8xf32>
    %69 = arith.select %58, %68, %48 : vector<16x8xi1>, vector<16x8xf32>
    %cst_19 = arith.constant dense<0x7F800000> : vector<16xf32>
    %70 = vector.multi_reduction <minimumf>, %69, %cst_19 [1] : vector<16x8xf32> to vector<16xf32>
    %71 = vector.shape_cast %70 : vector<16xf32> to vector<16x1xf32>
    %72 = vector.broadcast %71 : vector<16x1xf32> to vector<16x8xf32>
    %73 = arith.cmpf oeq, %69, %72 : vector<16x8xf32>
    %c8_i32_20 = arith.constant 8 : i32
    %74 = vector.broadcast %c8_i32_20 : i32 to vector<16x8xi32>
    %75 = arith.select %73, %26, %74 : vector<16x8xi1>, vector<16x8xi32>
    %cst_21 = arith.constant dense<2147483647> : vector<16xi32>
    %76 = vector.multi_reduction <minsi>, %75, %cst_21 [1] : vector<16x8xi32> to vector<16xi32>
    %77 = vector.shape_cast %76 : vector<16xi32> to vector<16x1xi32>
    %78 = vector.broadcast %77 : vector<16x1xi32> to vector<16x8xi32>
    %79 = arith.cmpi eq, %26, %78 : vector<16x8xi32>
    %cst_22 = arith.constant 9.99999993E-9 : f32
    %80 = vector.broadcast %cst_22 : f32 to vector<16x1xf32>
    %81 = arith.addf %71, %80 : vector<16x1xf32>
    %cst_23 = arith.constant 1.000000e+00 : f32
    %82 = vector.broadcast %cst_23 : f32 to vector<16x1xf32>
    %83 = arith.divf %82, %81 : vector<16x1xf32>
    %84 = arith.extui %79 : vector<16x8xi1> to vector<16x8xi32>
    %85 = arith.sitofp %84 : vector<16x8xi32> to vector<16x8xf32>
    %86 = vector.broadcast %83 : vector<16x1xf32> to vector<16x8xf32>
    %87 = arith.mulf %85, %86 : vector<16x8xf32>
    %88 = arith.addf %67, %87 : vector<16x8xf32>
    %cst_24 = arith.constant dense<0.000000e+00> : vector<16xf32>
    %89 = vector.multi_reduction <add>, %88, %cst_24 [1] : vector<16x8xf32> to vector<16xf32>
    %90 = vector.shape_cast %89 : vector<16xf32> to vector<16x1xf32>
    %91 = tpu.reciprocal %90 {approx = true} : vector<16x1xf32> -> vector<16x1xf32>
    %92 = vector.broadcast %91 : vector<16x1xf32> to vector<16x8xf32>
    %93 = arith.mulf %88, %92 : vector<16x8xf32>
    %94 = arith.truncf %93 : vector<16x8xf32> to vector<16x8xbf16>
    %cst_25 = arith.constant dense<0.000000e+00> : vector<16x256xf32>
    %95 = tpu.matmul %94, %5, %cst_25 {dimension_numbers = #tpu.dot_dimension_numbers<[1], [0], [0], [1], [0, 0, 1, 1], [], []>} : vector<16x8xbf16>, vector<8x256xbf16>, vector<16x256xf32> -> vector<16x256xf32>
    %96 = arith.truncf %95 : vector<16x256xf32> to vector<16x256xbf16>
    %c0_26 = arith.constant 0 : index
    %c0_27 = arith.constant 0 : index
    %97 = vector.load %arg6[%c0_26, %c0_27] : memref<256x256xbf16, #tpu.memory_space<vmem>>, vector<256x256xbf16>
    %cst_28 = arith.constant dense<0.000000e+00> : vector<16x256xf32>
    %98 = tpu.matmul %96, %97, %cst_28 {dimension_numbers = #tpu.dot_dimension_numbers<[1], [0], [0], [1], [0, 0, 1, 1], [], []>} : vector<16x256xbf16>, vector<256x256xbf16>, vector<16x256xf32> -> vector<16x256xf32>
    %c0_29 = arith.constant 0 : index
    %c0_30 = arith.constant 0 : index
    %c0_31 = arith.constant 0 : index
    %99 = vector.load %arg5[%c0_29, %c0_30, %c0_31] : memref<1x16x128xbf16, #tpu.memory_space<vmem>>, vector<1x16x128xbf16>
    %100 = vector.shape_cast %99 : vector<1x16x128xbf16> to vector<16x128xbf16>
    %c0_32 = arith.constant 0 : index
    %c0_33 = arith.constant 0 : index
    %101 = vector.load %arg7[%c0_32, %c0_33] : memref<128x256xbf16, #tpu.memory_space<vmem>>, vector<128x256xbf16>
    %cst_34 = arith.constant dense<0.000000e+00> : vector<16x256xf32>
    %102 = tpu.matmul %100, %101, %cst_34 {dimension_numbers = #tpu.dot_dimension_numbers<[1], [0], [0], [1], [0, 0, 1, 1], [], []>} : vector<16x128xbf16>, vector<128x256xbf16>, vector<16x256xf32> -> vector<16x256xf32>
    %103 = arith.addf %98, %102 : vector<16x256xf32>
    %c0_35 = arith.constant 0 : index
    %c0_36 = arith.constant 0 : index
    %104 = vector.load %arg8[%c0_35, %c0_36] : memref<1x256xf32, #tpu.memory_space<vmem>>, vector<1x256xf32>
    %105 = vector.broadcast %104 : vector<1x256xf32> to vector<16x256xf32>
    %106 = arith.addf %103, %105 : vector<16x256xf32>
    %cst_37 = arith.constant 0.000000e+00 : f32
    %107 = vector.broadcast %cst_37 : f32 to vector<16x256xf32>
    %108 = arith.maximumf %106, %107 : vector<16x256xf32>
    %109 = arith.truncf %108 : vector<16x256xf32> to vector<16x256xbf16>
    %c0_38 = arith.constant 0 : index
    %c0_39 = arith.constant 0 : index
    %110 = vector.load %arg9[%c0_38, %c0_39] : memref<256x256xbf16, #tpu.memory_space<vmem>>, vector<256x256xbf16>
    %cst_40 = arith.constant dense<0.000000e+00> : vector<16x256xf32>
    %111 = tpu.matmul %109, %110, %cst_40 {dimension_numbers = #tpu.dot_dimension_numbers<[1], [0], [0], [1], [0, 0, 1, 1], [], []>} : vector<16x256xbf16>, vector<256x256xbf16>, vector<16x256xf32> -> vector<16x256xf32>
    %c0_41 = arith.constant 0 : index
    %c0_42 = arith.constant 0 : index
    %112 = vector.load %arg10[%c0_41, %c0_42] : memref<1x256xf32, #tpu.memory_space<vmem>>, vector<1x256xf32>
    %113 = vector.broadcast %112 : vector<1x256xf32> to vector<16x256xf32>
    %114 = arith.addf %111, %113 : vector<16x256xf32>
    %cst_43 = arith.constant 0.000000e+00 : f32
    %115 = vector.broadcast %cst_43 : f32 to vector<16x256xf32>
    %116 = arith.maximumf %114, %115 : vector<16x256xf32>
    %117 = arith.truncf %116 : vector<16x256xf32> to vector<16x256xbf16>
    %c0_44 = arith.constant 0 : index
    %c0_45 = arith.constant 0 : index
    %c0_46 = arith.constant 0 : index
    %118 = vector.load %arg11[%c0_44, %c0_45, %c0_46] : memref<1x16x256xbf16, #tpu.memory_space<vmem>>, vector<1x16x256xbf16>
    %119 = vector.shape_cast %118 : vector<1x16x256xbf16> to vector<16x256xbf16>
    %120 = vector.shape_cast %117 : vector<16x256xbf16> to vector<1x16x256xbf16>
    tpu.vector_store %arg11[%c0_44, %c0_45, %c0_46], %120 {strides = array<i32>} : memref<1x16x256xbf16, #tpu.memory_space<vmem>>, vector<1x16x256xbf16>,
    return
  }
  func.func @transform_0(%arg0: i32, %arg1: i32) -> (i32, i32, i32) {
    %c0_i32 = arith.constant 0 : i32
    %c0_i32_0 = arith.constant 0 : i32
    return %arg0, %arg1, %c0_i32 : i32, i32, i32
  }
  func.func @transform_1(%arg0: i32, %arg1: i32) -> (i32, i32, i32) {
    %c0_i32 = arith.constant 0 : i32
    %c0_i32_0 = arith.constant 0 : i32
    %c0_i32_1 = arith.constant 0 : i32
    return %arg0, %c0_i32, %c0_i32_0 : i32, i32, i32
  }
  func.func @transform_2(%arg0: i32, %arg1: i32) -> (i32, i32, i32) {
    %c0_i32 = arith.constant 0 : i32
    %c0_i32_0 = arith.constant 0 : i32
    %c0_i32_1 = arith.constant 0 : i32
    return %arg0, %c0_i32, %c0_i32_0 : i32, i32, i32
  }
  func.func @transform_3(%arg0: i32, %arg1: i32) -> (i32, i32, i32) {
    %c0_i32 = arith.constant 0 : i32
    %c0_i32_0 = arith.constant 0 : i32
    return %arg0, %arg1, %c0_i32 : i32, i32, i32
  }
  func.func @transform_4(%arg0: i32, %arg1: i32) -> (i32, i32) {
    %c0_i32 = arith.constant 0 : i32
    %c0_i32_0 = arith.constant 0 : i32
    %c0_i32_1 = arith.constant 0 : i32
    return %c0_i32, %c0_i32_0 : i32, i32
  }
  func.func @transform_5(%arg0: i32, %arg1: i32) -> (i32, i32) {
    %c0_i32 = arith.constant 0 : i32
    %c0_i32_0 = arith.constant 0 : i32
    %c0_i32_1 = arith.constant 0 : i32
    return %c0_i32, %c0_i32_0 : i32, i32
  }
  func.func @transform_6(%arg0: i32, %arg1: i32) -> (i32, i32) {
    %c0_i32 = arith.constant 0 : i32
    %c0_i32_0 = arith.constant 0 : i32
    %c0_i32_1 = arith.constant 0 : i32
    return %c0_i32, %c0_i32_0 : i32, i32
  }
  func.func @transform_7(%arg0: i32, %arg1: i32) -> (i32, i32) {
    %c0_i32 = arith.constant 0 : i32
    %c0_i32_0 = arith.constant 0 : i32
    %c0_i32_1 = arith.constant 0 : i32
    return %c0_i32, %c0_i32_0 : i32, i32
  }
  func.func @transform_8(%arg0: i32, %arg1: i32) -> (i32, i32) {
    %c0_i32 = arith.constant 0 : i32
    %c0_i32_0 = arith.constant 0 : i32
    %c0_i32_1 = arith.constant 0 : i32
    return %c0_i32, %c0_i32_0 : i32, i32
  }
  func.func @transform_9(%arg0: i32, %arg1: i32) -> (i32, i32, i32) {
    %c0_i32 = arith.constant 0 : i32
    %c0_i32_0 = arith.constant 0 : i32
    return %arg0, %arg1, %c0_i32 : i32, i32, i32
  }
}

module attributes {stable_mosaic.version = 11 : i64} {
  func.func @kernel(%arg0: i32, %arg1: i32, %arg2: memref<1x32x3xf32, #tpu.memory_space<vmem>>, %arg3: memref<1x3x16xf32, #tpu.memory_space<vmem>>, %arg4: memref<1x16x256xbf16, #tpu.memory_space<vmem>>, %arg5: memref<1x32x64xbf16, #tpu.memory_space<vmem>>, %arg6: memref<256x256xbf16, #tpu.memory_space<vmem>>, %arg7: memref<64x256xbf16, #tpu.memory_space<vmem>>, %arg8: memref<1x256xf32, #tpu.memory_space<vmem>>, %arg9: memref<256x128xbf16, #tpu.memory_space<vmem>>, %arg10: memref<1x128xf32, #tpu.memory_space<vmem>>, %arg11: memref<1x32x128xbf16, #tpu.memory_space<vmem>>) attributes {dimension_semantics = [#tpu.dimension_semantics<parallel>, #tpu.dimension_semantics<parallel>], iteration_bounds = array<i64: 2, 1>, scalar_prefetch = 0 : i64, scratch_operands = 0 : i64, tpu.core_type = #tpu.core_type<tc>, window_params = [{transform_indices = @transform_0, window_bounds = array<i64: 1, 32, 3>}, {transform_indices = @transform_1, window_bounds = array<i64: 1, 3, 16>}, {transform_indices = @transform_2, window_bounds = array<i64: 1, 16, 256>}, {transform_indices = @transform_3, window_bounds = array<i64: 1, 32, 64>}, {pipeline_mode = #tpu.pipeline_mode<synchronous>, transform_indices = @transform_4, window_bounds = array<i64: 256, 256>}, {pipeline_mode = #tpu.pipeline_mode<synchronous>, transform_indices = @transform_5, window_bounds = array<i64: 64, 256>}, {pipeline_mode = #tpu.pipeline_mode<synchronous>, transform_indices = @transform_6, window_bounds = array<i64: 1, 256>}, {pipeline_mode = #tpu.pipeline_mode<synchronous>, transform_indices = @transform_7, window_bounds = array<i64: 256, 128>}, {pipeline_mode = #tpu.pipeline_mode<synchronous>, transform_indices = @transform_8, window_bounds = array<i64: 1, 128>}, {transform_indices = @transform_9, window_bounds = array<i64: 1, 32, 128>}]} {
    %c0 = arith.constant 0 : index
    %c0_0 = arith.constant 0 : index
    %c0_1 = arith.constant 0 : index
    %0 = vector.load %arg2[%c0, %c0_0, %c0_1] : memref<1x32x3xf32, #tpu.memory_space<vmem>>, vector<1x32x3xf32>
    %1 = vector.shape_cast %0 : vector<1x32x3xf32> to vector<32x3xf32>
    %c0_2 = arith.constant 0 : index
    %c0_3 = arith.constant 0 : index
    %c0_4 = arith.constant 0 : index
    %2 = vector.load %arg3[%c0_2, %c0_3, %c0_4] : memref<1x3x16xf32, #tpu.memory_space<vmem>>, vector<1x3x16xf32>
    %3 = vector.shape_cast %2 : vector<1x3x16xf32> to vector<3x16xf32>
    %c0_5 = arith.constant 0 : index
    %c0_6 = arith.constant 0 : index
    %c0_7 = arith.constant 0 : index
    %4 = vector.load %arg4[%c0_5, %c0_6, %c0_7] : memref<1x16x256xbf16, #tpu.memory_space<vmem>>, vector<1x16x256xbf16>
    %5 = vector.shape_cast %4 : vector<1x16x256xbf16> to vector<16x256xbf16>
    %6 = vector.extract_strided_slice %1 {offsets = [0, 0], sizes = [32, 1], strides = [1, 1]} : vector<32x3xf32> to vector<32x1xf32>
    %7 = vector.extract_strided_slice %3 {offsets = [0, 0], sizes = [1, 16], strides = [1, 1]} : vector<3x16xf32> to vector<1x16xf32>
    %8 = vector.broadcast %6 : vector<32x1xf32> to vector<32x16xf32>
    %9 = vector.broadcast %7 : vector<1x16xf32> to vector<32x16xf32>
    %10 = arith.subf %8, %9 : vector<32x16xf32>
    %11 = vector.extract_strided_slice %1 {offsets = [0, 1], sizes = [32, 1], strides = [1, 1]} : vector<32x3xf32> to vector<32x1xf32>
    %12 = vector.extract_strided_slice %3 {offsets = [1, 0], sizes = [1, 16], strides = [1, 1]} : vector<3x16xf32> to vector<1x16xf32>
    %13 = vector.broadcast %11 : vector<32x1xf32> to vector<32x16xf32>
    %14 = vector.broadcast %12 : vector<1x16xf32> to vector<32x16xf32>
    %15 = arith.subf %13, %14 : vector<32x16xf32>
    %16 = vector.extract_strided_slice %1 {offsets = [0, 2], sizes = [32, 1], strides = [1, 1]} : vector<32x3xf32> to vector<32x1xf32>
    %17 = vector.extract_strided_slice %3 {offsets = [2, 0], sizes = [1, 16], strides = [1, 1]} : vector<3x16xf32> to vector<1x16xf32>
    %18 = vector.broadcast %16 : vector<32x1xf32> to vector<32x16xf32>
    %19 = vector.broadcast %17 : vector<1x16xf32> to vector<32x16xf32>
    %20 = arith.subf %18, %19 : vector<32x16xf32>
    %21 = arith.mulf %10, %10 : vector<32x16xf32>
    %22 = arith.mulf %15, %15 : vector<32x16xf32>
    %23 = arith.addf %21, %22 : vector<32x16xf32>
    %24 = arith.mulf %20, %20 : vector<32x16xf32>
    %25 = arith.addf %23, %24 : vector<32x16xf32>
    %26 = tpu.iota {dimensions = array<i32: 1>} : vector<32x16xi32>
    %cst = arith.constant 0.000000e+00 : f32
    %27 = vector.broadcast %cst : f32 to vector<32x16xf32>
    %cst_8 = arith.constant dense<0x7F800000> : vector<32xf32>
    %28 = vector.multi_reduction <minimumf>, %25, %cst_8 [1] : vector<32x16xf32> to vector<32xf32>
    %29 = vector.shape_cast %28 : vector<32xf32> to vector<32x1xf32>
    %30 = vector.broadcast %29 : vector<32x1xf32> to vector<32x16xf32>
    %31 = arith.cmpf oeq, %25, %30 : vector<32x16xf32>
    %c16_i32 = arith.constant 16 : i32
    %32 = vector.broadcast %c16_i32 : i32 to vector<32x16xi32>
    %33 = arith.select %31, %26, %32 : vector<32x16xi1>, vector<32x16xi32>
    %cst_9 = arith.constant dense<2147483647> : vector<32xi32>
    %34 = vector.multi_reduction <minsi>, %33, %cst_9 [1] : vector<32x16xi32> to vector<32xi32>
    %35 = vector.shape_cast %34 : vector<32xi32> to vector<32x1xi32>
    %36 = vector.broadcast %35 : vector<32x1xi32> to vector<32x16xi32>
    %37 = arith.cmpi eq, %26, %36 : vector<32x16xi32>
    %cst_10 = arith.constant 9.99999993E-9 : f32
    %38 = vector.broadcast %cst_10 : f32 to vector<32x1xf32>
    %39 = arith.addf %29, %38 : vector<32x1xf32>
    %cst_11 = arith.constant 1.000000e+00 : f32
    %40 = vector.broadcast %cst_11 : f32 to vector<32x1xf32>
    %41 = arith.divf %40, %39 : vector<32x1xf32>
    %42 = arith.extui %37 : vector<32x16xi1> to vector<32x16xi32>
    %43 = arith.sitofp %42 : vector<32x16xi32> to vector<32x16xf32>
    %44 = vector.broadcast %41 : vector<32x1xf32> to vector<32x16xf32>
    %45 = arith.mulf %43, %44 : vector<32x16xf32>
    %46 = arith.addf %27, %45 : vector<32x16xf32>
    %cst_12 = arith.constant 0x7F800000 : f32
    %47 = vector.broadcast %cst_12 : f32 to vector<32x16xf32>
    %48 = arith.select %37, %47, %25 : vector<32x16xi1>, vector<32x16xf32>
    %cst_13 = arith.constant dense<0x7F800000> : vector<32xf32>
    %49 = vector.multi_reduction <minimumf>, %48, %cst_13 [1] : vector<32x16xf32> to vector<32xf32>
    %50 = vector.shape_cast %49 : vector<32xf32> to vector<32x1xf32>
    %51 = vector.broadcast %50 : vector<32x1xf32> to vector<32x16xf32>
    %52 = arith.cmpf oeq, %48, %51 : vector<32x16xf32>
    %c16_i32_14 = arith.constant 16 : i32
    %53 = vector.broadcast %c16_i32_14 : i32 to vector<32x16xi32>
    %54 = arith.select %52, %26, %53 : vector<32x16xi1>, vector<32x16xi32>
    %cst_15 = arith.constant dense<2147483647> : vector<32xi32>
    %55 = vector.multi_reduction <minsi>, %54, %cst_15 [1] : vector<32x16xi32> to vector<32xi32>
    %56 = vector.shape_cast %55 : vector<32xi32> to vector<32x1xi32>
    %57 = vector.broadcast %56 : vector<32x1xi32> to vector<32x16xi32>
    %58 = arith.cmpi eq, %26, %57 : vector<32x16xi32>
    %cst_16 = arith.constant 9.99999993E-9 : f32
    %59 = vector.broadcast %cst_16 : f32 to vector<32x1xf32>
    %60 = arith.addf %50, %59 : vector<32x1xf32>
    %cst_17 = arith.constant 1.000000e+00 : f32
    %61 = vector.broadcast %cst_17 : f32 to vector<32x1xf32>
    %62 = arith.divf %61, %60 : vector<32x1xf32>
    %63 = arith.extui %58 : vector<32x16xi1> to vector<32x16xi32>
    %64 = arith.sitofp %63 : vector<32x16xi32> to vector<32x16xf32>
    %65 = vector.broadcast %62 : vector<32x1xf32> to vector<32x16xf32>
    %66 = arith.mulf %64, %65 : vector<32x16xf32>
    %67 = arith.addf %46, %66 : vector<32x16xf32>
    %cst_18 = arith.constant 0x7F800000 : f32
    %68 = vector.broadcast %cst_18 : f32 to vector<32x16xf32>
    %69 = arith.select %58, %68, %48 : vector<32x16xi1>, vector<32x16xf32>
    %cst_19 = arith.constant dense<0x7F800000> : vector<32xf32>
    %70 = vector.multi_reduction <minimumf>, %69, %cst_19 [1] : vector<32x16xf32> to vector<32xf32>
    %71 = vector.shape_cast %70 : vector<32xf32> to vector<32x1xf32>
    %72 = vector.broadcast %71 : vector<32x1xf32> to vector<32x16xf32>
    %73 = arith.cmpf oeq, %69, %72 : vector<32x16xf32>
    %c16_i32_20 = arith.constant 16 : i32
    %74 = vector.broadcast %c16_i32_20 : i32 to vector<32x16xi32>
    %75 = arith.select %73, %26, %74 : vector<32x16xi1>, vector<32x16xi32>
    %cst_21 = arith.constant dense<2147483647> : vector<32xi32>
    %76 = vector.multi_reduction <minsi>, %75, %cst_21 [1] : vector<32x16xi32> to vector<32xi32>
    %77 = vector.shape_cast %76 : vector<32xi32> to vector<32x1xi32>
    %78 = vector.broadcast %77 : vector<32x1xi32> to vector<32x16xi32>
    %79 = arith.cmpi eq, %26, %78 : vector<32x16xi32>
    %cst_22 = arith.constant 9.99999993E-9 : f32
    %80 = vector.broadcast %cst_22 : f32 to vector<32x1xf32>
    %81 = arith.addf %71, %80 : vector<32x1xf32>
    %cst_23 = arith.constant 1.000000e+00 : f32
    %82 = vector.broadcast %cst_23 : f32 to vector<32x1xf32>
    %83 = arith.divf %82, %81 : vector<32x1xf32>
    %84 = arith.extui %79 : vector<32x16xi1> to vector<32x16xi32>
    %85 = arith.sitofp %84 : vector<32x16xi32> to vector<32x16xf32>
    %86 = vector.broadcast %83 : vector<32x1xf32> to vector<32x16xf32>
    %87 = arith.mulf %85, %86 : vector<32x16xf32>
    %88 = arith.addf %67, %87 : vector<32x16xf32>
    %cst_24 = arith.constant dense<0.000000e+00> : vector<32xf32>
    %89 = vector.multi_reduction <add>, %88, %cst_24 [1] : vector<32x16xf32> to vector<32xf32>
    %90 = vector.shape_cast %89 : vector<32xf32> to vector<32x1xf32>
    %91 = tpu.reciprocal %90 {approx = true} : vector<32x1xf32> -> vector<32x1xf32>
    %92 = vector.broadcast %91 : vector<32x1xf32> to vector<32x16xf32>
    %93 = arith.mulf %88, %92 : vector<32x16xf32>
    %94 = arith.truncf %93 : vector<32x16xf32> to vector<32x16xbf16>
    %cst_25 = arith.constant dense<0.000000e+00> : vector<32x256xf32>
    %95 = tpu.matmul %94, %5, %cst_25 {dimension_numbers = #tpu.dot_dimension_numbers<[1], [0], [0], [1], [0, 0, 1, 1], [], []>} : vector<32x16xbf16>, vector<16x256xbf16>, vector<32x256xf32> -> vector<32x256xf32>
    %96 = arith.truncf %95 : vector<32x256xf32> to vector<32x256xbf16>
    %c0_26 = arith.constant 0 : index
    %c0_27 = arith.constant 0 : index
    %97 = vector.load %arg6[%c0_26, %c0_27] : memref<256x256xbf16, #tpu.memory_space<vmem>>, vector<256x256xbf16>
    %cst_28 = arith.constant dense<0.000000e+00> : vector<32x256xf32>
    %98 = tpu.matmul %96, %97, %cst_28 {dimension_numbers = #tpu.dot_dimension_numbers<[1], [0], [0], [1], [0, 0, 1, 1], [], []>} : vector<32x256xbf16>, vector<256x256xbf16>, vector<32x256xf32> -> vector<32x256xf32>
    %c0_29 = arith.constant 0 : index
    %c0_30 = arith.constant 0 : index
    %c0_31 = arith.constant 0 : index
    %99 = vector.load %arg5[%c0_29, %c0_30, %c0_31] : memref<1x32x64xbf16, #tpu.memory_space<vmem>>, vector<1x32x64xbf16>
    %100 = vector.shape_cast %99 : vector<1x32x64xbf16> to vector<32x64xbf16>
    %c0_32 = arith.constant 0 : index
    %c0_33 = arith.constant 0 : index
    %101 = vector.load %arg7[%c0_32, %c0_33] : memref<64x256xbf16, #tpu.memory_space<vmem>>, vector<64x256xbf16>
    %cst_34 = arith.constant dense<0.000000e+00> : vector<32x256xf32>
    %102 = tpu.matmul %100, %101, %cst_34 {dimension_numbers = #tpu.dot_dimension_numbers<[1], [0], [0], [1], [0, 0, 1, 1], [], []>} : vector<32x64xbf16>, vector<64x256xbf16>, vector<32x256xf32> -> vector<32x256xf32>
    %103 = arith.addf %98, %102 : vector<32x256xf32>
    %c0_35 = arith.constant 0 : index
    %c0_36 = arith.constant 0 : index
    %104 = vector.load %arg8[%c0_35, %c0_36] : memref<1x256xf32, #tpu.memory_space<vmem>>, vector<1x256xf32>
    %105 = vector.broadcast %104 : vector<1x256xf32> to vector<32x256xf32>
    %106 = arith.addf %103, %105 : vector<32x256xf32>
    %cst_37 = arith.constant 0.000000e+00 : f32
    %107 = vector.broadcast %cst_37 : f32 to vector<32x256xf32>
    %108 = arith.maximumf %106, %107 : vector<32x256xf32>
    %109 = arith.truncf %108 : vector<32x256xf32> to vector<32x256xbf16>
    %c0_38 = arith.constant 0 : index
    %c0_39 = arith.constant 0 : index
    %110 = vector.load %arg9[%c0_38, %c0_39] : memref<256x128xbf16, #tpu.memory_space<vmem>>, vector<256x128xbf16>
    %cst_40 = arith.constant dense<0.000000e+00> : vector<32x128xf32>
    %111 = tpu.matmul %109, %110, %cst_40 {dimension_numbers = #tpu.dot_dimension_numbers<[1], [0], [0], [1], [0, 0, 1, 1], [], []>} : vector<32x256xbf16>, vector<256x128xbf16>, vector<32x128xf32> -> vector<32x128xf32>
    %c0_41 = arith.constant 0 : index
    %c0_42 = arith.constant 0 : index
    %112 = vector.load %arg10[%c0_41, %c0_42] : memref<1x128xf32, #tpu.memory_space<vmem>>, vector<1x128xf32>
    %113 = vector.broadcast %112 : vector<1x128xf32> to vector<32x128xf32>
    %114 = arith.addf %111, %113 : vector<32x128xf32>
    %cst_43 = arith.constant 0.000000e+00 : f32
    %115 = vector.broadcast %cst_43 : f32 to vector<32x128xf32>
    %116 = arith.maximumf %114, %115 : vector<32x128xf32>
    %117 = arith.truncf %116 : vector<32x128xf32> to vector<32x128xbf16>
    %c0_44 = arith.constant 0 : index
    %c0_45 = arith.constant 0 : index
    %c0_46 = arith.constant 0 : index
    %118 = vector.load %arg11[%c0_44, %c0_45, %c0_46] : memref<1x32x128xbf16, #tpu.memory_space<vmem>>, vector<1x32x128xbf16>
    %119 = vector.shape_cast %118 : vector<1x32x128xbf16> to vector<32x128xbf16>
    %120 = vector.shape_cast %117 : vector<32x128xbf16> to vector<1x32x128xbf16>
    tpu.vector_store %arg11[%c0_44, %c0_45, %c0_46], %120 {strides = array<i32>} : memref<1x32x128xbf16, #tpu.memory_space<vmem>>, vector<1x32x128xbf16>,
    return
  }
  func.func @transform_0(%arg0: i32, %arg1: i32) -> (i32, i32, i32) {
    %c0_i32 = arith.constant 0 : i32
    %c0_i32_0 = arith.constant 0 : i32
    return %arg0, %arg1, %c0_i32 : i32, i32, i32
  }
  func.func @transform_1(%arg0: i32, %arg1: i32) -> (i32, i32, i32) {
    %c0_i32 = arith.constant 0 : i32
    %c0_i32_0 = arith.constant 0 : i32
    %c0_i32_1 = arith.constant 0 : i32
    return %arg0, %c0_i32, %c0_i32_0 : i32, i32, i32
  }
  func.func @transform_2(%arg0: i32, %arg1: i32) -> (i32, i32, i32) {
    %c0_i32 = arith.constant 0 : i32
    %c0_i32_0 = arith.constant 0 : i32
    %c0_i32_1 = arith.constant 0 : i32
    return %arg0, %c0_i32, %c0_i32_0 : i32, i32, i32
  }
  func.func @transform_3(%arg0: i32, %arg1: i32) -> (i32, i32, i32) {
    %c0_i32 = arith.constant 0 : i32
    %c0_i32_0 = arith.constant 0 : i32
    return %arg0, %arg1, %c0_i32 : i32, i32, i32
  }
  func.func @transform_4(%arg0: i32, %arg1: i32) -> (i32, i32) {
    %c0_i32 = arith.constant 0 : i32
    %c0_i32_0 = arith.constant 0 : i32
    %c0_i32_1 = arith.constant 0 : i32
    return %c0_i32, %c0_i32_0 : i32, i32
  }
  func.func @transform_5(%arg0: i32, %arg1: i32) -> (i32, i32) {
    %c0_i32 = arith.constant 0 : i32
    %c0_i32_0 = arith.constant 0 : i32
    %c0_i32_1 = arith.constant 0 : i32
    return %c0_i32, %c0_i32_0 : i32, i32
  }
  func.func @transform_6(%arg0: i32, %arg1: i32) -> (i32, i32) {
    %c0_i32 = arith.constant 0 : i32
    %c0_i32_0 = arith.constant 0 : i32
    %c0_i32_1 = arith.constant 0 : i32
    return %c0_i32, %c0_i32_0 : i32, i32
  }
  func.func @transform_7(%arg0: i32, %arg1: i32) -> (i32, i32) {
    %c0_i32 = arith.constant 0 : i32
    %c0_i32_0 = arith.constant 0 : i32
    %c0_i32_1 = arith.constant 0 : i32
    return %c0_i32, %c0_i32_0 : i32, i32
  }
  func.func @transform_8(%arg0: i32, %arg1: i32) -> (i32, i32) {
    %c0_i32 = arith.constant 0 : i32
    %c0_i32_0 = arith.constant 0 : i32
    %c0_i32_1 = arith.constant 0 : i32
    return %c0_i32, %c0_i32_0 : i32, i32
  }
  func.func @transform_9(%arg0: i32, %arg1: i32) -> (i32, i32, i32) {
    %c0_i32 = arith.constant 0 : i32
    %c0_i32_0 = arith.constant 0 : i32
    return %arg0, %arg1, %c0_i32 : i32, i32, i32
  }
}

module attributes {stable_mosaic.version = 11 : i64} {
  func.func @kernel(%arg0: i32, %arg1: i32, %arg2: memref<1x64x3xf32, #tpu.memory_space<vmem>>, %arg3: memref<1x3x32xf32, #tpu.memory_space<vmem>>, %arg4: memref<1x32x128xbf16, #tpu.memory_space<vmem>>, %arg5: memref<128x128xbf16, #tpu.memory_space<vmem>>, %arg6: memref<1x128xf32, #tpu.memory_space<vmem>>, %arg7: memref<128x128xbf16, #tpu.memory_space<vmem>>, %arg8: memref<1x128xf32, #tpu.memory_space<vmem>>, %arg9: memref<128x128xbf16, #tpu.memory_space<vmem>>, %arg10: memref<1x128xf32, #tpu.memory_space<vmem>>, %arg11: memref<128x128xbf16, #tpu.memory_space<vmem>>, %arg12: memref<1x128xf32, #tpu.memory_space<vmem>>, %arg13: memref<128x128xbf16, #tpu.memory_space<vmem>>, %arg14: memref<1x128xf32, #tpu.memory_space<vmem>>, %arg15: memref<1x64x128xf32, #tpu.memory_space<vmem>>) attributes {dimension_semantics = [#tpu.dimension_semantics<parallel>, #tpu.dimension_semantics<parallel>], iteration_bounds = array<i64: 2, 1>, scalar_prefetch = 0 : i64, scratch_operands = 0 : i64, tpu.core_type = #tpu.core_type<tc>, window_params = [{transform_indices = @transform_0, window_bounds = array<i64: 1, 64, 3>}, {transform_indices = @transform_1, window_bounds = array<i64: 1, 3, 32>}, {transform_indices = @transform_2, window_bounds = array<i64: 1, 32, 128>}, {pipeline_mode = #tpu.pipeline_mode<synchronous>, transform_indices = @transform_3, window_bounds = array<i64: 128, 128>}, {pipeline_mode = #tpu.pipeline_mode<synchronous>, transform_indices = @transform_4, window_bounds = array<i64: 1, 128>}, {pipeline_mode = #tpu.pipeline_mode<synchronous>, transform_indices = @transform_5, window_bounds = array<i64: 128, 128>}, {pipeline_mode = #tpu.pipeline_mode<synchronous>, transform_indices = @transform_6, window_bounds = array<i64: 1, 128>}, {pipeline_mode = #tpu.pipeline_mode<synchronous>, transform_indices = @transform_7, window_bounds = array<i64: 128, 128>}, {pipeline_mode = #tpu.pipeline_mode<synchronous>, transform_indices = @transform_8, window_bounds = array<i64: 1, 128>}, {pipeline_mode = #tpu.pipeline_mode<synchronous>, transform_indices = @transform_9, window_bounds = array<i64: 128, 128>}, {pipeline_mode = #tpu.pipeline_mode<synchronous>, transform_indices = @transform_10, window_bounds = array<i64: 1, 128>}, {pipeline_mode = #tpu.pipeline_mode<synchronous>, transform_indices = @transform_11, window_bounds = array<i64: 128, 128>}, {pipeline_mode = #tpu.pipeline_mode<synchronous>, transform_indices = @transform_12, window_bounds = array<i64: 1, 128>}, {transform_indices = @transform_13, window_bounds = array<i64: 1, 64, 128>}]} {
    %c0 = arith.constant 0 : index
    %c0_0 = arith.constant 0 : index
    %c0_1 = arith.constant 0 : index
    %0 = vector.load %arg2[%c0, %c0_0, %c0_1] : memref<1x64x3xf32, #tpu.memory_space<vmem>>, vector<1x64x3xf32>
    %1 = vector.shape_cast %0 : vector<1x64x3xf32> to vector<64x3xf32>
    %c0_2 = arith.constant 0 : index
    %c0_3 = arith.constant 0 : index
    %c0_4 = arith.constant 0 : index
    %2 = vector.load %arg3[%c0_2, %c0_3, %c0_4] : memref<1x3x32xf32, #tpu.memory_space<vmem>>, vector<1x3x32xf32>
    %3 = vector.shape_cast %2 : vector<1x3x32xf32> to vector<3x32xf32>
    %c0_5 = arith.constant 0 : index
    %c0_6 = arith.constant 0 : index
    %c0_7 = arith.constant 0 : index
    %4 = vector.load %arg4[%c0_5, %c0_6, %c0_7] : memref<1x32x128xbf16, #tpu.memory_space<vmem>>, vector<1x32x128xbf16>
    %5 = vector.shape_cast %4 : vector<1x32x128xbf16> to vector<32x128xbf16>
    %6 = vector.extract_strided_slice %1 {offsets = [0, 0], sizes = [64, 1], strides = [1, 1]} : vector<64x3xf32> to vector<64x1xf32>
    %7 = vector.extract_strided_slice %3 {offsets = [0, 0], sizes = [1, 32], strides = [1, 1]} : vector<3x32xf32> to vector<1x32xf32>
    %8 = vector.broadcast %6 : vector<64x1xf32> to vector<64x32xf32>
    %9 = vector.broadcast %7 : vector<1x32xf32> to vector<64x32xf32>
    %10 = arith.subf %8, %9 : vector<64x32xf32>
    %11 = vector.extract_strided_slice %1 {offsets = [0, 1], sizes = [64, 1], strides = [1, 1]} : vector<64x3xf32> to vector<64x1xf32>
    %12 = vector.extract_strided_slice %3 {offsets = [1, 0], sizes = [1, 32], strides = [1, 1]} : vector<3x32xf32> to vector<1x32xf32>
    %13 = vector.broadcast %11 : vector<64x1xf32> to vector<64x32xf32>
    %14 = vector.broadcast %12 : vector<1x32xf32> to vector<64x32xf32>
    %15 = arith.subf %13, %14 : vector<64x32xf32>
    %16 = vector.extract_strided_slice %1 {offsets = [0, 2], sizes = [64, 1], strides = [1, 1]} : vector<64x3xf32> to vector<64x1xf32>
    %17 = vector.extract_strided_slice %3 {offsets = [2, 0], sizes = [1, 32], strides = [1, 1]} : vector<3x32xf32> to vector<1x32xf32>
    %18 = vector.broadcast %16 : vector<64x1xf32> to vector<64x32xf32>
    %19 = vector.broadcast %17 : vector<1x32xf32> to vector<64x32xf32>
    %20 = arith.subf %18, %19 : vector<64x32xf32>
    %21 = arith.mulf %10, %10 : vector<64x32xf32>
    %22 = arith.mulf %15, %15 : vector<64x32xf32>
    %23 = arith.addf %21, %22 : vector<64x32xf32>
    %24 = arith.mulf %20, %20 : vector<64x32xf32>
    %25 = arith.addf %23, %24 : vector<64x32xf32>
    %26 = tpu.iota {dimensions = array<i32: 1>} : vector<64x32xi32>
    %cst = arith.constant 0.000000e+00 : f32
    %27 = vector.broadcast %cst : f32 to vector<64x32xf32>
    %cst_8 = arith.constant dense<0x7F800000> : vector<64xf32>
    %28 = vector.multi_reduction <minimumf>, %25, %cst_8 [1] : vector<64x32xf32> to vector<64xf32>
    %29 = vector.shape_cast %28 : vector<64xf32> to vector<64x1xf32>
    %30 = vector.broadcast %29 : vector<64x1xf32> to vector<64x32xf32>
    %31 = arith.cmpf oeq, %25, %30 : vector<64x32xf32>
    %c32_i32 = arith.constant 32 : i32
    %32 = vector.broadcast %c32_i32 : i32 to vector<64x32xi32>
    %33 = arith.select %31, %26, %32 : vector<64x32xi1>, vector<64x32xi32>
    %cst_9 = arith.constant dense<2147483647> : vector<64xi32>
    %34 = vector.multi_reduction <minsi>, %33, %cst_9 [1] : vector<64x32xi32> to vector<64xi32>
    %35 = vector.shape_cast %34 : vector<64xi32> to vector<64x1xi32>
    %36 = vector.broadcast %35 : vector<64x1xi32> to vector<64x32xi32>
    %37 = arith.cmpi eq, %26, %36 : vector<64x32xi32>
    %cst_10 = arith.constant 9.99999993E-9 : f32
    %38 = vector.broadcast %cst_10 : f32 to vector<64x1xf32>
    %39 = arith.addf %29, %38 : vector<64x1xf32>
    %cst_11 = arith.constant 1.000000e+00 : f32
    %40 = vector.broadcast %cst_11 : f32 to vector<64x1xf32>
    %41 = arith.divf %40, %39 : vector<64x1xf32>
    %42 = arith.extui %37 : vector<64x32xi1> to vector<64x32xi32>
    %43 = arith.sitofp %42 : vector<64x32xi32> to vector<64x32xf32>
    %44 = vector.broadcast %41 : vector<64x1xf32> to vector<64x32xf32>
    %45 = arith.mulf %43, %44 : vector<64x32xf32>
    %46 = arith.addf %27, %45 : vector<64x32xf32>
    %cst_12 = arith.constant 0x7F800000 : f32
    %47 = vector.broadcast %cst_12 : f32 to vector<64x32xf32>
    %48 = arith.select %37, %47, %25 : vector<64x32xi1>, vector<64x32xf32>
    %cst_13 = arith.constant dense<0x7F800000> : vector<64xf32>
    %49 = vector.multi_reduction <minimumf>, %48, %cst_13 [1] : vector<64x32xf32> to vector<64xf32>
    %50 = vector.shape_cast %49 : vector<64xf32> to vector<64x1xf32>
    %51 = vector.broadcast %50 : vector<64x1xf32> to vector<64x32xf32>
    %52 = arith.cmpf oeq, %48, %51 : vector<64x32xf32>
    %c32_i32_14 = arith.constant 32 : i32
    %53 = vector.broadcast %c32_i32_14 : i32 to vector<64x32xi32>
    %54 = arith.select %52, %26, %53 : vector<64x32xi1>, vector<64x32xi32>
    %cst_15 = arith.constant dense<2147483647> : vector<64xi32>
    %55 = vector.multi_reduction <minsi>, %54, %cst_15 [1] : vector<64x32xi32> to vector<64xi32>
    %56 = vector.shape_cast %55 : vector<64xi32> to vector<64x1xi32>
    %57 = vector.broadcast %56 : vector<64x1xi32> to vector<64x32xi32>
    %58 = arith.cmpi eq, %26, %57 : vector<64x32xi32>
    %cst_16 = arith.constant 9.99999993E-9 : f32
    %59 = vector.broadcast %cst_16 : f32 to vector<64x1xf32>
    %60 = arith.addf %50, %59 : vector<64x1xf32>
    %cst_17 = arith.constant 1.000000e+00 : f32
    %61 = vector.broadcast %cst_17 : f32 to vector<64x1xf32>
    %62 = arith.divf %61, %60 : vector<64x1xf32>
    %63 = arith.extui %58 : vector<64x32xi1> to vector<64x32xi32>
    %64 = arith.sitofp %63 : vector<64x32xi32> to vector<64x32xf32>
    %65 = vector.broadcast %62 : vector<64x1xf32> to vector<64x32xf32>
    %66 = arith.mulf %64, %65 : vector<64x32xf32>
    %67 = arith.addf %46, %66 : vector<64x32xf32>
    %cst_18 = arith.constant 0x7F800000 : f32
    %68 = vector.broadcast %cst_18 : f32 to vector<64x32xf32>
    %69 = arith.select %58, %68, %48 : vector<64x32xi1>, vector<64x32xf32>
    %cst_19 = arith.constant dense<0x7F800000> : vector<64xf32>
    %70 = vector.multi_reduction <minimumf>, %69, %cst_19 [1] : vector<64x32xf32> to vector<64xf32>
    %71 = vector.shape_cast %70 : vector<64xf32> to vector<64x1xf32>
    %72 = vector.broadcast %71 : vector<64x1xf32> to vector<64x32xf32>
    %73 = arith.cmpf oeq, %69, %72 : vector<64x32xf32>
    %c32_i32_20 = arith.constant 32 : i32
    %74 = vector.broadcast %c32_i32_20 : i32 to vector<64x32xi32>
    %75 = arith.select %73, %26, %74 : vector<64x32xi1>, vector<64x32xi32>
    %cst_21 = arith.constant dense<2147483647> : vector<64xi32>
    %76 = vector.multi_reduction <minsi>, %75, %cst_21 [1] : vector<64x32xi32> to vector<64xi32>
    %77 = vector.shape_cast %76 : vector<64xi32> to vector<64x1xi32>
    %78 = vector.broadcast %77 : vector<64x1xi32> to vector<64x32xi32>
    %79 = arith.cmpi eq, %26, %78 : vector<64x32xi32>
    %cst_22 = arith.constant 9.99999993E-9 : f32
    %80 = vector.broadcast %cst_22 : f32 to vector<64x1xf32>
    %81 = arith.addf %71, %80 : vector<64x1xf32>
    %cst_23 = arith.constant 1.000000e+00 : f32
    %82 = vector.broadcast %cst_23 : f32 to vector<64x1xf32>
    %83 = arith.divf %82, %81 : vector<64x1xf32>
    %84 = arith.extui %79 : vector<64x32xi1> to vector<64x32xi32>
    %85 = arith.sitofp %84 : vector<64x32xi32> to vector<64x32xf32>
    %86 = vector.broadcast %83 : vector<64x1xf32> to vector<64x32xf32>
    %87 = arith.mulf %85, %86 : vector<64x32xf32>
    %88 = arith.addf %67, %87 : vector<64x32xf32>
    %cst_24 = arith.constant dense<0.000000e+00> : vector<64xf32>
    %89 = vector.multi_reduction <add>, %88, %cst_24 [1] : vector<64x32xf32> to vector<64xf32>
    %90 = vector.shape_cast %89 : vector<64xf32> to vector<64x1xf32>
    %91 = tpu.reciprocal %90 {approx = true} : vector<64x1xf32> -> vector<64x1xf32>
    %92 = vector.broadcast %91 : vector<64x1xf32> to vector<64x32xf32>
    %93 = arith.mulf %88, %92 : vector<64x32xf32>
    %94 = arith.truncf %93 : vector<64x32xf32> to vector<64x32xbf16>
    %cst_25 = arith.constant dense<0.000000e+00> : vector<64x128xf32>
    %95 = tpu.matmul %94, %5, %cst_25 {dimension_numbers = #tpu.dot_dimension_numbers<[1], [0], [0], [1], [0, 0, 1, 1], [], []>} : vector<64x32xbf16>, vector<32x128xbf16>, vector<64x128xf32> -> vector<64x128xf32>
    %96 = arith.truncf %95 : vector<64x128xf32> to vector<64x128xbf16>
    %c0_26 = arith.constant 0 : index
    %c0_27 = arith.constant 0 : index
    %97 = vector.load %arg5[%c0_26, %c0_27] : memref<128x128xbf16, #tpu.memory_space<vmem>>, vector<128x128xbf16>
    %cst_28 = arith.constant dense<0.000000e+00> : vector<64x128xf32>
    %98 = tpu.matmul %96, %97, %cst_28 {dimension_numbers = #tpu.dot_dimension_numbers<[1], [0], [0], [1], [0, 0, 1, 1], [], []>} : vector<64x128xbf16>, vector<128x128xbf16>, vector<64x128xf32> -> vector<64x128xf32>
    %c0_29 = arith.constant 0 : index
    %c0_30 = arith.constant 0 : index
    %99 = vector.load %arg6[%c0_29, %c0_30] : memref<1x128xf32, #tpu.memory_space<vmem>>, vector<1x128xf32>
    %100 = vector.broadcast %99 : vector<1x128xf32> to vector<64x128xf32>
    %101 = arith.addf %98, %100 : vector<64x128xf32>
    %cst_31 = arith.constant 0.000000e+00 : f32
    %102 = vector.broadcast %cst_31 : f32 to vector<64x128xf32>
    %103 = arith.maximumf %101, %102 : vector<64x128xf32>
    %104 = arith.truncf %103 : vector<64x128xf32> to vector<64x128xbf16>
    %c0_32 = arith.constant 0 : index
    %c0_33 = arith.constant 0 : index
    %105 = vector.load %arg7[%c0_32, %c0_33] : memref<128x128xbf16, #tpu.memory_space<vmem>>, vector<128x128xbf16>
    %cst_34 = arith.constant dense<0.000000e+00> : vector<64x128xf32>
    %106 = tpu.matmul %104, %105, %cst_34 {dimension_numbers = #tpu.dot_dimension_numbers<[1], [0], [0], [1], [0, 0, 1, 1], [], []>} : vector<64x128xbf16>, vector<128x128xbf16>, vector<64x128xf32> -> vector<64x128xf32>
    %c0_35 = arith.constant 0 : index
    %c0_36 = arith.constant 0 : index
    %107 = vector.load %arg8[%c0_35, %c0_36] : memref<1x128xf32, #tpu.memory_space<vmem>>, vector<1x128xf32>
    %108 = vector.broadcast %107 : vector<1x128xf32> to vector<64x128xf32>
    %109 = arith.addf %106, %108 : vector<64x128xf32>
    %cst_37 = arith.constant 0.000000e+00 : f32
    %110 = vector.broadcast %cst_37 : f32 to vector<64x128xf32>
    %111 = arith.maximumf %109, %110 : vector<64x128xf32>
    %112 = arith.truncf %111 : vector<64x128xf32> to vector<64x128xbf16>
    %c0_38 = arith.constant 0 : index
    %c0_39 = arith.constant 0 : index
    %113 = vector.load %arg9[%c0_38, %c0_39] : memref<128x128xbf16, #tpu.memory_space<vmem>>, vector<128x128xbf16>
    %cst_40 = arith.constant dense<0.000000e+00> : vector<64x128xf32>
    %114 = tpu.matmul %112, %113, %cst_40 {dimension_numbers = #tpu.dot_dimension_numbers<[1], [0], [0], [1], [0, 0, 1, 1], [], []>} : vector<64x128xbf16>, vector<128x128xbf16>, vector<64x128xf32> -> vector<64x128xf32>
    %c0_41 = arith.constant 0 : index
    %c0_42 = arith.constant 0 : index
    %115 = vector.load %arg10[%c0_41, %c0_42] : memref<1x128xf32, #tpu.memory_space<vmem>>, vector<1x128xf32>
    %116 = vector.broadcast %115 : vector<1x128xf32> to vector<64x128xf32>
    %117 = arith.addf %114, %116 : vector<64x128xf32>
    %cst_43 = arith.constant 0.000000e+00 : f32
    %118 = vector.broadcast %cst_43 : f32 to vector<64x128xf32>
    %119 = arith.maximumf %117, %118 : vector<64x128xf32>
    %120 = arith.truncf %119 : vector<64x128xf32> to vector<64x128xbf16>
    %c0_44 = arith.constant 0 : index
    %c0_45 = arith.constant 0 : index
    %121 = vector.load %arg11[%c0_44, %c0_45] : memref<128x128xbf16, #tpu.memory_space<vmem>>, vector<128x128xbf16>
    %cst_46 = arith.constant dense<0.000000e+00> : vector<64x128xf32>
    %122 = tpu.matmul %120, %121, %cst_46 {dimension_numbers = #tpu.dot_dimension_numbers<[1], [0], [0], [1], [0, 0, 1, 1], [], []>} : vector<64x128xbf16>, vector<128x128xbf16>, vector<64x128xf32> -> vector<64x128xf32>
    %c0_47 = arith.constant 0 : index
    %c0_48 = arith.constant 0 : index
    %123 = vector.load %arg12[%c0_47, %c0_48] : memref<1x128xf32, #tpu.memory_space<vmem>>, vector<1x128xf32>
    %124 = vector.broadcast %123 : vector<1x128xf32> to vector<64x128xf32>
    %125 = arith.addf %122, %124 : vector<64x128xf32>
    %cst_49 = arith.constant 0.000000e+00 : f32
    %126 = vector.broadcast %cst_49 : f32 to vector<64x128xf32>
    %127 = arith.maximumf %125, %126 : vector<64x128xf32>
    %128 = arith.truncf %127 : vector<64x128xf32> to vector<64x128xbf16>
    %c0_50 = arith.constant 0 : index
    %c0_51 = arith.constant 0 : index
    %129 = vector.load %arg13[%c0_50, %c0_51] : memref<128x128xbf16, #tpu.memory_space<vmem>>, vector<128x128xbf16>
    %cst_52 = arith.constant dense<0.000000e+00> : vector<64x128xf32>
    %130 = tpu.matmul %128, %129, %cst_52 {dimension_numbers = #tpu.dot_dimension_numbers<[1], [0], [0], [1], [0, 0, 1, 1], [], []>} : vector<64x128xbf16>, vector<128x128xbf16>, vector<64x128xf32> -> vector<64x128xf32>
    %c0_53 = arith.constant 0 : index
    %c0_54 = arith.constant 0 : index
    %131 = vector.load %arg14[%c0_53, %c0_54] : memref<1x128xf32, #tpu.memory_space<vmem>>, vector<1x128xf32>
    %132 = vector.broadcast %131 : vector<1x128xf32> to vector<64x128xf32>
    %133 = arith.addf %130, %132 : vector<64x128xf32>
    %c0_55 = arith.constant 0 : index
    %c0_56 = arith.constant 0 : index
    %c0_57 = arith.constant 0 : index
    %134 = vector.load %arg15[%c0_55, %c0_56, %c0_57] : memref<1x64x128xf32, #tpu.memory_space<vmem>>, vector<1x64x128xf32>
    %135 = vector.shape_cast %134 : vector<1x64x128xf32> to vector<64x128xf32>
    %136 = vector.shape_cast %133 : vector<64x128xf32> to vector<1x64x128xf32>
    tpu.vector_store %arg15[%c0_55, %c0_56, %c0_57], %136 {strides = array<i32>} : memref<1x64x128xf32, #tpu.memory_space<vmem>>, vector<1x64x128xf32>,
    return
  }
  func.func @transform_0(%arg0: i32, %arg1: i32) -> (i32, i32, i32) {
    %c0_i32 = arith.constant 0 : i32
    %c0_i32_0 = arith.constant 0 : i32
    return %arg0, %arg1, %c0_i32 : i32, i32, i32
  }
  func.func @transform_1(%arg0: i32, %arg1: i32) -> (i32, i32, i32) {
    %c0_i32 = arith.constant 0 : i32
    %c0_i32_0 = arith.constant 0 : i32
    %c0_i32_1 = arith.constant 0 : i32
    return %arg0, %c0_i32, %c0_i32_0 : i32, i32, i32
  }
  func.func @transform_2(%arg0: i32, %arg1: i32) -> (i32, i32, i32) {
    %c0_i32 = arith.constant 0 : i32
    %c0_i32_0 = arith.constant 0 : i32
    %c0_i32_1 = arith.constant 0 : i32
    return %arg0, %c0_i32, %c0_i32_0 : i32, i32, i32
  }
  func.func @transform_3(%arg0: i32, %arg1: i32) -> (i32, i32) {
    %c0_i32 = arith.constant 0 : i32
    %c0_i32_0 = arith.constant 0 : i32
    %c0_i32_1 = arith.constant 0 : i32
    return %c0_i32, %c0_i32_0 : i32, i32
  }
  func.func @transform_4(%arg0: i32, %arg1: i32) -> (i32, i32) {
    %c0_i32 = arith.constant 0 : i32
    %c0_i32_0 = arith.constant 0 : i32
    %c0_i32_1 = arith.constant 0 : i32
    return %c0_i32, %c0_i32_0 : i32, i32
  }
  func.func @transform_5(%arg0: i32, %arg1: i32) -> (i32, i32) {
    %c0_i32 = arith.constant 0 : i32
    %c0_i32_0 = arith.constant 0 : i32
    %c0_i32_1 = arith.constant 0 : i32
    return %c0_i32, %c0_i32_0 : i32, i32
  }
  func.func @transform_6(%arg0: i32, %arg1: i32) -> (i32, i32) {
    %c0_i32 = arith.constant 0 : i32
    %c0_i32_0 = arith.constant 0 : i32
    %c0_i32_1 = arith.constant 0 : i32
    return %c0_i32, %c0_i32_0 : i32, i32
  }
  func.func @transform_7(%arg0: i32, %arg1: i32) -> (i32, i32) {
    %c0_i32 = arith.constant 0 : i32
    %c0_i32_0 = arith.constant 0 : i32
    %c0_i32_1 = arith.constant 0 : i32
    return %c0_i32, %c0_i32_0 : i32, i32
  }
  func.func @transform_8(%arg0: i32, %arg1: i32) -> (i32, i32) {
    %c0_i32 = arith.constant 0 : i32
    %c0_i32_0 = arith.constant 0 : i32
    %c0_i32_1 = arith.constant 0 : i32
    return %c0_i32, %c0_i32_0 : i32, i32
  }
  func.func @transform_9(%arg0: i32, %arg1: i32) -> (i32, i32) {
    %c0_i32 = arith.constant 0 : i32
    %c0_i32_0 = arith.constant 0 : i32
    %c0_i32_1 = arith.constant 0 : i32
    return %c0_i32, %c0_i32_0 : i32, i32
  }
  func.func @transform_10(%arg0: i32, %arg1: i32) -> (i32, i32) {
    %c0_i32 = arith.constant 0 : i32
    %c0_i32_0 = arith.constant 0 : i32
    %c0_i32_1 = arith.constant 0 : i32
    return %c0_i32, %c0_i32_0 : i32, i32
  }
  func.func @transform_11(%arg0: i32, %arg1: i32) -> (i32, i32) {
    %c0_i32 = arith.constant 0 : i32
    %c0_i32_0 = arith.constant 0 : i32
    %c0_i32_1 = arith.constant 0 : i32
    return %c0_i32, %c0_i32_0 : i32, i32
  }
  func.func @transform_12(%arg0: i32, %arg1: i32) -> (i32, i32) {
    %c0_i32 = arith.constant 0 : i32
    %c0_i32_0 = arith.constant 0 : i32
    %c0_i32_1 = arith.constant 0 : i32
    return %c0_i32, %c0_i32_0 : i32, i32
  }
  func.func @transform_13(%arg0: i32, %arg1: i32) -> (i32, i32, i32) {
    %c0_i32 = arith.constant 0 : i32
    %c0_i32_0 = arith.constant 0 : i32
    return %arg0, %arg1, %c0_i32 : i32, i32, i32
  }
}

</mosaic_0001>

<bundles_post_ra>
// kernel: decoder_forward.5
= control target key start
LH: loop header
LB: loop body
LE: loop exit
PB: predicated region body
PF: predicated region fallthrough
CT: control target
= control target key end

     0   :  { %s1924_s30 = smov 0   ;;  %s1926_s10 = smov 0   ;;  %s2293_s0 = inlined_call_operand.vmem [shape: f32[2,16,3], index: 0, kind: input, shape index: {}]   ;;  %s2294_s1 = inlined_call_operand.vmem [shape: f32[2,3,8], index: 1, kind: input, shape index: {}]   ;;  %s2295_s2 = inlined_call_operand.vmem [shape: bf16[2,8,256], index: 2, kind: input, shape index: {}]   ;;  %s2296_s3 = inlined_call_operand.vmem [shape: bf16[2,16,128], index: 3, kind: input, shape index: {}]   ;;  %s2297_s4 = inlined_call_operand.vmem [shape: bf16[256,256], index: 4, kind: input, shape index: {}]   ;;  %s2298_s5 = inlined_call_operand.vmem [shape: bf16[128,256], index: 5, kind: input, shape index: {}]   ;;  %s2299_s6 = inlined_call_operand.vmem [shape: f32[1,256], index: 6, kind: input, shape index: {}]   ;;  %s2300_s7 = inlined_call_operand.vmem [shape: bf16[256,256], index: 7, kind: input, shape index: {}]   ;;  %s2301_s8 = inlined_call_operand.vmem [shape: f32[1,256], index: 8, kind: input, shape index: {}]   ;;  %s2302_s9 = inlined_call_operand.vmem [shape: bf16[2,16,256], index: 9, kind: output, shape index: {}]  }
   0x1   :  { %s1928_s11 = smov 0  }
   0x2 LB: > { %s31_s12 = sadd.s32 1, %s1864_s10  ;;  %p1560_p0 = scmp.ge.s32.totalorder %s1868_s11, 1  ;;  %s1868_s11 = sphi %s1928_s11, %s19_s11   ;;  %s1864_s10 = sphi %s1926_s10, %s2304_s10   ;;  %s1860_s30 = sphi %s1924_s30, %s2303_s30  }
   0x3   : > { %p33_p1 = scmp.ge.s32.totalorder %s31_s12, 2  ;;  %p344_p2 = scmp.lt.s32.totalorder %s1868_s11, 3 }
   0x5   : > { %s2306_s12 = smov (%p33_p1, %s31_s12), 0  ;;  %p345_p3 = pnand %p1560_p0, %p344_p2 }
   0x6   : > { %p408_p4 = scmp.lt.s32.totalorder (!%p345_p3), %s1860_s30, 1  ;;  %v1870_v0 = vmov (!%p345_p3), 1   ;;  %v1871_v1 = vmov (!%p345_p3), 0   ;;  %v1872_v4 = vmov (!%p345_p3), 2   ;;  %v462_v5 = vlaneseq (!%p345_p3) }
   0x7   : > { %348 = sbr.rel (%p345_p3) target bundleno = 2312 (0x908), region = 56  ;;  %1704 = vset.pattern.permute.xlu1 (!%p345_p3), %v1870_v0  ;;  %1703 = vset.pattern.permute.xlu0 (!%p345_p3), %v1871_v1  ;;  %vm508_vm0 = vcmask (!%p345_p3), 64512  }
   0x8   : > { %739 = vmatprep.mubr.bf16.mxu0 (!%p345_p3), %v1871_v1  ;;  %920 = vmatprep.mubr.bf16.mxu1 (!%p345_p3), %v1871_v1  ;;  %v463_v6 = vshrl.u32 (!%p345_p3), %v462_v5, 7  ;;  %v1962_v38 = vand.u32 (!%p345_p3), 127, %v462_v5 }
   0xa   : > { %v1954_v7 = vsub.s32 (!%p345_p3), 1, %v463_v6  ;;  %v1956_v8 = vsub.s32 (!%p345_p3), 0, %v463_v6  ;;  %v492_v14 = vsub.s32 (!%p345_p3), 2, %v463_v6 }
   0xe   : > { %s2308_s30 = smov (!%p408_p4, %s1860_s30), 1 }
   0xf   : > { %s1665_s13 = sshll.u32 %s2308_s30, 4  ;;  %s1563_s17 = sshll.u32 %s2308_s30, 2 }
  0x10   : > { %s415_s16 = scalar_lea.vmem %s2293_s0, %s1665_s13  ;;  %s420_s20 = scalar_lea.vmem %s2294_s1, %s1563_s17 }
  0x11   : > { %v448_v2 = vld [vmem:[%s415_s16] sm:$0xff]  ;;  %v449_v3 = vld [vmem:[%s415_s16 + $0x8] sm:$0xff]  ;;  %s1666_s21 = sshll.u32 %s2308_s30, 3 }
  0x12   : > { %469 = vperm.xlu1 %1704, %v448_v2   ;;  %454 = vperm.xlu0 %1703, %v448_v2   ;;  %v450_v9 = vld [vmem:[%s420_s20] sm:$0x7]  ;;  %s425_s24 = scalar_lea.vmem %s2295_s2, %s1666_s21  ;;  %s2023_s27 = scalar_lea.vmem %s2296_s3, %s1666_s21 }
  0x13   : > { %v479_v10 = vrot.slane %v450_v9, %v1954_v7  ;;  %v465_v12 = vrot.slane %v450_v9, %v1956_v8  ;;  %v493_v21 = vrot.slane %v450_v9, %v492_v14  ;;  %s445_s20 = scalar_lea.vmem %s2302_s9, %s1665_s13 }
  0x16   : > { %473 = vperm.xlu1 %1704, %v449_v3   ;;  %459 = vperm.xlu0 %1703, %v449_v3  }
  0x1a   : > { %1706 = vset.pattern.permute.xlu1 %v1872_v4  ;;  %1705 = vset.pattern.permute.xlu0 %v1872_v4 }
  0x1b   : > { %487 = vperm.xlu1 %1706, %v449_v3   ;;  %483 = vperm.xlu0 %1705, %v448_v2  }
  0x91   : > { %v470_v11 = vpop.permute.xlu1 %469  ;;  %v455_v13 = vpop.permute.xlu0 %454 }
  0x92   : > { %v480_v15 = vsub.f32 %v470_v11, %v479_v10  ;;  %v466_v16 = vsub.f32 %v455_v13, %v465_v12 }
  0x94   : > { %v498_v22 = vmul.f32 %v480_v15, %v480_v15  ;;  %v496_v23 = vmul.f32 %v466_v16, %v466_v16 }
  0x95   : > { %v474_v17 = vpop.permute.xlu1 %473  ;;  %v460_v18 = vpop.permute.xlu0 %459 }
  0x96   : > { %v481_v19 = vsub.f32 %v474_v17, %v479_v10  ;;  %v467_v20 = vsub.f32 %v460_v18, %v465_v12  ;;  %v500_v30 = vadd.f32 %v498_v22, %v496_v23 }
  0x98   : > { %v499_v24 = vmul.f32 %v481_v19, %v481_v19  ;;  %v497_v25 = vmul.f32 %v467_v20, %v467_v20 }
  0x9a   : > { %v488_v26 = vpop.permute.xlu1 %487  ;;  %v484_v27 = vpop.permute.xlu0 %483  ;;  %v501_v31 = vadd.f32 %v499_v24, %v497_v25 }
  0x9b   : > { %v495_v28 = vsub.f32 %v488_v26, %v493_v21  ;;  %v494_v29 = vsub.f32 %v484_v27, %v493_v21 }
  0x9d   : > { %v503_v32 = vmul.f32 %v495_v28, %v495_v28  ;;  %v502_v33 = vmul.f32 %v494_v29, %v494_v29 }
  0x9f   : > { %v505_v34 = vadd.f32 %v503_v32, %v501_v31  ;;  %v504_v35 = vadd.f32 %v502_v33, %v500_v30 }
  0xa1   : > { %v512_v36 = vsel %vm508_vm0, %v505_v34, inf  ;;  %v509_v37 = vsel %vm508_vm0, %v504_v35, inf }
  0xa2   : > { %513 = vmin.xlane.f32.xlu0 %v512_v36  ;;  %510 = vmin.xlane.f32.xlu1 %v509_v37 }
 0x12f   : > { %v1964_v39 = vpop.xlane.xlu1 %510  ;;  %v1966_v40 = vpop.xlane.xlu0 %513 }
 0x130   : > { %vm515_vm1 = vcmp.eq.f32.partialorder %v504_v35, %v1964_v39  ;;  %vm516_vm2 = vcmp.eq.f32.partialorder %v505_v34, %v1966_v40  ;;  %v551_v27 = vadd.f32 1e-08, %v1964_v39  ;;  %v552_v28 = vadd.f32 1e-08, %v1966_v40 }
 0x131   : > { %v517_v41 = vsel %vm515_vm1, %v1962_v38, 8  ;;  %v518_v42 = vsel %vm516_vm2, %v1962_v38, 8 }
 0x132   : > { %v519_v43 = vsel %vm508_vm0, %v517_v41, 2147483647  ;;  %v534_v44 = vsel %vm508_vm0, %v518_v42, 2147483647  ;;  %1830 = vrcp.f32 %v551_v27  ;;  %v1873_v42 = vmov 0.0  }
 0x133   : > { %v521_v45 = vshra.s32 %v519_v43, 16  ;;  %v536_v46 = vshra.s32 %v534_v44, 16  ;;  %v535_v49 = vand.u32 65535, %v534_v44  ;;  %v520_v50 = vand.u32 65535, %v519_v43 }
 0x134   : > { %1832 = vrcp.f32 %v552_v28 }
 0x135   : > { %v523_v47 = vcvt.s32.f32 %v521_v45  ;;  %v538_v48 = vcvt.s32.f32 %v536_v46  ;;  %v537_v53 = vcvt.s32.f32 %v535_v49  ;;  %v522_v54 = vcvt.s32.f32 %v520_v50 }
 0x137   : > { %524 = vmin.xlane.f32.xlu0 %v523_v47  ;;  %539 = vmin.xlane.f32.xlu1 %v538_v48 }
 0x13c   : > { %v1831_v43 = vpop.eup %1830 }
 0x13e   : > { %v1833_v46 = vpop.eup %1832 }
 0x1c4   : > { %v540_v51 = vpop.xlane.xlu1 %539  ;;  %v525_v52 = vpop.xlane.xlu0 %524 }
 0x1c5   : > { %vm541_vm3 = vcmp.eq.f32.partialorder %v538_v48, %v540_v51  ;;  %vm526_vm4 = vcmp.eq.f32.partialorder %v523_v47, %v525_v52  ;;  %v546_v57 = vcvt.f32.s32 %v540_v51  ;;  %v531_v58 = vcvt.f32.s32 %v525_v52 }
 0x1c6   : > { %v542_v55 = vsel %vm541_vm3, %v537_v53, inf  ;;  %v527_v56 = vsel %vm526_vm4, %v522_v54, inf  ;;  %vm700_vm4 = vcmask 1043456  }
 0x1c7   : > { %543 = vmin.xlane.f32.xlu1 %v542_v55  ;;  %528 = vmin.xlane.f32.xlu0 %v527_v56  ;;  %v547_v61 = vshll.u32 %v546_v57, 16  ;;  %v532_v62 = vshll.u32 %v531_v58, 16 }
 0x254   : > { %v544_v59 = vpop.xlane.xlu1 %543  ;;  %v529_v60 = vpop.xlane.xlu0 %528 }
 0x255   : > { %v545_v63 = vcvt.f32.s32 %v544_v59  ;;  %v530_v0 = vcvt.f32.s32 %v529_v60 }
 0x257   : > { %v548_v1 = vadd.s32 %v547_v61, %v545_v63  ;;  %v533_v2 = vadd.s32 %v532_v62, %v530_v0 }
 0x259   : > { %vm550_vm5 = vcmp.eq.s32.totalorder %v1962_v38, %v548_v1  ;;  %vm549_vm6 = vcmp.eq.s32.totalorder %v1962_v38, %v533_v2 }
 0x25a   : > { %v566_v3 = vsel %vm550_vm5, inf, %v505_v34  ;;  %v565_v4 = vsel %vm549_vm6, inf, %v504_v35  ;;  %v1571_v39 = vsel %vm550_vm5, 1.0, %v1873_v42  ;;  %v1570_v40 = vsel %vm549_vm6, 1.0, %v1873_v42 }
 0x25b   : > { %v570_v5 = vsel %vm508_vm0, %v566_v3, inf  ;;  %v567_v6 = vsel %vm508_vm0, %v565_v4, inf  ;;  %v562_v48 = vmul.f32 %v1833_v46, %v1571_v39  ;;  %v561_v49 = vmul.f32 %v1831_v43, %v1570_v40  ;;  %v1709_v43 = vld [vmem:[%s2298_s5 + $0x4] ss:$8 sps:$4 sm:$0xff]   ;;  %v1714_v46 = vld [vmem:[%s2298_s5 + $0x10] ss:$8 sps:$4 sm:$0xff]  }
 0x25c   : > { %571 = vmin.xlane.f32.xlu1 %v570_v5  ;;  %568 = vmin.xlane.f32.xlu0 %v567_v6 }
 0x25d   : > { %888 = vmatprep.subr.bf16.mxu1 %v1709_v43  ;;  %v1793_v43 = vld [vmem:[%s2300_s7 + $0x34] ss:$8 sps:$4 sm:$0xff]  }
 0x2e9   : > { %v572_v9 = vpop.xlane.xlu1 %571  ;;  %v569_v10 = vpop.xlane.xlu0 %568 }
 0x2ea   : > { %vm574_vm7 = vcmp.eq.f32.partialorder %v566_v3, %v572_v9  ;;  %vm573_vm8 = vcmp.eq.f32.partialorder %v565_v4, %v569_v10  ;;  %v610_v29 = vadd.f32 1e-08, %v572_v9  ;;  %v609_v30 = vadd.f32 1e-08, %v569_v10 }
 0x2eb   : > { %v576_v11 = vsel %vm574_vm7, %v1962_v38, 8  ;;  %v575_v12 = vsel %vm573_vm8, %v1962_v38, 8 }
 0x2ec   : > { %v592_v13 = vsel %vm508_vm0, %v576_v11, 2147483647  ;;  %v577_v14 = vsel %vm508_vm0, %v575_v12, 2147483647  ;;  %1834 = vrcp.f32 %v610_v29 }
 0x2ed   : > { %v594_v15 = vshra.s32 %v592_v13, 16  ;;  %v579_v16 = vshra.s32 %v577_v14, 16  ;;  %v593_v19 = vand.u32 65535, %v592_v13  ;;  %v578_v20 = vand.u32 65535, %v577_v14 }
 0x2ee   : > { %1836 = vrcp.f32 %v609_v30 }
 0x2ef   : > { %v596_v17 = vcvt.s32.f32 %v594_v15  ;;  %v581_v18 = vcvt.s32.f32 %v579_v16  ;;  %v595_v23 = vcvt.s32.f32 %v593_v19  ;;  %v580_v24 = vcvt.s32.f32 %v578_v20 }
 0x2f1   : > { %597 = vmin.xlane.f32.xlu1 %v596_v17  ;;  %582 = vmin.xlane.f32.xlu0 %v581_v18 }
 0x2f6   : > { %v1835_v47 = vpop.eup %1834 }
 0x2f8   : > { %v1837_v50 = vpop.eup %1836 }
 0x37e   : > { %v598_v21 = vpop.xlane.xlu1 %597  ;;  %v583_v22 = vpop.xlane.xlu0 %582 }
 0x37f   : > { %vm599_vm9 = vcmp.eq.f32.partialorder %v596_v17, %v598_v21  ;;  %vm584_vm10 = vcmp.eq.f32.partialorder %v581_v18, %v583_v22  ;;  %v604_v31 = vcvt.f32.s32 %v598_v21  ;;  %v589_v32 = vcvt.f32.s32 %v583_v22 }
 0x380   : > { %v600_v25 = vsel %vm599_vm9, %v595_v23, inf  ;;  %v585_v26 = vsel %vm584_vm10, %v580_v24, inf }
 0x381   : > { %601 = vmin.xlane.f32.xlu1 %v600_v25  ;;  %586 = vmin.xlane.f32.xlu0 %v585_v26  ;;  %v605_v35 = vshll.u32 %v604_v31, 16  ;;  %v590_v36 = vshll.u32 %v589_v32, 16 }
 0x40e   : > { %v602_v33 = vpop.xlane.xlu1 %601  ;;  %v587_v34 = vpop.xlane.xlu0 %586 }
 0x40f   : > { %v603_v37 = vcvt.f32.s32 %v602_v33  ;;  %v588_v41 = vcvt.f32.s32 %v587_v34 }
 0x411   : > { %v606_v44 = vadd.s32 %v605_v35, %v603_v37  ;;  %v591_v45 = vadd.s32 %v590_v36, %v588_v41 }
 0x413   : > { %vm608_vm11 = vcmp.eq.s32.totalorder %v1962_v38, %v606_v44  ;;  %vm607_vm12 = vcmp.eq.s32.totalorder %v1962_v38, %v591_v45  ;;  %v1711_v44 = vld [vmem:[%s2298_s5] ss:$8 sps:$4 sm:$0xff]   ;;  %v1712_v45 = vld [vmem:[%s2298_s5 + $0x14] ss:$8 sps:$4 sm:$0xff]  }
 0x414   : > { %v624_v51 = vsel %vm608_vm11, inf, %v566_v3  ;;  %v1573_v52 = vsel %vm608_vm11, 1.0, %v1873_v42  ;;  %v623_v53 = vsel %vm607_vm12, inf, %v565_v4  ;;  %v1572_v54 = vsel %vm607_vm12, 1.0, %v1873_v42  ;;  %889 = vmatpush1.bf16.msra.mxu1 %v1711_v44  ;;  %v1791_v44 = vld [vmem:[%s2300_s7 + $0x30] ss:$8 sps:$4 sm:$0xff]  }
 0x415   : > { %v628_v55 = vsel %vm508_vm0, %v624_v51, inf  ;;  %v620_v56 = vmul.f32 %v1835_v47, %v1573_v52  ;;  %v625_v57 = vsel %vm508_vm0, %v623_v53, inf  ;;  %v619_v58 = vmul.f32 %v1837_v50, %v1572_v54  ;;  %890 = vmatprep.subr.bf16.mxu1 %v1712_v45  ;;  %v1715_v47 = vld [vmem:[%s2298_s5 + $0x24] ss:$8 sps:$4 sm:$0xff]   ;;  %v1720_v50 = vld [vmem:[%s2298_s5 + $0x30] ss:$8 sps:$4 sm:$0xff]  }
 0x416   : > { %629 = vmin.xlane.f32.xlu1 %v628_v55  ;;  %626 = vmin.xlane.f32.xlu0 %v625_v57  ;;  %v1723_v52 = vld [vmem:[%s2298_s5 + $0x40] ss:$8 sps:$4 sm:$0xff]   ;;  %v1726_v54 = vld [vmem:[%s2298_s5 + $0x50] ss:$8 sps:$4 sm:$0xff]   ;;  %v1727_v55 = vld [vmem:[%s2298_s5 + $0x64] ss:$8 sps:$4 sm:$0xff]  }
 0x417   : > { %v622_v59 = vadd.f32 %v620_v56, %v562_v48  ;;  %v621_v60 = vadd.f32 %v619_v58, %v561_v49  ;;  %v1717_v48 = vld [vmem:[%s2298_s5 + $0x20] ss:$8 sps:$4 sm:$0xff]   ;;  %v1718_v49 = vld [vmem:[%s2298_s5 + $0x34] ss:$8 sps:$4 sm:$0xff]   ;;  %v1732_v58 = vld [vmem:[%s2298_s5 + $0x70] ss:$8 sps:$4 sm:$0xff]  }
 0x418   : > { %891 = vmatpush1.bf16.msra.mxu1 %v1714_v46  ;;  %v1729_v56 = vld [vmem:[%s2298_s5 + $0x60] ss:$8 sps:$4 sm:$0xff]   ;;  %v1730_v57 = vld [vmem:[%s2298_s5 + $0x74] ss:$8 sps:$4 sm:$0xff]   ;;  %v1796_v45 = vld [vmem:[%s2300_s7 + $0x44] ss:$8 sps:$4 sm:$0xff]  }
 0x419   : > { %892 = vmatprep.subr.bf16.mxu1 %v1715_v47  ;;  %v1794_v46 = vld [vmem:[%s2300_s7 + $0x40] ss:$8 sps:$4 sm:$0xff]   ;;  %v1799_v47 = vld [vmem:[%s2300_s7 + $0x54] ss:$8 sps:$4 sm:$0xff]  }
 0x41c   : > { %893 = vmatpush1.bf16.msra.mxu1 %v1717_v48  ;;  %v1797_v48 = vld [vmem:[%s2300_s7 + $0x50] ss:$8 sps:$4 sm:$0xff]  }
 0x41d   : > { %894 = vmatprep.subr.bf16.mxu1 %v1718_v49  ;;  %v1802_v49 = vld [vmem:[%s2300_s7 + $0x64] ss:$8 sps:$4 sm:$0xff]  }
 0x420   : > { %895 = vmatpush1.bf16.msra.mxu1 %v1720_v50  ;;  %v1800_v50 = vld [vmem:[%s2300_s7 + $0x60] ss:$8 sps:$4 sm:$0xff]  }
 0x4a3   : > { %v630_v61 = vpop.xlane.xlu1 %629  ;;  %v627_v62 = vpop.xlane.xlu0 %626 }
 0x4a4   : > { %vm632_vm13 = vcmp.eq.f32.partialorder %v624_v51, %v630_v61  ;;  %vm631_vm14 = vcmp.eq.f32.partialorder %v623_v53, %v627_v62  ;;  %v668_v17 = vadd.f32 1e-08, %v630_v61  ;;  %v667_v18 = vadd.f32 1e-08, %v627_v62  ;;  %v1721_v51 = vld [vmem:[%s2298_s5 + $0x44] ss:$8 sps:$4 sm:$0xff]  }
 0x4a5   : > { %v634_v63 = vsel %vm632_vm13, %v1962_v38, 8  ;;  %v633_v0 = vsel %vm631_vm14, %v1962_v38, 8  ;;  %896 = vmatprep.subr.bf16.mxu1 %v1721_v51  ;;  %v1724_v53 = vld [vmem:[%s2298_s5 + $0x54] ss:$8 sps:$4 sm:$0xff]   ;;  %v1733_v61 = vld [vmem:[%s2297_s4] ss:$8 sps:$4 sm:$0xff]  }
 0x4a6   : > { %v650_v1 = vsel %vm508_vm0, %v634_v63, 2147483647  ;;  %v635_v2 = vsel %vm508_vm0, %v633_v0, 2147483647  ;;  %1838 = vrcp.f32 %v668_v17  ;;  %897 = vmatpush1.bf16.msra.mxu1 %v1723_v52  ;;  %v1739_v62 = vld [vmem:[%s2297_s4 + $0x14] ss:$8 sps:$4 sm:$0xff]  }
 0x4a7   : > { %v652_v3 = vshra.s32 %v650_v1, 16  ;;  %v637_v4 = vshra.s32 %v635_v2, 16  ;;  %v651_v9 = vand.u32 65535, %v650_v1  ;;  %v636_v10 = vand.u32 65535, %v635_v2  ;;  %898 = vmatprep.subr.bf16.mxu1 %v1724_v53  ;;  %v1737_v63 = vld [vmem:[%s2297_s4 + $0x10] ss:$8 sps:$4 sm:$0xff]  }
 0x4a8   : > { %1840 = vrcp.f32 %v667_v18  ;;  %v1742_v0 = vld [vmem:[%s2297_s4 + $0x24] ss:$8 sps:$4 sm:$0xff]   ;;  %v1740_v1 = vld [vmem:[%s2297_s4 + $0x20] ss:$8 sps:$4 sm:$0xff]   ;;  %v1745_v2 = vld [vmem:[%s2297_s4 + $0x34] ss:$8 sps:$4 sm:$0xff]  }
 0x4a9   : > { %v654_v5 = vcvt.s32.f32 %v652_v3  ;;  %v639_v6 = vcvt.s32.f32 %v637_v4  ;;  %v653_v13 = vcvt.s32.f32 %v651_v9  ;;  %v638_v14 = vcvt.s32.f32 %v636_v10  ;;  %v1743_v3 = vld [vmem:[%s2297_s4 + $0x30] ss:$8 sps:$4 sm:$0xff]   ;;  %v1748_v4 = vld [vmem:[%s2297_s4 + $0x44] ss:$8 sps:$4 sm:$0xff]   ;;  %v1805_v51 = vld [vmem:[%s2300_s7 + $0x74] ss:$8 sps:$4 sm:$0xff]  }
 0x4aa   : > { %899 = vmatpush1.bf16.msra.mxu1 %v1726_v54  ;;  %v1749_v9 = vld [vmem:[%s2297_s4 + $0x50] ss:$8 sps:$4 sm:$0xff]   ;;  %v1754_v10 = vld [vmem:[%s2297_s4 + $0x64] ss:$8 sps:$4 sm:$0xff]   ;;  %v1806_v54 = vld [vmem:[%s2300_s7 + $0x80] ss:$8 sps:$4 sm:$0xff]  }
 0x4ab   : > { %655 = vmin.xlane.f32.xlu1 %v654_v5  ;;  %640 = vmin.xlane.f32.xlu0 %v639_v6  ;;  %v1761_v17 = vld [vmem:[%s2297_s4 + $0x90] ss:$8 sps:$4 sm:$0xff]   ;;  %v1766_v18 = vld [vmem:[%s2297_s4 + $0xa4] ss:$8 sps:$4 sm:$0xff]  }
 0x4ac   : > { %900 = vmatprep.subr.bf16.mxu1 %v1727_v55  ;;  %v1803_v52 = vld [vmem:[%s2300_s7 + $0x70] ss:$8 sps:$4 sm:$0xff]   ;;  %v1808_v53 = vld [vmem:[%s2300_s7 + $0x84] ss:$8 sps:$4 sm:$0xff]   ;;  %v1811_v55 = vld [vmem:[%s2300_s7 + $0x94] ss:$8 sps:$4 sm:$0xff]  }
 0x4ae   : > { %901 = vmatpush1.bf16.msra.mxu1 %v1729_v56  ;;  %v1809_v56 = vld [vmem:[%s2300_s7 + $0x90] ss:$8 sps:$4 sm:$0xff]  }
 0x4af   : > { %902 = vmatprep.subr.bf16.mxu1 %v1730_v57  ;;  %v1814_v57 = vld [vmem:[%s2300_s7 + $0xa4] ss:$8 sps:$4 sm:$0xff]  }
 0x4b0   : > { %v1839_v29 = vpop.eup %1838 }
 0x4b2   : > { %v1841_v30 = vpop.eup %1840  ;;  %903 = vmatpush1.bf16.msra.mxu1 %v1732_v58  ;;  %v1812_v58 = vld [vmem:[%s2300_s7 + $0xa0] ss:$8 sps:$4 sm:$0xff]  }
 0x538   : > { %v656_v11 = vpop.xlane.xlu1 %655  ;;  %v641_v12 = vpop.xlane.xlu0 %640 }
 0x539   : > { %vm657_vm15 = vcmp.eq.f32.partialorder %v654_v5, %v656_v11  ;;  %vm642_vm1 = vcmp.eq.f32.partialorder %v639_v6, %v641_v12  ;;  %v662_v19 = vcvt.f32.s32 %v656_v11  ;;  %v647_v20 = vcvt.f32.s32 %v641_v12  ;;  %v1746_v5 = vld [vmem:[%s2297_s4 + $0x40] ss:$8 sps:$4 sm:$0xff]   ;;  %v1751_v6 = vld [vmem:[%s2297_s4 + $0x54] ss:$8 sps:$4 sm:$0xff]  }
 0x53a   : > { %v658_v15 = vsel %vm657_vm15, %v653_v13, inf  ;;  %v643_v16 = vsel %vm642_vm1, %v638_v14, inf  ;;  %v1752_v11 = vld [vmem:[%s2297_s4 + $0x60] ss:$8 sps:$4 sm:$0xff]   ;;  %v1757_v12 = vld [vmem:[%s2297_s4 + $0x74] ss:$8 sps:$4 sm:$0xff]  }
 0x53b   : > { %659 = vmin.xlane.f32.xlu1 %v658_v15  ;;  %644 = vmin.xlane.f32.xlu0 %v643_v16  ;;  %v663_v23 = vshll.u32 %v662_v19, 16  ;;  %v648_v24 = vshll.u32 %v647_v20, 16  ;;  %v1755_v13 = vld [vmem:[%s2297_s4 + $0x70] ss:$8 sps:$4 sm:$0xff]   ;;  %v1760_v14 = vld [vmem:[%s2297_s4 + $0x84] ss:$8 sps:$4 sm:$0xff]  }
 0x53c   : > { %v1758_v15 = vld [vmem:[%s2297_s4 + $0x80] ss:$8 sps:$4 sm:$0xff]   ;;  %v1763_v16 = vld [vmem:[%s2297_s4 + $0x94] ss:$8 sps:$4 sm:$0xff]  }
 0x53d   : > { %v1764_v19 = vld [vmem:[%s2297_s4 + $0xa0] ss:$8 sps:$4 sm:$0xff]   ;;  %v1769_v20 = vld [vmem:[%s2297_s4 + $0xb4] ss:$8 sps:$4 sm:$0xff]  }
 0x5c8   : > { %v660_v21 = vpop.xlane.xlu1 %659  ;;  %v645_v22 = vpop.xlane.xlu0 %644 }
 0x5c9   : > { %v661_v25 = vcvt.f32.s32 %v660_v21  ;;  %v646_v26 = vcvt.f32.s32 %v645_v22  ;;  %v1767_v21 = vld [vmem:[%s2297_s4 + $0xb0] ss:$8 sps:$4 sm:$0xff]   ;;  %v1772_v22 = vld [vmem:[%s2297_s4 + $0xc4] ss:$8 sps:$4 sm:$0xff]  }
 0x5cb   : > { %v664_v27 = vadd.s32 %v663_v23, %v661_v25  ;;  %v649_v28 = vadd.s32 %v648_v24, %v646_v26  ;;  %v1770_v23 = vld [vmem:[%s2297_s4 + $0xc0] ss:$8 sps:$4 sm:$0xff]   ;;  %v1775_v24 = vld [vmem:[%s2297_s4 + $0xd4] ss:$8 sps:$4 sm:$0xff]   ;;  %v1773_v25 = vld [vmem:[%s2297_s4 + $0xd0] ss:$8 sps:$4 sm:$0xff]  }
 0x5cc   : > { %v1778_v26 = vld [vmem:[%s2297_s4 + $0xe4] ss:$8 sps:$4 sm:$0xff]  }
 0x5cd   : > { %vm666_vm2 = vcmp.eq.s32.totalorder %v1962_v38, %v664_v27  ;;  %vm665_vm3 = vcmp.eq.s32.totalorder %v1962_v38, %v649_v28  ;;  %v451_v38 = vld [vmem:[%s425_s24] sm:$0xff] }
 0x5ce   : > { %v1575_v31 = vsel %vm666_vm2, 1.0, %v1873_v42  ;;  %v1574_v32 = vsel %vm665_vm3, 1.0, %v1873_v42  ;;  %v1577_v42 = vcombine.high %v451_v38, %v451_v38  ;;  %v1576_v39 = vcombine.low %v451_v38, %v451_v38  ;;  %v1776_v27 = vld [vmem:[%s2297_s4 + $0xe0] ss:$8 sps:$4 sm:$0xff]  }
 0x5cf   : > { %v678_v33 = vmul.f32 %v1839_v29, %v1575_v31  ;;  %v677_v34 = vmul.f32 %v1841_v30, %v1574_v32  ;;  %v1782_v38 = vld [vmem:[%s2300_s7] ss:$8 sps:$4 sm:$0xff]  }
 0x5d0   : > { %1578 = vmatprep.subr.msk.bf16.mxu0 %vm700_vm4, %v1577_v42  ;;  %v702_v40 = vsel %vm700_vm4, %v1576_v39, 0  ;;  %v1785_v42 = vld [vmem:[%s2300_s7 + $0x10] ss:$8 sps:$4 sm:$0xff]   ;;  %v1790_v39 = vld [vmem:[%s2300_s7 + $0x24] ss:$8 sps:$4 sm:$0xff]  }
 0x5d1   : > { %v2008_v35 = vadd.f32 %v678_v33, %v622_v59  ;;  %v2010_v36 = vadd.f32 %v677_v34, %v621_v60  ;;  %708 = vmatpush1.bf16.msra.mxu0 %v702_v40  ;;  %v1735_v59 = vld [vmem:[%s2297_s4 + $0x4] ss:$8 sps:$4 sm:$0xff]   ;;  %v1788_v40 = vld [vmem:[%s2300_s7 + $0x20] ss:$8 sps:$4 sm:$0xff]  }
 0x5d2   : > { %v1736_v60 = vld [vmem:[%s2023_s27] sm:$0xff]   ;;  %1091 = vmatprep.subr.bf16.mxu1 %v1735_v59  ;;  %v1817_v59 = vld [vmem:[%s2300_s7 + $0xb4] ss:$8 sps:$4 sm:$0xff]  }
 0x5d3   : > { %v684_v37 = vsel %vm508_vm0, %v2008_v35, 0.0  ;;  %v681_v41 = vsel %vm508_vm0, %v2010_v36, 0.0  ;;  %921 = vmatmul.mubr.bf16.vlgmr.msra.gmra.mrb[0].mxu1 %v1736_v60  ;;  %v1815_v60 = vld [vmem:[%s2300_s7 + $0xb0] ss:$8 sps:$4 sm:$0xff]  }
 0x5d4   : > { %685 = vadd.xlane.f32.xlu1 %v684_v37  ;;  %682 = vadd.xlane.f32.xlu0 %v681_v41  ;;  %v1781_v37 = vld [vmem:[%s2297_s4 + $0xf4] ss:$8 sps:$4 sm:$0xff]   ;;  %v1779_v41 = vld [vmem:[%s2297_s4 + $0xf0] ss:$8 sps:$4 sm:$0xff]  }
 0x5d5   : > { %1092 = vmatpush1.bf16.msra.mxu1 %v1733_v61  ;;  %v1820_v61 = vld [vmem:[%s2300_s7 + $0xc4] ss:$8 sps:$4 sm:$0xff]  }
 0x5d6   : > { %1093 = vmatprep.subr.bf16.mxu1 %v1739_v62  ;;  %v1818_v62 = vld [vmem:[%s2300_s7 + $0xc0] ss:$8 sps:$4 sm:$0xff]  }
 0x5d9   : > { %1094 = vmatpush1.bf16.msra.mxu1 %v1737_v63  ;;  %v1823_v63 = vld [vmem:[%s2300_s7 + $0xd4] ss:$8 sps:$4 sm:$0xff]  }
 0x5da   : > { %1095 = vmatprep.subr.bf16.mxu1 %v1742_v0  ;;  %v1821_v0 = vld [vmem:[%s2300_s7 + $0xd0] ss:$8 sps:$4 sm:$0xff]  }
 0x5dd   : > { %1096 = vmatpush1.bf16.msra.mxu1 %v1740_v1 }
 0x5de   : > { %1097 = vmatprep.subr.bf16.mxu1 %v1745_v2 }
 0x5e1   : > { %1098 = vmatpush1.bf16.msra.mxu1 %v1743_v3 }
 0x5e2   : > { %1099 = vmatprep.subr.bf16.mxu1 %v1748_v4 }
 0x5e5   : > { %1100 = vmatpush1.bf16.msra.mxu1 %v1746_v5 }
 0x5e6   : > { %1101 = vmatprep.subr.bf16.mxu1 %v1751_v6 }
 0x5e9   : > { %1102 = vmatpush1.bf16.msra.mxu1 %v1749_v9  ;;  %v1826_v9 = vld [vmem:[%s2300_s7 + $0xe4] ss:$8 sps:$4 sm:$0xff]  }
 0x5ea   : > { %1103 = vmatprep.subr.bf16.mxu1 %v1754_v10  ;;  %v1824_v10 = vld [vmem:[%s2300_s7 + $0xe0] ss:$8 sps:$4 sm:$0xff]  }
 0x5ed   : > { %1104 = vmatpush1.bf16.msra.mxu1 %v1752_v11  ;;  %v1829_v11 = vld [vmem:[%s2300_s7 + $0xf4] ss:$8 sps:$4 sm:$0xff]  }
 0x5ee   : > { %1105 = vmatprep.subr.bf16.mxu1 %v1757_v12  ;;  %v1827_v12 = vld [vmem:[%s2300_s7 + $0xf0] ss:$8 sps:$4 sm:$0xff]  }
 0x5f1   : > { %1106 = vmatpush1.bf16.msra.mxu1 %v1755_v13  ;;  %v1134_v13 = vld [vmem:[%s2299_s6] sm:$0x3] }
 0x5f2   : > { %1107 = vmatprep.subr.bf16.mxu1 %v1760_v14  ;;  %v1139_v14 = vrot.slane %v1134_v13, %v1956_v8 }
 0x5f5   : > { %1108 = vmatpush1.bf16.msra.mxu1 %v1758_v15  ;;  %v1143_v15 = vrot.slane %v1134_v13, %v1954_v7 }
 0x5f6   : > { %1109 = vmatprep.subr.bf16.mxu1 %v1763_v16 }
 0x5f9   : > { %1110 = vmatpush1.bf16.msra.mxu1 %v1761_v17 }
 0x5fa   : > { %1111 = vmatprep.subr.bf16.mxu1 %v1766_v18 }
 0x5fd   : > { %1112 = vmatpush1.bf16.msra.mxu1 %v1764_v19 }
 0x5fe   : > { %1113 = vmatprep.subr.bf16.mxu1 %v1769_v20 }
 0x601   : > { %1114 = vmatpush1.bf16.msra.mxu1 %v1767_v21 }
 0x602   : > { %1115 = vmatprep.subr.bf16.mxu1 %v1772_v22 }
 0x605   : > { %1116 = vmatpush1.bf16.msra.mxu1 %v1770_v23 }
 0x606   : > { %1117 = vmatprep.subr.bf16.mxu1 %v1775_v24 }
 0x609   : > { %1118 = vmatpush1.bf16.msra.mxu1 %v1773_v25 }
 0x60a   : > { %1119 = vmatprep.subr.bf16.mxu1 %v1778_v26 }
 0x60d   : > { %1120 = vmatpush1.bf16.msra.mxu1 %v1776_v27 }
 0x60e   : > { %1121 = vmatprep.subr.bf16.mxu1 %v1781_v37 }
 0x611   : > { %1122 = vmatpush1.bf16.msra.mxu1 %v1779_v41 }
 0x661   : > { %v686_v28 = vpop.xlane.xlu1 %685  ;;  %v683_v29 = vpop.xlane.xlu0 %682 }
 0x662   : > { %1842 = vrcp.f32 %v686_v28 }
 0x663   : > { %1844 = vrcp.f32 %v683_v29 }
 0x66c   : > { %v1843_v30 = vpop.eup %1842 }
 0x66d   : > { %v1845_v31 = vpop.eup %1844  ;;  %v690_v32 = vmul.f32 %v1843_v30, %v2008_v35  ;;  %v1784_v35 = vld [vmem:[%s2300_s7 + $0x4] ss:$8 sps:$4 sm:$0xff]   ;;  %v1188_v30 = vld [vmem:[%s2301_s8] sm:$0x3] }
 0x66e   : > { %v689_v33 = vmul.f32 %v1845_v31, %v2010_v36  ;;  %v1787_v36 = vld [vmem:[%s2300_s7 + $0x14] ss:$8 sps:$4 sm:$0xff]   ;;  %1360 = vmatprep.subr.bf16.mxu0 %v1784_v35  ;;  %v1193_v31 = vrot.slane %v1188_v30, %v1956_v8 }
 0x670   : > { %v691_v34 = vpack.c.bf16 %v690_v32, %v689_v33  ;;  %v1197_v32 = vrot.slane %v1188_v30, %v1954_v7 }
 0x672   : > { %1579 = vmatmul.mubr.msk.bf16.vlgmr.msra.gmra.mrb[0].mxu0 %vm508_vm0, %v691_v34 }
 0x673   : > { %1361 = vmatpush1.bf16.msra.mxu0 %v1782_v38 }
 0x674   : > { %1362 = vmatprep.subr.bf16.mxu0 %v1787_v36 }
 0x677   : > { %1363 = vmatpush1.bf16.msra.mxu0 %v1785_v42 }
 0x678   : > { %1364 = vmatprep.subr.bf16.mxu0 %v1790_v39 }
 0x67b   : > { %1365 = vmatpush1.bf16.msra.mxu0 %v1788_v40 }
 0x67c   : > { %1366 = vmatprep.subr.bf16.mxu0 %v1793_v43 }
 0x67f   : > { %1367 = vmatpush1.bf16.msra.mxu0 %v1791_v44 }
 0x680   : > { %1368 = vmatprep.subr.bf16.mxu0 %v1796_v45 }
 0x683   : > { %1369 = vmatpush1.bf16.msra.mxu0 %v1794_v46 }
 0x684   : > { %1370 = vmatprep.subr.bf16.mxu0 %v1799_v47 }
 0x687   : > { %1371 = vmatpush1.bf16.msra.mxu0 %v1797_v48 }
 0x688   : > { %1372 = vmatprep.subr.bf16.mxu0 %v1802_v49 }
 0x68b   : > { %1373 = vmatpush1.bf16.msra.mxu0 %v1800_v50 }
 0x68c   : > { %1374 = vmatprep.subr.bf16.mxu0 %v1805_v51 }
 0x68f   : > { %1375 = vmatpush1.bf16.msra.mxu0 %v1803_v52 }
 0x690   : > { %1376 = vmatprep.subr.bf16.mxu0 %v1808_v53 }
 0x693   : > { %1377 = vmatpush1.bf16.msra.mxu0 %v1806_v54 }
 0x694   : > { %1378 = vmatprep.subr.bf16.mxu0 %v1811_v55 }
 0x697   : > { %1379 = vmatpush1.bf16.msra.mxu0 %v1809_v56 }
 0x698   : > { %1380 = vmatprep.subr.bf16.mxu0 %v1814_v57 }
 0x69b   : > { %1381 = vmatpush1.bf16.msra.mxu0 %v1812_v58 }
 0x69c   : > { %1382 = vmatprep.subr.bf16.mxu0 %v1817_v59 }
 0x69f   : > { %1383 = vmatpush1.bf16.msra.mxu0 %v1815_v60 }
 0x6a0   : > { %1384 = vmatprep.subr.bf16.mxu0 %v1820_v61 }
 0x6a3   : > { %1385 = vmatpush1.bf16.msra.mxu0 %v1818_v62 }
 0x6a4   : > { %1386 = vmatprep.subr.bf16.mxu0 %v1823_v63 }
 0x6a7   : > { %1387 = vmatpush1.bf16.msra.mxu0 %v1821_v0 }
 0x6a8   : > { %1388 = vmatprep.subr.bf16.mxu0 %v1826_v9 }
 0x6ab   : > { %1389 = vmatpush1.bf16.msra.mxu0 %v1824_v10 }
 0x6ac   : > { %1390 = vmatprep.subr.bf16.mxu0 %v1829_v11 }
 0x6af   : > { %1391 = vmatpush1.bf16.msra.mxu0 %v1827_v12 }
 0x745   : > { %v741_v1 = vpop.f32.mrb[0].mxu0 }
 0x746   : > { %v743_v2 = vpop.f32.mrb[1].mxu0 }
 0x747   : > { %v745_v3 = vpop.f32.mrb[2].mxu0 }
 0x748   : > { %v750_v4 = vpack.c.bf16 %v745_v3, %v741_v1  ;;  %v747_v5 = vpop.f32.mrb[3].mxu0 }
 0x749   : > { %v751_v6 = vpack.c.bf16 %v747_v5, %v743_v2 }
 0x74b   : > { %1123 = vmatprep.mubr.bf16.mxu1 %v751_v6 }
 0x74c   : > { %1124 = vmatmul.mubr.bf16.vlgmr.msra.gmra.mrb[0].mxu1 %v750_v4 }
 0x81f   : > { %v1125_v16 = vpop.f32.mrb[0].mxu1 }
 0x820   : > { %v1146_v17 = vadd.f32 %v1139_v14, %v1125_v16  ;;  %v1127_v18 = vpop.f32.mrb[1].mxu1 }
 0x821   : > { %v1147_v19 = vadd.f32 %v1143_v15, %v1127_v18  ;;  %v1129_v20 = vpop.f32.mrb[2].mxu1 }
 0x822   : > { %v1148_v21 = vadd.f32 %v1139_v14, %v1129_v20  ;;  %v1131_v22 = vpop.f32.mrb[3].mxu1  ;;  %v1150_v24 = vmax.f32 %v1146_v17, 0.0 }
 0x823   : > { %v1149_v23 = vadd.f32 %v1143_v15, %v1131_v22  ;;  %v1151_v26 = vmax.f32 %v1147_v19, 0.0 }
 0x824   : > { %v1152_v25 = vmax.f32 %v1148_v21, 0.0 }
 0x825   : > { %v1153_v27 = vmax.f32 %v1149_v23, 0.0 }
 0x826   : > { %v1154_v28 = vpack.c.bf16 %v1152_v25, %v1150_v24 }
 0x827   : > { %v1155_v29 = vpack.c.bf16 %v1153_v27, %v1151_v26 }
 0x829   : > { %1392 = vmatprep.mubr.bf16.mxu0 %v1155_v29 }
 0x82a   : > { %1393 = vmatmul.mubr.bf16.vlgmr.msra.gmra.mrb[4].mxu0 %v1154_v28 }
 0x8fd   : > { %v1394_v33 = vpop.f32.mrb[4].mxu0 }
 0x8fe   : > { %v1395_v34 = vadd.f32 %v1394_v33, %v1193_v31  ;;  %v1396_v37 = vpop.f32.mrb[5].mxu0 }
 0x8ff   : > { %v1397_v41 = vadd.f32 %v1396_v37, %v1197_v32  ;;  %v1398_v38 = vpop.f32.mrb[6].mxu0 }
 0x900   : > { %v1403_v35 = vmax.f32 %v1395_v34, 0.0  ;;  %v1399_v36 = vadd.f32 %v1398_v38, %v1193_v31  ;;  %v1400_v42 = vpop.f32.mrb[7].mxu0 }
 0x901   : > { %v1404_v39 = vmax.f32 %v1397_v41, 0.0  ;;  %v1401_v40 = vadd.f32 %v1400_v42, %v1197_v32 }
 0x902   : > { %v1405_v43 = vmax.f32 %v1399_v36, 0.0 }
 0x903   : > { %v1669_v44 = vpack.c.bf16 %v1404_v39, %v1403_v35  ;;  %v1406_v8 = vmax.f32 %v1401_v40, 0.0 }
 0x905   : > { %1419 = vst [vmem:[%s445_s20] sm:$0xff] %v1669_v44  ;;  %v1670_v7 = vpack.c.bf16 %v1406_v8, %v1405_v43 }
 0x907   : > { %1420 = vst [vmem:[%s445_s20 + $0x8] sm:$0xff] %v1670_v7 }
 0x908 PF: > { %s19_s11 = sadd.s32 1, %s1868_s11   ;;  %s2303_s30 = smov %s1864_s10 }
 0x909   : > { %p16_p5 = scmp.ge.s32.totalorder %s19_s11, 4   ;;  %s2304_s10 = smov %s2306_s12 }
 0x90b   :  { %18 = sbr.rel (!%p16_p5) target bundleno = 2 (0x2), region = 95 }

// kernel: decoder_forward.4
= control target key start
LH: loop header
LB: loop body
LE: loop exit
PB: predicated region body
PF: predicated region fallthrough
CT: control target
= control target key end

     0   :  { %s2270_s30 = smov 0   ;;  %s2272_s10 = smov 0   ;;  %s2751_s0 = inlined_call_operand.vmem [shape: f32[2,8,3], index: 0, kind: input, shape index: {}]   ;;  %s2752_s1 = inlined_call_operand.vmem [shape: f32[2,3,4], index: 1, kind: input, shape index: {}]   ;;  %s2753_s2 = inlined_call_operand.vmem [shape: bf16[2,4,512], index: 2, kind: input, shape index: {}]   ;;  %s2754_s3 = inlined_call_operand.vmem [shape: bf16[2,8,256], index: 3, kind: input, shape index: {}]   ;;  %s2755_s4 = inlined_call_operand.vmem [shape: bf16[512,256], index: 4, kind: input, shape index: {}]   ;;  %s2756_s5 = inlined_call_operand.vmem [shape: bf16[256,256], index: 5, kind: input, shape index: {}]   ;;  %s2757_s6 = inlined_call_operand.vmem [shape: f32[1,256], index: 6, kind: input, shape index: {}]   ;;  %s2758_s7 = inlined_call_operand.vmem [shape: bf16[256,256], index: 7, kind: input, shape index: {}]   ;;  %s2759_s8 = inlined_call_operand.vmem [shape: f32[1,256], index: 8, kind: input, shape index: {}]   ;;  %s2760_s9 = inlined_call_operand.vmem [shape: bf16[2,8,256], index: 9, kind: output, shape index: {}]  }
   0x1   :  { %s2274_s11 = smov 0  }
   0x2 LB: > { %s31_s12 = sadd.s32 1, %s2209_s10  ;;  %p1802_p0 = scmp.ge.s32.totalorder %s2213_s11, 1  ;;  %s2213_s11 = sphi %s2274_s11, %s19_s11   ;;  %s2209_s10 = sphi %s2272_s10, %s2762_s10   ;;  %s2205_s30 = sphi %s2270_s30, %s2761_s30  }
   0x3   : > { %p33_p1 = scmp.ge.s32.totalorder %s31_s12, 2  ;;  %p340_p2 = scmp.lt.s32.totalorder %s2213_s11, 3 }
   0x5   : > { %s2764_s12 = smov (%p33_p1, %s31_s12), 0  ;;  %p341_p3 = pnand %p1802_p0, %p340_p2 }
   0x6   : > { %p400_p4 = scmp.lt.s32.totalorder (!%p341_p3), %s2205_s30, 1  ;;  %v2215_v0 = vmov (!%p341_p3), 0   ;;  %v2216_v1 = vmov (!%p341_p3), 2   ;;  %v2217_v3 = vmov (!%p341_p3), 1   ;;  %v443_v4 = vlaneseq (!%p341_p3) }
   0x7   : > { %344 = sbr.rel (%p341_p3) target bundleno = 2307 (0x903), region = 56  ;;  %1984 = vset.pattern.permute.xlu0 (!%p341_p3), %v2215_v0  ;;  %1986 = vset.pattern.permute.xlu1 (!%p341_p3), %v2216_v1  ;;  %vm473_vm0 = vcmask (!%p341_p3), 31744   ;;  %v2218_v58 = vmov (!%p341_p3), 0.0   ;;  %vm587_vm10 = vcmask (!%p341_p3), 1041408  }
   0x8   : > { %632 = vmatprep.mubr.bf16.mxu0 (!%p341_p3), %v2215_v0  ;;  %673 = vmatprep.mubr.bf16.mxu1 (!%p341_p3), %v2215_v0  ;;  %v2294_v5 = vshrl.u32 (!%p341_p3), %v443_v4, 7  ;;  %v2309_v25 = vand.u32 (!%p341_p3), 127, %v443_v4 }
   0xa   : > { %v2300_v6 = vsub.s32 (!%p341_p3), 0, %v2294_v5  ;;  %v463_v7 = vsub.s32 (!%p341_p3), 2, %v2294_v5  ;;  %v2304_v9 = vsub.s32 (!%p341_p3), 1, %v2294_v5 }
   0xe   : > { %s2766_s30 = smov (!%p400_p4, %s2205_s30), 1 }
   0xf   : > { %s2288_s13 = sshll.u32 %s2766_s30, 3  ;;  %s1804_s17 = sshll.u32 %s2766_s30, 2 }
  0x10   : > { %s406_s16 = scalar_lea.vmem %s2751_s0, %s2288_s13  ;;  %s410_s20 = scalar_lea.vmem %s2752_s1, %s1804_s17 }
  0x11   : > { %v435_v2 = vld [vmem:[%s406_s16] sm:$0xff]  ;;  %s415_s23 = scalar_lea.vmem %s2753_s2, %s2288_s13  ;;  %s424_s30 = scalar_lea.vmem %s2754_s3, %s2288_s13 }
  0x12   : > { %440 = vperm.xlu0 %1984, %v435_v2   ;;  %458 = vperm.xlu1 %1986, %v435_v2   ;;  %v436_v8 = vld [vmem:[%s410_s20] sm:$0x7]  ;;  %s433_s17 = scalar_lea.vmem %s2760_s9, %s2288_s13 }
  0x13   : > { %v446_v10 = vrot.slane %v436_v8, %v2300_v6  ;;  %v464_v12 = vrot.slane %v436_v8, %v463_v7  ;;  %v455_v14 = vrot.slane %v436_v8, %v2304_v9 }
  0x16   : > { %1985 = vset.pattern.permute.xlu0 %v2217_v3 }
  0x17   : > { %449 = vperm.xlu0 %1985, %v435_v2  }
  0x1b   : > { %1987 = vset.pattern.permute.xlu0 %v2216_v1 }
  0x91   : > { %v441_v11 = vpop.permute.xlu0 %440  ;;  %v459_v13 = vpop.permute.xlu1 %458 }
  0x92   : > { %v447_v15 = vsub.f32 %v441_v11, %v446_v10  ;;  %v465_v16 = vsub.f32 %v459_v13, %v464_v12 }
  0x94   : > { %v466_v19 = vmul.f32 %v447_v15, %v447_v15  ;;  %v469_v21 = vmul.f32 %v465_v16, %v465_v16 }
  0x96   : > { %v450_v17 = vpop.permute.xlu0 %449 }
  0x97   : > { %v456_v18 = vsub.f32 %v450_v17, %v455_v14 }
  0x99   : > { %v467_v20 = vmul.f32 %v456_v18, %v456_v18 }
  0x9b   : > { %v468_v22 = vadd.f32 %v467_v20, %v466_v19 }
  0x9d   : > { %v470_v23 = vadd.f32 %v469_v21, %v468_v22 }
  0x9f   : > { %v474_v24 = vsel %vm473_vm0, %v470_v23, inf }
  0xa0   : > { %475 = vmin.xlane.f32.xlu1 %v474_v24 }
 0x12d   : > { %v476_v26 = vpop.xlane.xlu1 %475 }
 0x12e   : > { %vm477_vm1 = vcmp.eq.f32.partialorder %v470_v23, %v476_v26  ;;  %v495_v51 = vadd.f32 1e-08, %v476_v26 }
 0x12f   : > { %v478_v27 = vsel %vm477_vm1, %v2309_v25, 4 }
 0x130   : > { %v479_v28 = vsel %vm473_vm0, %v478_v27, 2147483647  ;;  %2183 = vrcp.f32 %v495_v51  ;;  %v1997_v51 = vld [vmem:[%s2756_s5 + $0x24] ss:$8 sps:$4 sm:$0xff]  }
 0x131   : > { %v481_v29 = vshra.s32 %v479_v28, 16  ;;  %v480_v31 = vand.u32 65535, %v479_v28  ;;  %v437_v28 = vld [vmem:[%s415_s23] sm:$0xff] }
 0x133   : > { %v483_v30 = vcvt.s32.f32 %v481_v29  ;;  %v482_v33 = vcvt.s32.f32 %v480_v31  ;;  %v2219_v29 = vmov 1983009808  }
 0x135   : > { %484 = vmin.xlane.f32.xlu0 %v483_v30 }
 0x13a   : > { %v2184_v60 = vpop.eup %2183 }
 0x1c2   : > { %v485_v32 = vpop.xlane.xlu0 %484 }
 0x1c3   : > { %vm486_vm2 = vcmp.eq.f32.partialorder %v483_v30, %v485_v32  ;;  %v491_v35 = vcvt.f32.s32 %v485_v32  ;;  %v569_v30 = vunpack.c.l.s4 %v2219_v29  ;;  %v567_v32 = vcombine.high %v437_v28, %v437_v28  ;;  %v2107_v29 = vld [vmem:[%s2755_s4 + $0xb4] ss:$8 sps:$4 sm:$0xff]  }
 0x1c4   : > { %v487_v34 = vsel %vm486_vm2, %v482_v33, inf }
 0x1c5   : > { %488 = vmin.xlane.f32.xlu1 %v487_v34  ;;  %v492_v37 = vshll.u32 %v491_v35, 16  ;;  %v570_v31 = vunpack.c.0.s8 %v569_v30  ;;  %v2022_v30 = vld [vmem:[%s2756_s5 + $0xb0] ss:$8 sps:$4 sm:$0xff]  }
 0x1c7   : > { %v573_v33 = vsub.s32 %v570_v31, %v2294_v5  ;;  %v2041_v5 = vld [vmem:[%s2755_s4 + $0x4] ss:$8 sps:$4 sm:$0xff]  }
 0x1c8   : > { %v2027_v31 = vld [vmem:[%s2756_s5 + $0xc4] ss:$8 sps:$4 sm:$0xff]  }
 0x1c9   : > { %v581_v34 = vrot.slane %v567_v32, %v573_v33  ;;  %v2105_v32 = vld [vmem:[%s2755_s4 + $0xb0] ss:$8 sps:$4 sm:$0xff]  }
 0x252   : > { %v489_v36 = vpop.xlane.xlu1 %488 }
 0x253   : > { %v490_v38 = vcvt.f32.s32 %v489_v36  ;;  %v583_v36 = vcombine.high %v581_v34, %v581_v34 }
 0x255   : > { %v493_v39 = vadd.s32 %v492_v37, %v490_v38  ;;  %v595_v38 = vsel %vm587_vm10, %v581_v34, 0  ;;  %1816 = vmatprep.subr.msk.bf16.mxu1 %vm587_vm10, %v583_v36  ;;  %v2030_v34 = vld [vmem:[%s2756_s5 + $0xd4] ss:$8 sps:$4 sm:$0xff]  }
 0x256   : > { %642 = vmatpush1.bf16.msra.mxu1 %v595_v38  ;;  %v2119_v36 = vld [vmem:[%s2755_s4 + $0xd4] ss:$8 sps:$4 sm:$0xff]   ;;  %v2033_v38 = vld [vmem:[%s2756_s5 + $0xe4] ss:$8 sps:$4 sm:$0xff]  }
 0x257   : > { %vm494_vm3 = vcmp.eq.s32.totalorder %v2309_v25, %v493_v39  ;;  %v1991_v39 = vld [vmem:[%s2756_s5 + $0x4] ss:$8 sps:$4 sm:$0xff]   ;;  %1311 = vmatprep.subr.bf16.mxu1 %v2041_v5 }
 0x258   : > { %v502_v40 = vsel %vm494_vm3, inf, %v470_v23  ;;  %v1811_v59 = vsel %vm494_vm3, 1.0, %v2218_v58  ;;  %v2125_v5 = vld [vmem:[%s2755_s4 + $0xe4] ss:$8 sps:$4 sm:$0xff]  }
 0x259   : > { %v503_v41 = vsel %vm473_vm0, %v502_v40, inf  ;;  %v500_v0 = vmul.f32 %v2184_v60, %v1811_v59  ;;  %v2003_v59 = vld [vmem:[%s2756_s5 + $0x44] ss:$8 sps:$4 sm:$0xff]   ;;  %v2057_v60 = vld [vmem:[%s2755_s4 + $0x30] ss:$8 sps:$4 sm:$0xff]  }
 0x25a   : > { %504 = vmin.xlane.f32.xlu0 %v503_v41  ;;  %v2342_v41 = vld [vmem:[%s424_s30] sm:$0xff] }
 0x2e7   : > { %v505_v42 = vpop.xlane.xlu0 %504 }
 0x2e8   : > { %vm506_vm4 = vcmp.eq.f32.partialorder %v502_v40, %v505_v42  ;;  %v524_v52 = vadd.f32 1e-08, %v505_v42 }
 0x2e9   : > { %v507_v43 = vsel %vm506_vm4, %v2309_v25, 4 }
 0x2ea   : > { %v508_v44 = vsel %vm473_vm0, %v507_v43, 2147483647  ;;  %2185 = vrcp.f32 %v524_v52  ;;  %v2045_v52 = vld [vmem:[%s2755_s4 + $0x10] ss:$8 sps:$4 sm:$0xff]  }
 0x2eb   : > { %v510_v45 = vshra.s32 %v508_v44, 16  ;;  %v509_v47 = vand.u32 65535, %v508_v44  ;;  %v1989_v44 = vld [vmem:[%s2756_s5] ss:$8 sps:$4 sm:$0xff]  }
 0x2ed   : > { %v512_v46 = vcvt.s32.f32 %v510_v45  ;;  %v511_v49 = vcvt.s32.f32 %v509_v47  ;;  %v1819_v45 = vcombine.high %v2342_v41, %v2342_v41  ;;  %v1994_v47 = vld [vmem:[%s2756_s5 + $0x14] ss:$8 sps:$4 sm:$0xff]  }
 0x2ef   : > { %513 = vmin.xlane.f32.xlu1 %v512_v46 }
 0x2f4   : > { %v2186_v61 = vpop.eup %2185 }
 0x37c   : > { %v514_v48 = vpop.xlane.xlu1 %513 }
 0x37d   : > { %vm515_vm5 = vcmp.eq.f32.partialorder %v512_v46, %v514_v48  ;;  %v520_v53 = vcvt.f32.s32 %v514_v48  ;;  %v2039_v48 = vld [vmem:[%s2755_s4] ss:$8 sps:$4 sm:$0xff]  }
 0x37e   : > { %v516_v50 = vsel %vm515_vm5, %v511_v49, inf  ;;  %v2047_v49 = vld [vmem:[%s2755_s4 + $0x14] ss:$8 sps:$4 sm:$0xff]  }
 0x37f   : > { %517 = vmin.xlane.f32.xlu0 %v516_v50  ;;  %v521_v55 = vshll.u32 %v520_v53, 16  ;;  %v1992_v50 = vld [vmem:[%s2756_s5 + $0x10] ss:$8 sps:$4 sm:$0xff]   ;;  %v2053_v53 = vld [vmem:[%s2755_s4 + $0x24] ss:$8 sps:$4 sm:$0xff]  }
 0x40c   : > { %v518_v54 = vpop.xlane.xlu0 %517 }
 0x40d   : > { %v519_v56 = vcvt.f32.s32 %v518_v54  ;;  %v1995_v54 = vld [vmem:[%s2756_s5 + $0x20] ss:$8 sps:$4 sm:$0xff]  }
 0x40f   : > { %v522_v57 = vadd.s32 %v521_v55, %v519_v56  ;;  %v2000_v55 = vld [vmem:[%s2756_s5 + $0x34] ss:$8 sps:$4 sm:$0xff]   ;;  %v2051_v56 = vld [vmem:[%s2755_s4 + $0x20] ss:$8 sps:$4 sm:$0xff]  }
 0x411   : > { %vm523_vm6 = vcmp.eq.s32.totalorder %v2309_v25, %v522_v57  ;;  %v2059_v57 = vld [vmem:[%s2755_s4 + $0x34] ss:$8 sps:$4 sm:$0xff]  }
 0x412   : > { %v531_v62 = vsel %vm523_vm6, inf, %v502_v40  ;;  %v1812_v63 = vsel %vm523_vm6, 1.0, %v2218_v58 }
 0x413   : > { %v532_v1 = vsel %vm473_vm0, %v531_v62, inf  ;;  %v529_v2 = vmul.f32 %v2186_v61, %v1812_v63  ;;  %v2065_v61 = vld [vmem:[%s2755_s4 + $0x44] ss:$8 sps:$4 sm:$0xff]   ;;  %v2006_v63 = vld [vmem:[%s2756_s5 + $0x54] ss:$8 sps:$4 sm:$0xff]  }
 0x414   : > { %533 = vmin.xlane.f32.xlu1 %v532_v1  ;;  %v2071_v1 = vld [vmem:[%s2755_s4 + $0x54] ss:$8 sps:$4 sm:$0xff]  }
 0x415   : > { %v530_v3 = vadd.f32 %v529_v2, %v500_v0  ;;  %v2063_v0 = vld [vmem:[%s2755_s4 + $0x40] ss:$8 sps:$4 sm:$0xff]   ;;  %v2004_v2 = vld [vmem:[%s2756_s5 + $0x50] ss:$8 sps:$4 sm:$0xff]  }
 0x4a1   : > { %v534_v4 = vpop.xlane.xlu1 %533 }
 0x4a2   : > { %vm535_vm7 = vcmp.eq.f32.partialorder %v531_v62, %v534_v4  ;;  %v553_v16 = vadd.f32 1e-08, %v534_v4  ;;  %v2001_v62 = vld [vmem:[%s2756_s5 + $0x40] ss:$8 sps:$4 sm:$0xff]   ;;  %v2069_v4 = vld [vmem:[%s2755_s4 + $0x50] ss:$8 sps:$4 sm:$0xff]  }
 0x4a3   : > { %v536_v7 = vsel %vm535_vm7, %v2309_v25, 4 }
 0x4a4   : > { %v537_v8 = vsel %vm473_vm0, %v536_v7, 2147483647  ;;  %2187 = vrcp.f32 %v553_v16  ;;  %v2077_v7 = vld [vmem:[%s2755_s4 + $0x64] ss:$8 sps:$4 sm:$0xff]  }
 0x4a5   : > { %v539_v10 = vshra.s32 %v537_v8, 16  ;;  %v538_v12 = vand.u32 65535, %v537_v8  ;;  %v2007_v8 = vld [vmem:[%s2756_s5 + $0x60] ss:$8 sps:$4 sm:$0xff]   ;;  %v2089_v16 = vld [vmem:[%s2755_s4 + $0x84] ss:$8 sps:$4 sm:$0xff]  }
 0x4a7   : > { %v541_v11 = vcvt.s32.f32 %v539_v10  ;;  %v540_v14 = vcvt.s32.f32 %v538_v12  ;;  %v2012_v10 = vld [vmem:[%s2756_s5 + $0x74] ss:$8 sps:$4 sm:$0xff]  }
 0x4a8   : > { %v2083_v12 = vld [vmem:[%s2755_s4 + $0x74] ss:$8 sps:$4 sm:$0xff]  }
 0x4a9   : > { %542 = vmin.xlane.f32.xlu0 %v541_v11 }
 0x4ae   : > { %v2188_v22 = vpop.eup %2187 }
 0x536   : > { %v543_v13 = vpop.xlane.xlu0 %542 }
 0x537   : > { %vm544_vm8 = vcmp.eq.f32.partialorder %v541_v11, %v543_v13  ;;  %v549_v17 = vcvt.f32.s32 %v543_v13  ;;  %v2075_v11 = vld [vmem:[%s2755_s4 + $0x60] ss:$8 sps:$4 sm:$0xff]   ;;  %v2010_v13 = vld [vmem:[%s2756_s5 + $0x70] ss:$8 sps:$4 sm:$0xff]  }
 0x538   : > { %v545_v15 = vsel %vm544_vm8, %v540_v14, inf  ;;  %v2015_v14 = vld [vmem:[%s2756_s5 + $0x84] ss:$8 sps:$4 sm:$0xff]  }
 0x539   : > { %546 = vmin.xlane.f32.xlu1 %v545_v15  ;;  %v550_v19 = vshll.u32 %v549_v17, 16  ;;  %v2081_v15 = vld [vmem:[%s2755_s4 + $0x70] ss:$8 sps:$4 sm:$0xff]   ;;  %v2013_v17 = vld [vmem:[%s2756_s5 + $0x80] ss:$8 sps:$4 sm:$0xff]  }
 0x5c6   : > { %v547_v18 = vpop.xlane.xlu1 %546 }
 0x5c7   : > { %v548_v20 = vcvt.f32.s32 %v547_v18  ;;  %v2018_v18 = vld [vmem:[%s2756_s5 + $0x94] ss:$8 sps:$4 sm:$0xff]  }
 0x5c9   : > { %v551_v21 = vadd.s32 %v550_v19, %v548_v20  ;;  %v2087_v19 = vld [vmem:[%s2755_s4 + $0x80] ss:$8 sps:$4 sm:$0xff]   ;;  %v2095_v20 = vld [vmem:[%s2755_s4 + $0x94] ss:$8 sps:$4 sm:$0xff]  }
 0x5cb   : > { %vm552_vm9 = vcmp.eq.s32.totalorder %v2309_v25, %v551_v21  ;;  %v574_v25 = vrot.slane %v437_v28, %v573_v33  ;;  %v2016_v21 = vld [vmem:[%s2756_s5 + $0x90] ss:$8 sps:$4 sm:$0xff]   ;;  %v2099_v28 = vld [vmem:[%s2755_s4 + $0xa0] ss:$8 sps:$4 sm:$0xff]   ;;  %v2113_v33 = vld [vmem:[%s2755_s4 + $0xc4] ss:$8 sps:$4 sm:$0xff]  }
 0x5cc   : > { %v1813_v23 = vsel %vm552_vm9, 1.0, %v2218_v58  ;;  %v1998_v58 = vld [vmem:[%s2756_s5 + $0x30] ss:$8 sps:$4 sm:$0xff]  }
 0x5cd   : > { %v558_v24 = vmul.f32 %v2188_v22, %v1813_v23  ;;  %v582_v35 = vcombine.high %v574_v25, %v574_v25  ;;  %v589_v37 = vsel %vm587_vm10, %v574_v25, 0  ;;  %v2021_v22 = vld [vmem:[%s2756_s5 + $0xa4] ss:$8 sps:$4 sm:$0xff]   ;;  %v2093_v23 = vld [vmem:[%s2755_s4 + $0x90] ss:$8 sps:$4 sm:$0xff]  }
 0x5ce   : > { %v2025_v25 = vld [vmem:[%s2756_s5 + $0xc0] ss:$8 sps:$4 sm:$0xff]  }
 0x5cf   : > { %v559_v26 = vadd.f32 %v558_v24, %v530_v3  ;;  %1814 = vmatprep.subr.msk.bf16.mxu0 %vm587_vm10, %v582_v35  ;;  %v2009_v3 = vld [vmem:[%s2756_s5 + $0x64] ss:$8 sps:$4 sm:$0xff]   ;;  %v2111_v35 = vld [vmem:[%s2755_s4 + $0xc0] ss:$8 sps:$4 sm:$0xff]  }
 0x5d0   : > { %601 = vmatpush1.bf16.msra.mxu0 %v589_v37  ;;  %v2101_v24 = vld [vmem:[%s2755_s4 + $0xa4] ss:$8 sps:$4 sm:$0xff]   ;;  %v2028_v37 = vld [vmem:[%s2756_s5 + $0xd0] ss:$8 sps:$4 sm:$0xff]  }
 0x5d1   : > { %v560_v27 = vsel %vm473_vm0, %v559_v26, 0.0  ;;  %950 = vmatprep.subr.bf16.mxu0 %v1991_v39  ;;  %v2117_v39 = vld [vmem:[%s2755_s4 + $0xd0] ss:$8 sps:$4 sm:$0xff]  }
 0x5d2   : > { %561 = vadd.xlane.f32.xlu0 %v560_v27  ;;  %v2024_v27 = vld [vmem:[%s2756_s5 + $0xb4] ss:$8 sps:$4 sm:$0xff]  }
 0x65f   : > { %v562_v40 = vpop.xlane.xlu0 %561 }
 0x660   : > { %2189 = vrcp.f32 %v562_v40  ;;  %v2031_v40 = vld [vmem:[%s2756_s5 + $0xe0] ss:$8 sps:$4 sm:$0xff]  }
 0x66a   : > { %v2190_v42 = vpop.eup %2189 }
 0x66b   : > { %v564_v43 = vmul.f32 %v2190_v42, %v559_v26  ;;  %v2019_v26 = vld [vmem:[%s2756_s5 + $0xa0] ss:$8 sps:$4 sm:$0xff]   ;;  %v2036_v42 = vld [vmem:[%s2756_s5 + $0xf4] ss:$8 sps:$4 sm:$0xff]  }
 0x66d   : > { %v565_v46 = vpack.c.bf16 %v564_v43, %v564_v43  ;;  %v2123_v43 = vld [vmem:[%s2755_s4 + $0xe0] ss:$8 sps:$4 sm:$0xff]  }
 0x66f   : > { %1815 = vmatmul.mubr.msk.bf16.vlgmr.msra.gmra.mrb[0].mxu0 %vm473_vm0, %v565_v46  ;;  %1817 = vmatmul.mubr.msk.bf16.vlgmr.msra.gmra.mrb[0].mxu1 %vm473_vm0, %v565_v46  ;;  %v1818_v46 = vcombine.low %v2342_v41, %v2342_v41  ;;  %v2056_v41 = vld [vmem:[%s2755_s4 + $0x124] ss:$8 sps:$4 sm:$0xff]  }
 0x670   : > { %951 = vmatpush1.bf16.msra.mxu0 %v1989_v44  ;;  %982 = vmatprep.mubr.bf16.mxu0 %v1819_v45  ;;  %v2034_v44 = vld [vmem:[%s2756_s5 + $0xf0] ss:$8 sps:$4 sm:$0xff]   ;;  %v2044_v45 = vld [vmem:[%s2755_s4 + $0x104] ss:$8 sps:$4 sm:$0xff]  }
 0x671   : > { %952 = vmatprep.subr.bf16.mxu0 %v1994_v47  ;;  %1312 = vmatpush1.bf16.msra.mxu1 %v2039_v48  ;;  %v2042_v47 = vld [vmem:[%s2755_s4 + $0x100] ss:$8 sps:$4 sm:$0xff]   ;;  %v2050_v48 = vld [vmem:[%s2755_s4 + $0x114] ss:$8 sps:$4 sm:$0xff]  }
 0x672   : > { %1313 = vmatprep.subr.bf16.mxu1 %v2047_v49  ;;  %v2048_v49 = vld [vmem:[%s2755_s4 + $0x110] ss:$8 sps:$4 sm:$0xff]  }
 0x674   : > { %953 = vmatpush1.bf16.msra.mxu0 %v1992_v50  ;;  %v2054_v50 = vld [vmem:[%s2755_s4 + $0x120] ss:$8 sps:$4 sm:$0xff]  }
 0x675   : > { %954 = vmatprep.subr.bf16.mxu0 %v1997_v51  ;;  %1314 = vmatpush1.bf16.msra.mxu1 %v2045_v52  ;;  %v2062_v51 = vld [vmem:[%s2755_s4 + $0x134] ss:$8 sps:$4 sm:$0xff]   ;;  %v2060_v52 = vld [vmem:[%s2755_s4 + $0x130] ss:$8 sps:$4 sm:$0xff]  }
 0x676   : > { %1315 = vmatprep.subr.bf16.mxu1 %v2053_v53  ;;  %v2068_v53 = vld [vmem:[%s2755_s4 + $0x144] ss:$8 sps:$4 sm:$0xff]  }
 0x678   : > { %955 = vmatpush1.bf16.msra.mxu0 %v1995_v54  ;;  %v2066_v54 = vld [vmem:[%s2755_s4 + $0x140] ss:$8 sps:$4 sm:$0xff]  }
 0x679   : > { %956 = vmatprep.subr.bf16.mxu0 %v2000_v55  ;;  %1316 = vmatpush1.bf16.msra.mxu1 %v2051_v56  ;;  %v2074_v55 = vld [vmem:[%s2755_s4 + $0x154] ss:$8 sps:$4 sm:$0xff]   ;;  %v2072_v56 = vld [vmem:[%s2755_s4 + $0x150] ss:$8 sps:$4 sm:$0xff]  }
 0x67a   : > { %1317 = vmatprep.subr.bf16.mxu1 %v2059_v57  ;;  %v2080_v57 = vld [vmem:[%s2755_s4 + $0x164] ss:$8 sps:$4 sm:$0xff]  }
 0x67c   : > { %957 = vmatpush1.bf16.msra.mxu0 %v1998_v58  ;;  %v2131_v58 = vld [vmem:[%s2755_s4 + $0xf4] ss:$8 sps:$4 sm:$0xff]  }
 0x67d   : > { %958 = vmatprep.subr.bf16.mxu0 %v2003_v59  ;;  %1318 = vmatpush1.bf16.msra.mxu1 %v2057_v60  ;;  %v2129_v59 = vld [vmem:[%s2755_s4 + $0xf0] ss:$8 sps:$4 sm:$0xff]   ;;  %v2078_v60 = vld [vmem:[%s2755_s4 + $0x160] ss:$8 sps:$4 sm:$0xff]  }
 0x67e   : > { %1319 = vmatprep.subr.bf16.mxu1 %v2065_v61  ;;  %v2086_v61 = vld [vmem:[%s2755_s4 + $0x174] ss:$8 sps:$4 sm:$0xff]  }
 0x680   : > { %959 = vmatpush1.bf16.msra.mxu0 %v2001_v62  ;;  %v2084_v62 = vld [vmem:[%s2755_s4 + $0x170] ss:$8 sps:$4 sm:$0xff]  }
 0x681   : > { %960 = vmatprep.subr.bf16.mxu0 %v2006_v63  ;;  %1320 = vmatpush1.bf16.msra.mxu1 %v2063_v0  ;;  %v2092_v63 = vld [vmem:[%s2755_s4 + $0x184] ss:$8 sps:$4 sm:$0xff]   ;;  %v2090_v0 = vld [vmem:[%s2755_s4 + $0x180] ss:$8 sps:$4 sm:$0xff]  }
 0x682   : > { %1321 = vmatprep.subr.bf16.mxu1 %v2071_v1  ;;  %v2098_v1 = vld [vmem:[%s2755_s4 + $0x194] ss:$8 sps:$4 sm:$0xff]  }
 0x684   : > { %961 = vmatpush1.bf16.msra.mxu0 %v2004_v2  ;;  %v2096_v2 = vld [vmem:[%s2755_s4 + $0x190] ss:$8 sps:$4 sm:$0xff]  }
 0x685   : > { %962 = vmatprep.subr.bf16.mxu0 %v2009_v3  ;;  %1322 = vmatpush1.bf16.msra.mxu1 %v2069_v4  ;;  %v2104_v3 = vld [vmem:[%s2755_s4 + $0x1a4] ss:$8 sps:$4 sm:$0xff]   ;;  %v2102_v4 = vld [vmem:[%s2755_s4 + $0x1a0] ss:$8 sps:$4 sm:$0xff]  }
 0x686   : > { %1323 = vmatprep.subr.bf16.mxu1 %v2077_v7  ;;  %v2110_v7 = vld [vmem:[%s2755_s4 + $0x1b4] ss:$8 sps:$4 sm:$0xff]  }
 0x688   : > { %963 = vmatpush1.bf16.msra.mxu0 %v2007_v8  ;;  %v2108_v8 = vld [vmem:[%s2755_s4 + $0x1b0] ss:$8 sps:$4 sm:$0xff]  }
 0x689   : > { %964 = vmatprep.subr.bf16.mxu0 %v2012_v10  ;;  %1324 = vmatpush1.bf16.msra.mxu1 %v2075_v11  ;;  %v2116_v10 = vld [vmem:[%s2755_s4 + $0x1c4] ss:$8 sps:$4 sm:$0xff]   ;;  %v2114_v11 = vld [vmem:[%s2755_s4 + $0x1c0] ss:$8 sps:$4 sm:$0xff]  }
 0x68a   : > { %1325 = vmatprep.subr.bf16.mxu1 %v2083_v12  ;;  %v2122_v12 = vld [vmem:[%s2755_s4 + $0x1d4] ss:$8 sps:$4 sm:$0xff]  }
 0x68c   : > { %965 = vmatpush1.bf16.msra.mxu0 %v2010_v13  ;;  %v2120_v13 = vld [vmem:[%s2755_s4 + $0x1d0] ss:$8 sps:$4 sm:$0xff]  }
 0x68d   : > { %966 = vmatprep.subr.bf16.mxu0 %v2015_v14  ;;  %1326 = vmatpush1.bf16.msra.mxu1 %v2081_v15  ;;  %v2128_v14 = vld [vmem:[%s2755_s4 + $0x1e4] ss:$8 sps:$4 sm:$0xff]   ;;  %v2126_v15 = vld [vmem:[%s2755_s4 + $0x1e0] ss:$8 sps:$4 sm:$0xff]  }
 0x68e   : > { %1327 = vmatprep.subr.bf16.mxu1 %v2089_v16  ;;  %v2134_v16 = vld [vmem:[%s2755_s4 + $0x1f4] ss:$8 sps:$4 sm:$0xff]  }
 0x690   : > { %967 = vmatpush1.bf16.msra.mxu0 %v2013_v17  ;;  %v2132_v17 = vld [vmem:[%s2755_s4 + $0x1f0] ss:$8 sps:$4 sm:$0xff]  }
 0x691   : > { %968 = vmatprep.subr.bf16.mxu0 %v2018_v18  ;;  %1328 = vmatpush1.bf16.msra.mxu1 %v2087_v19  ;;  %v2137_v18 = vld [vmem:[%s2758_s7 + $0x4] ss:$8 sps:$4 sm:$0xff]  }
 0x692   : > { %1329 = vmatprep.subr.bf16.mxu1 %v2095_v20 }
 0x694   : > { %969 = vmatpush1.bf16.msra.mxu0 %v2016_v21 }
 0x695   : > { %970 = vmatprep.subr.bf16.mxu0 %v2021_v22  ;;  %1330 = vmatpush1.bf16.msra.mxu1 %v2093_v23 }
 0x696   : > { %1331 = vmatprep.subr.bf16.mxu1 %v2101_v24 }
 0x698   : > { %971 = vmatpush1.bf16.msra.mxu0 %v2019_v26 }
 0x699   : > { %972 = vmatprep.subr.bf16.mxu0 %v2024_v27  ;;  %1332 = vmatpush1.bf16.msra.mxu1 %v2099_v28  ;;  %v2135_v28 = vld [vmem:[%s2758_s7] ss:$8 sps:$4 sm:$0xff]  }
 0x69a   : > { %1333 = vmatprep.subr.bf16.mxu1 %v2107_v29 }
 0x69c   : > { %973 = vmatpush1.bf16.msra.mxu0 %v2022_v30 }
 0x69d   : > { %974 = vmatprep.subr.bf16.mxu0 %v2027_v31  ;;  %1334 = vmatpush1.bf16.msra.mxu1 %v2105_v32 }
 0x69e   : > { %1335 = vmatprep.subr.bf16.mxu1 %v2113_v33  ;;  %v2140_v33 = vld [vmem:[%s2758_s7 + $0x14] ss:$8 sps:$4 sm:$0xff]  }
 0x6a0   : > { %975 = vmatpush1.bf16.msra.mxu0 %v2025_v25  ;;  %v2138_v25 = vld [vmem:[%s2758_s7 + $0x10] ss:$8 sps:$4 sm:$0xff]  }
 0x6a1   : > { %976 = vmatprep.subr.bf16.mxu0 %v2030_v34  ;;  %1336 = vmatpush1.bf16.msra.mxu1 %v2111_v35  ;;  %v2143_v34 = vld [vmem:[%s2758_s7 + $0x24] ss:$8 sps:$4 sm:$0xff]   ;;  %v2141_v35 = vld [vmem:[%s2758_s7 + $0x20] ss:$8 sps:$4 sm:$0xff]  }
 0x6a2   : > { %1337 = vmatprep.subr.bf16.mxu1 %v2119_v36  ;;  %v2146_v36 = vld [vmem:[%s2758_s7 + $0x34] ss:$8 sps:$4 sm:$0xff]  }
 0x6a4   : > { %977 = vmatpush1.bf16.msra.mxu0 %v2028_v37  ;;  %v2144_v37 = vld [vmem:[%s2758_s7 + $0x30] ss:$8 sps:$4 sm:$0xff]  }
 0x6a5   : > { %978 = vmatprep.subr.bf16.mxu0 %v2033_v38  ;;  %1338 = vmatpush1.bf16.msra.mxu1 %v2117_v39  ;;  %v2149_v38 = vld [vmem:[%s2758_s7 + $0x44] ss:$8 sps:$4 sm:$0xff]   ;;  %v2147_v39 = vld [vmem:[%s2758_s7 + $0x40] ss:$8 sps:$4 sm:$0xff]  }
 0x6a6   : > { %1339 = vmatprep.subr.bf16.mxu1 %v2125_v5  ;;  %v2152_v5 = vld [vmem:[%s2758_s7 + $0x54] ss:$8 sps:$4 sm:$0xff]  }
 0x6a8   : > { %979 = vmatpush1.bf16.msra.mxu0 %v2031_v40  ;;  %v2150_v40 = vld [vmem:[%s2758_s7 + $0x50] ss:$8 sps:$4 sm:$0xff]  }
 0x6a9   : > { %980 = vmatprep.subr.bf16.mxu0 %v2036_v42  ;;  %1340 = vmatpush1.bf16.msra.mxu1 %v2123_v43  ;;  %v2155_v42 = vld [vmem:[%s2758_s7 + $0x64] ss:$8 sps:$4 sm:$0xff]   ;;  %v2153_v43 = vld [vmem:[%s2758_s7 + $0x60] ss:$8 sps:$4 sm:$0xff]  }
 0x6aa   : > { %1341 = vmatprep.subr.bf16.mxu1 %v2131_v58 }
 0x6ac   : > { %981 = vmatpush1.bf16.msra.mxu0 %v2034_v44  ;;  %v2158_v44 = vld [vmem:[%s2758_s7 + $0x74] ss:$8 sps:$4 sm:$0xff]  }
 0x6ad   : > { %1352 = vmatprep.subr.bf16.mxu0 %v2044_v45  ;;  %1342 = vmatpush1.bf16.msra.mxu1 %v2129_v59  ;;  %v2156_v45 = vld [vmem:[%s2758_s7 + $0x70] ss:$8 sps:$4 sm:$0xff]   ;;  %v2176_v59 = vld [vmem:[%s2758_s7 + $0xd4] ss:$8 sps:$4 sm:$0xff]  }
 0x6ae   : > { %1615 = vmatprep.subr.bf16.mxu1 %v2137_v18 }
 0x6af   : > { %983 = vmatmul.mubr.bf16.vlgmr.msra.gmra.mrb[4].mxu0 %v1818_v46  ;;  %v2161_v46 = vld [vmem:[%s2758_s7 + $0x84] ss:$8 sps:$4 sm:$0xff]  }
 0x6b0   : > { %1353 = vmatpush1.bf16.msra.mxu0 %v2042_v47  ;;  %v2159_v47 = vld [vmem:[%s2758_s7 + $0x80] ss:$8 sps:$4 sm:$0xff]  }
 0x6b1   : > { %1354 = vmatprep.subr.bf16.mxu0 %v2050_v48  ;;  %v2164_v48 = vld [vmem:[%s2758_s7 + $0x94] ss:$8 sps:$4 sm:$0xff]  }
 0x6b4   : > { %1355 = vmatpush1.bf16.msra.mxu0 %v2048_v49  ;;  %v2162_v49 = vld [vmem:[%s2758_s7 + $0x90] ss:$8 sps:$4 sm:$0xff]  }
 0x6b5   : > { %1356 = vmatprep.subr.bf16.mxu0 %v2056_v41  ;;  %v2167_v41 = vld [vmem:[%s2758_s7 + $0xa4] ss:$8 sps:$4 sm:$0xff]  }
 0x6b8   : > { %1357 = vmatpush1.bf16.msra.mxu0 %v2054_v50  ;;  %v2165_v50 = vld [vmem:[%s2758_s7 + $0xa0] ss:$8 sps:$4 sm:$0xff]  }
 0x6b9   : > { %1358 = vmatprep.subr.bf16.mxu0 %v2062_v51  ;;  %v2170_v51 = vld [vmem:[%s2758_s7 + $0xb4] ss:$8 sps:$4 sm:$0xff]  }
 0x6bc   : > { %1359 = vmatpush1.bf16.msra.mxu0 %v2060_v52  ;;  %v2168_v52 = vld [vmem:[%s2758_s7 + $0xb0] ss:$8 sps:$4 sm:$0xff]  }
 0x6bd   : > { %1360 = vmatprep.subr.bf16.mxu0 %v2068_v53  ;;  %v2173_v53 = vld [vmem:[%s2758_s7 + $0xc4] ss:$8 sps:$4 sm:$0xff]  }
 0x6c0   : > { %1361 = vmatpush1.bf16.msra.mxu0 %v2066_v54  ;;  %v2171_v54 = vld [vmem:[%s2758_s7 + $0xc0] ss:$8 sps:$4 sm:$0xff]  }
 0x6c1   : > { %1362 = vmatprep.subr.bf16.mxu0 %v2074_v55 }
 0x6c4   : > { %1363 = vmatpush1.bf16.msra.mxu0 %v2072_v56 }
 0x6c5   : > { %1364 = vmatprep.subr.bf16.mxu0 %v2080_v57 }
 0x6c8   : > { %1365 = vmatpush1.bf16.msra.mxu0 %v2078_v60  ;;  %v2174_v60 = vld [vmem:[%s2758_s7 + $0xd0] ss:$8 sps:$4 sm:$0xff]  }
 0x6c9   : > { %1366 = vmatprep.subr.bf16.mxu0 %v2086_v61  ;;  %v2179_v61 = vld [vmem:[%s2758_s7 + $0xe4] ss:$8 sps:$4 sm:$0xff]  }
 0x6cc   : > { %1367 = vmatpush1.bf16.msra.mxu0 %v2084_v62  ;;  %v2177_v62 = vld [vmem:[%s2758_s7 + $0xe0] ss:$8 sps:$4 sm:$0xff]  }
 0x6cd   : > { %1368 = vmatprep.subr.bf16.mxu0 %v2092_v63  ;;  %v2182_v63 = vld [vmem:[%s2758_s7 + $0xf4] ss:$8 sps:$4 sm:$0xff]  }
 0x6d0   : > { %1369 = vmatpush1.bf16.msra.mxu0 %v2090_v0  ;;  %v2180_v0 = vld [vmem:[%s2758_s7 + $0xf0] ss:$8 sps:$4 sm:$0xff]  }
 0x6d1   : > { %1370 = vmatprep.subr.bf16.mxu0 %v2098_v1  ;;  %v1393_v1 = vld [vmem:[%s2757_s6] sm:$0x3] }
 0x6d4   : > { %1371 = vmatpush1.bf16.msra.mxu0 %v2096_v2 }
 0x6d5   : > { %1372 = vmatprep.subr.bf16.mxu0 %v2104_v3 }
 0x6d8   : > { %1373 = vmatpush1.bf16.msra.mxu0 %v2102_v4 }
 0x6d9   : > { %1374 = vmatprep.subr.bf16.mxu0 %v2110_v7  ;;  %v1398_v7 = vrot.slane %v1393_v1, %v2300_v6 }
 0x6dc   : > { %1375 = vmatpush1.bf16.msra.mxu0 %v2108_v8 }
 0x6dd   : > { %1376 = vmatprep.subr.bf16.mxu0 %v2116_v10 }
 0x6e0   : > { %1377 = vmatpush1.bf16.msra.mxu0 %v2114_v11 }
 0x6e1   : > { %1378 = vmatprep.subr.bf16.mxu0 %v2122_v12  ;;  %v1402_v12 = vrot.slane %v1393_v1, %v2304_v9 }
 0x6e4   : > { %1379 = vmatpush1.bf16.msra.mxu0 %v2120_v13 }
 0x6e5   : > { %1380 = vmatprep.subr.bf16.mxu0 %v2128_v14 }
 0x6e8   : > { %1381 = vmatpush1.bf16.msra.mxu0 %v2126_v15 }
 0x6e9   : > { %1382 = vmatprep.subr.bf16.mxu0 %v2134_v16 }
 0x6ec   : > { %1383 = vmatpush1.bf16.msra.mxu0 %v2132_v17 }
 0x742   : > { %v634_v19 = vpop.f32.mrb[0].mxu0  ;;  %v675_v20 = vpop.f32.mrb[0].mxu1 }
 0x743   : > { %v636_v21 = vpop.f32.mrb[1].mxu0  ;;  %v677_v22 = vpop.f32.mrb[1].mxu1  ;;  %v682_v29 = vpack.c.bf16 %v634_v19, %v634_v19  ;;  %v684_v30 = vpack.c.bf16 %v675_v20, %v675_v20 }
 0x744   : > { %v683_v23 = vpack.c.bf16 %v636_v21, %v636_v21  ;;  %v685_v24 = vpack.c.bf16 %v677_v22, %v677_v22  ;;  %v638_v26 = vpop.f32.mrb[2].mxu0  ;;  %v679_v27 = vpop.f32.mrb[2].mxu1 }
 0x745   : > { %v639_v31 = vpop.f32.mrb[3].mxu0  ;;  %v680_v32 = vpop.f32.mrb[3].mxu1  ;;  %v1443_v26 = vld [vmem:[%s2759_s8] sm:$0x3] }
 0x746   : > { %1343 = vmatprep.mubr.bf16.mxu1 %v683_v23  ;;  %1384 = vmatprep.mubr.bf16.mxu0 %v685_v24  ;;  %v1448_v27 = vrot.slane %v1443_v26, %v2300_v6 }
 0x747   : > { %1344 = vmatmul.mubr.bf16.vlgmr.msra.gmra.mrb[4].mxu1 %v682_v29  ;;  %1385 = vmatmul.mubr.bf16.vlgmr.msra.gmra.mrb[8].mxu0 %v684_v30 }
 0x748   : > { %1616 = vmatpush1.bf16.msra.mxu1 %v2135_v28  ;;  %v1452_v28 = vrot.slane %v1443_v26, %v2304_v9 }
 0x749   : > { %1617 = vmatprep.subr.bf16.mxu1 %v2140_v33 }
 0x74c   : > { %1618 = vmatpush1.bf16.msra.mxu1 %v2138_v25 }
 0x74d   : > { %1619 = vmatprep.subr.bf16.mxu1 %v2143_v34 }
 0x750   : > { %1620 = vmatpush1.bf16.msra.mxu1 %v2141_v35 }
 0x751   : > { %1621 = vmatprep.subr.bf16.mxu1 %v2146_v36 }
 0x754   : > { %1622 = vmatpush1.bf16.msra.mxu1 %v2144_v37 }
 0x755   : > { %1623 = vmatprep.subr.bf16.mxu1 %v2149_v38 }
 0x758   : > { %1624 = vmatpush1.bf16.msra.mxu1 %v2147_v39 }
 0x759   : > { %1625 = vmatprep.subr.bf16.mxu1 %v2152_v5 }
 0x75c   : > { %1626 = vmatpush1.bf16.msra.mxu1 %v2150_v40 }
 0x75d   : > { %1627 = vmatprep.subr.bf16.mxu1 %v2155_v42 }
 0x760   : > { %1628 = vmatpush1.bf16.msra.mxu1 %v2153_v43 }
 0x761   : > { %1629 = vmatprep.subr.bf16.mxu1 %v2158_v44 }
 0x764   : > { %1630 = vmatpush1.bf16.msra.mxu1 %v2156_v45 }
 0x765   : > { %1631 = vmatprep.subr.bf16.mxu1 %v2161_v46 }
 0x768   : > { %1632 = vmatpush1.bf16.msra.mxu1 %v2159_v47 }
 0x769   : > { %1633 = vmatprep.subr.bf16.mxu1 %v2164_v48 }
 0x76c   : > { %1634 = vmatpush1.bf16.msra.mxu1 %v2162_v49 }
 0x76d   : > { %1635 = vmatprep.subr.bf16.mxu1 %v2167_v41 }
 0x770   : > { %1636 = vmatpush1.bf16.msra.mxu1 %v2165_v50 }
 0x771   : > { %1637 = vmatprep.subr.bf16.mxu1 %v2170_v51 }
 0x774   : > { %1638 = vmatpush1.bf16.msra.mxu1 %v2168_v52 }
 0x775   : > { %1639 = vmatprep.subr.bf16.mxu1 %v2173_v53 }
 0x778   : > { %1640 = vmatpush1.bf16.msra.mxu1 %v2171_v54 }
 0x779   : > { %1641 = vmatprep.subr.bf16.mxu1 %v2176_v59 }
 0x77c   : > { %1642 = vmatpush1.bf16.msra.mxu1 %v2174_v60 }
 0x77d   : > { %1643 = vmatprep.subr.bf16.mxu1 %v2179_v61 }
 0x780   : > { %1644 = vmatpush1.bf16.msra.mxu1 %v2177_v62 }
 0x781   : > { %1645 = vmatprep.subr.bf16.mxu1 %v2182_v63 }
 0x782   : > { %v984_v55 = vpop.f32.mrb[4].mxu0 }
 0x783   : > { %v986_v56 = vpop.f32.mrb[5].mxu0 }
 0x784   : > { %v988_v57 = vpop.f32.mrb[6].mxu0  ;;  %1646 = vmatpush1.bf16.msra.mxu1 %v2180_v0 }
 0x785   : > { %v989_v58 = vpop.f32.mrb[7].mxu0 }
 0x81a   : > { %v1345_v2 = vpop.f32.mrb[4].mxu1  ;;  %v1386_v3 = vpop.f32.mrb[8].mxu0 }
 0x81b   : > { %v1346_v4 = vadd.f32 %v1345_v2, %v984_v55  ;;  %v1347_v8 = vpop.f32.mrb[5].mxu1  ;;  %v1388_v10 = vpop.f32.mrb[9].mxu0 }
 0x81c   : > { %v1348_v11 = vadd.f32 %v1347_v8, %v986_v56  ;;  %v1349_v13 = vpop.f32.mrb[6].mxu1  ;;  %v1390_v14 = vpop.f32.mrb[10].mxu0 }
 0x81d   : > { %v1387_v15 = vadd.f32 %v1386_v3, %v1346_v4  ;;  %v1350_v16 = vpop.f32.mrb[7].mxu1  ;;  %v1391_v17 = vpop.f32.mrb[11].mxu0 }
 0x81e   : > { %v1389_v18 = vadd.f32 %v1388_v10, %v1348_v11 }
 0x81f   : > { %v1405_v19 = vadd.f32 %v1398_v7, %v1387_v15 }
 0x820   : > { %v1406_v20 = vadd.f32 %v1402_v12, %v1389_v18 }
 0x821   : > { %v1407_v21 = vmax.f32 %v1405_v19, 0.0 }
 0x822   : > { %v1408_v22 = vmax.f32 %v1406_v20, 0.0 }
 0x823   : > { %v1409_v24 = vpack.c.bf16 %v1407_v21, %v1407_v21 }
 0x824   : > { %v1410_v23 = vpack.c.bf16 %v1408_v22, %v1408_v22 }
 0x826   : > { %1647 = vmatprep.mubr.bf16.mxu1 %v1410_v23 }
 0x827   : > { %1648 = vmatmul.mubr.bf16.vlgmr.msra.gmra.mrb[8].mxu1 %v1409_v24 }
 0x8fa   : > { %v1649_v29 = vpop.f32.mrb[8].mxu1 }
 0x8fb   : > { %v1650_v30 = vadd.f32 %v1649_v29, %v1448_v27  ;;  %v1651_v31 = vpop.f32.mrb[9].mxu1 }
 0x8fc   : > { %v1652_v32 = vadd.f32 %v1651_v31, %v1452_v28  ;;  %v1653_v33 = vpop.f32.mrb[10].mxu1 }
 0x8fd   : > { %v1656_v25 = vmax.f32 %v1650_v30, 0.0  ;;  %v1654_v34 = vpop.f32.mrb[11].mxu1 }
 0x8fe   : > { %v1657_v35 = vmax.f32 %v1652_v32, 0.0 }
 0x900   : > { %v1954_v36 = vpack.c.bf16 %v1657_v35, %v1656_v25 }
 0x902   : > { %1666 = vst [vmem:[%s433_s17] sm:$0xff] %v1954_v36 }
 0x903 PF: > { %s19_s11 = sadd.s32 1, %s2213_s11   ;;  %s2761_s30 = smov %s2209_s10 }
 0x904   : > { %p16_p5 = scmp.ge.s32.totalorder %s19_s11, 4   ;;  %s2762_s10 = smov %s2764_s12 }
 0x906   :  { %18 = sbr.rel (!%p16_p5) target bundleno = 2 (0x2), region = 95 }

// kernel: decoder_forward.6
= control target key start
LH: loop header
LB: loop body
LE: loop exit
PB: predicated region body
PF: predicated region fallthrough
CT: control target
= control target key end

     0   :  { %s2106_s30 = smov 0   ;;  %s2108_s10 = smov 0   ;;  %s2529_s0 = inlined_call_operand.vmem [shape: f32[2,32,3], index: 0, kind: input, shape index: {}]   ;;  %s2530_s1 = inlined_call_operand.vmem [shape: f32[2,3,16], index: 1, kind: input, shape index: {}]   ;;  %s2531_s2 = inlined_call_operand.vmem [shape: bf16[2,16,256], index: 2, kind: input, shape index: {}]   ;;  %s2532_s3 = inlined_call_operand.vmem [shape: bf16[2,32,64], index: 3, kind: input, shape index: {}]   ;;  %s2533_s4 = inlined_call_operand.vmem [shape: bf16[256,256], index: 4, kind: input, shape index: {}]   ;;  %s2534_s5 = inlined_call_operand.vmem [shape: bf16[64,256], index: 5, kind: input, shape index: {}]   ;;  %s2535_s6 = inlined_call_operand.vmem [shape: f32[1,256], index: 6, kind: input, shape index: {}]   ;;  %s2536_s7 = inlined_call_operand.vmem [shape: bf16[256,128], index: 7, kind: input, shape index: {}]   ;;  %s2537_s8 = inlined_call_operand.vmem [shape: f32[1,128], index: 8, kind: input, shape index: {}]   ;;  %s2538_s9 = inlined_call_operand.vmem [shape: bf16[2,32,128], index: 9, kind: output, shape index: {}]  }
   0x1   :  { %s2110_s11 = smov 0  }
   0x2 LB: > { %s31_s12 = sadd.s32 1, %s2046_s10  ;;  %p1731_p0 = scmp.ge.s32.totalorder %s2050_s11, 1  ;;  %s2050_s11 = sphi %s2110_s11, %s19_s11   ;;  %s2046_s10 = sphi %s2108_s10, %s2540_s10   ;;  %s2042_s30 = sphi %s2106_s30, %s2539_s30  }
   0x3   : > { %p33_p1 = scmp.ge.s32.totalorder %s31_s12, 2  ;;  %p344_p2 = scmp.lt.s32.totalorder %s2050_s11, 3 }
   0x5   : > { %s2542_s12 = smov (%p33_p1, %s31_s12), 0  ;;  %p345_p3 = pnand %p1731_p0, %p344_p2 }
   0x6   : > { %p407_p4 = scmp.lt.s32.totalorder (!%p345_p3), %s2042_s30, 1  ;;  %v2052_v0 = vmov (!%p345_p3), 2   ;;  %v2053_v1 = vmov (!%p345_p3), 1   ;;  %v2054_v2 = vmov (!%p345_p3), 0   ;;  %v473_v7 = vlaneseq (!%p345_p3) }
   0x7   : > { %348 = sbr.rel (%p345_p3) target bundleno = 2334 (0x91e), region = 56  ;;  %1908 = vset.pattern.permute.xlu0 (!%p345_p3), %v2052_v0  ;;  %1907 = vset.pattern.permute.xlu1 (!%p345_p3), %v2053_v1  ;;  %vm551_vm0 = vcmask (!%p345_p3), 130048  }
   0x8   : > { %966 = vmatprep.mubr.bf16.mxu0 (!%p345_p3), %v2054_v2  ;;  %v2135_v8 = vshrl.u32 (!%p345_p3), %v473_v7, 7 }
   0xa   : > { %v499_v9 = vsub.s32 (!%p345_p3), 1, %v2135_v8  ;;  %v523_v10 = vsub.s32 (!%p345_p3), 2, %v2135_v8  ;;  %v475_v12 = vsub.s32 (!%p345_p3), 0, %v2135_v8 }
   0xe   : > { %s2544_s30 = smov (!%p407_p4, %s2042_s30), 1 }
   0xf   : > { %s1824_s13 = sshll.u32 %s2544_s30, 5  ;;  %s1734_s17 = sshll.u32 %s2544_s30, 2 }
  0x10   : > { %s414_s16 = scalar_lea.vmem %s2529_s0, %s1824_s13  ;;  %s419_s20 = scalar_lea.vmem %s2530_s1, %s1734_s17 }
  0x11   : > { %v446_v3 = vld [vmem:[%s414_s16] sm:$0xff]  ;;  %v447_v4 = vld [vmem:[%s414_s16 + $0x8] sm:$0xff]  ;;  %v449_v5 = vld [vmem:[%s414_s16 + $0x18] sm:$0xff]  ;;  %s2315_s21 = sshll.u32 %s2544_s30, 4 }
  0x12   : > { %506 = vperm.xlu0 %1908, %v446_v3   ;;  %482 = vperm.xlu1 %1907, %v446_v3   ;;  %v448_v6 = vld [vmem:[%s414_s16 + $0x10] sm:$0xff]  ;;  %v450_v11 = vld [vmem:[%s419_s20] sm:$0x7]  ;;  %s424_s24 = scalar_lea.vmem %s2531_s2, %s2315_s21  ;;  %s2325_s27 = scalar_lea.vmem %s2532_s3, %s2315_s21 }
  0x13   : > { %v500_v13 = vrot.slane %v450_v11, %v499_v9  ;;  %v524_v15 = vrot.slane %v450_v11, %v523_v10  ;;  %v476_v17 = vrot.slane %v450_v11, %v475_v12  ;;  %s443_s14 = scalar_lea.vmem %s2538_s9, %s2315_s21 }
  0x16   : > { %1909 = vset.pattern.permute.xlu0 %v2054_v2  ;;  %486 = vperm.xlu1 %1907, %v447_v4  }
  0x17   : > { %455 = vperm.xlu0 %1909, %v446_v3  }
  0x1a   : > { %1910 = vset.pattern.permute.xlu1 %v2052_v0 }
  0x1b   : > { %460 = vperm.xlu0 %1909, %v447_v4   ;;  %510 = vperm.xlu1 %1910, %v447_v4  }
  0x1f   : > { %1911 = vset.pattern.permute.xlu1 %v2054_v2  ;;  %470 = vperm.xlu0 %1909, %v449_v5  }
  0x20   : > { %465 = vperm.xlu1 %1911, %v448_v6  }
  0x23   : > { %1913 = vset.pattern.permute.xlu0 %v2052_v0 }
  0x24   : > { %1912 = vset.pattern.permute.xlu1 %v2053_v1  ;;  %514 = vperm.xlu0 %1913, %v448_v6  }
  0x25   : > { %490 = vperm.xlu1 %1912, %v448_v6  }
  0x29   : > { %494 = vperm.xlu1 %1912, %v449_v5  }
  0x2d   : > { %1914 = vset.pattern.permute.xlu1 %v2052_v0  ;;  %v2164_v0 = vand.u32 127, %v473_v7 }
  0x2e   : > { %518 = vperm.xlu1 %1914, %v449_v5  }
  0x91   : > { %v483_v14 = vpop.permute.xlu1 %482  ;;  %v507_v16 = vpop.permute.xlu0 %506 }
  0x92   : > { %v501_v18 = vsub.f32 %v483_v14, %v500_v13  ;;  %v525_v19 = vsub.f32 %v507_v16, %v524_v15 }
  0x94   : > { %v533_v23 = vmul.f32 %v501_v18, %v501_v18  ;;  %v541_v24 = vmul.f32 %v525_v19, %v525_v19 }
  0x95   : > { %v487_v20 = vpop.permute.xlu1 %486 }
  0x96   : > { %v456_v21 = vpop.permute.xlu0 %455  ;;  %v502_v25 = vsub.f32 %v487_v20, %v500_v13 }
  0x97   : > { %v477_v22 = vsub.f32 %v456_v21, %v476_v17 }
  0x98   : > { %v534_v32 = vmul.f32 %v502_v25, %v502_v25 }
  0x99   : > { %v529_v26 = vmul.f32 %v477_v22, %v477_v22 }
  0x9a   : > { %v461_v27 = vpop.permute.xlu0 %460  ;;  %v511_v28 = vpop.permute.xlu1 %510 }
  0x9b   : > { %v537_v29 = vadd.f32 %v533_v23, %v529_v26  ;;  %v478_v30 = vsub.f32 %v461_v27, %v476_v17  ;;  %v526_v31 = vsub.f32 %v511_v28, %v524_v15 }
  0x9d   : > { %v530_v33 = vmul.f32 %v478_v30, %v478_v30  ;;  %v2147_v34 = vadd.f32 %v541_v24, %v537_v29  ;;  %v542_v36 = vmul.f32 %v526_v31, %v526_v31 }
  0x9e   : > { %v471_v37 = vpop.permute.xlu0 %470 }
  0x9f   : > { %v538_v35 = vadd.f32 %v534_v32, %v530_v33  ;;  %v466_v38 = vpop.permute.xlu1 %465  ;;  %v552_v39 = vsel %vm551_vm0, %v2147_v34, inf  ;;  %v480_v53 = vsub.f32 %v471_v37, %v476_v17 }
  0xa0   : > { %553 = vmin.xlane.f32.xlu1 %v552_v39  ;;  %v479_v41 = vsub.f32 %v466_v38, %v476_v17 }
  0xa1   : > { %v2151_v40 = vadd.f32 %v542_v36, %v538_v35  ;;  %v532_v58 = vmul.f32 %v480_v53, %v480_v53 }
  0xa2   : > { %v531_v47 = vmul.f32 %v479_v41, %v479_v41 }
  0xa3   : > { %v555_v42 = vsel %vm551_vm0, %v2151_v40, inf  ;;  %v515_v43 = vpop.permute.xlu0 %514 }
  0xa4   : > { %556 = vmin.xlane.f32.xlu0 %v555_v42  ;;  %v491_v44 = vpop.permute.xlu1 %490  ;;  %v527_v45 = vsub.f32 %v515_v43, %v524_v15 }
  0xa5   : > { %v503_v46 = vsub.f32 %v491_v44, %v500_v13 }
  0xa6   : > { %v543_v49 = vmul.f32 %v527_v45, %v527_v45 }
  0xa7   : > { %v535_v48 = vmul.f32 %v503_v46, %v503_v46 }
  0xa8   : > { %v495_v50 = vpop.permute.xlu1 %494 }
  0xa9   : > { %v539_v51 = vadd.f32 %v535_v48, %v531_v47  ;;  %v504_v52 = vsub.f32 %v495_v50, %v500_v13 }
  0xab   : > { %v2155_v54 = vadd.f32 %v543_v49, %v539_v51  ;;  %v536_v55 = vmul.f32 %v504_v52, %v504_v52 }
  0xad   : > { %v519_v56 = vpop.permute.xlu1 %518  ;;  %v558_v57 = vsel %vm551_vm0, %v2155_v54, inf  ;;  %v540_v60 = vadd.f32 %v536_v55, %v532_v58 }
  0xae   : > { %v528_v59 = vsub.f32 %v519_v56, %v524_v15  ;;  %559 = vmin.xlane.f32.xlu0 %v558_v57  ;;  %v2055_v57 = vmov 0.0  }
  0xb0   : > { %v544_v61 = vmul.f32 %v528_v59, %v528_v59 }
  0xb2   : > { %v2159_v62 = vadd.f32 %v544_v61, %v540_v60 }
  0xb4   : > { %v561_v63 = vsel %vm551_vm0, %v2159_v62, inf }
  0xb5   : > { %562 = vmin.xlane.f32.xlu1 %v561_v63 }
 0x12d   : > { %v554_v1 = vpop.xlane.xlu1 %553 }
 0x12e   : > { %vm564_vm1 = vcmp.eq.f32.partialorder %v2147_v34, %v554_v1  ;;  %v636_v43 = vadd.f32 1e-08, %v554_v1 }
 0x12f   : > { %v568_v3 = vsel %vm564_vm1, %v2164_v0, 16 }
 0x130   : > { %v572_v4 = vsel %vm551_vm0, %v568_v3, 2147483647  ;;  %1996 = vrcp.f32 %v636_v43 }
 0x131   : > { %v557_v5 = vpop.xlane.xlu0 %556  ;;  %v574_v6 = vshra.s32 %v572_v4, 16  ;;  %v573_v25 = vand.u32 65535, %v572_v4 }
 0x132   : > { %vm565_vm2 = vcmp.eq.f32.partialorder %v2151_v40, %v557_v5  ;;  %v637_v44 = vadd.f32 1e-08, %v557_v5 }
 0x133   : > { %v569_v10 = vsel %vm565_vm2, %v2164_v0, 16  ;;  %v576_v11 = vcvt.s32.f32 %v574_v6  ;;  %v575_v27 = vcvt.s32.f32 %v573_v25 }
 0x134   : > { %v587_v13 = vsel %vm551_vm0, %v569_v10, 2147483647  ;;  %1998 = vrcp.f32 %v637_v44 }
 0x135   : > { %577 = vmin.xlane.f32.xlu0 %v576_v11  ;;  %v589_v14 = vshra.s32 %v587_v13, 16  ;;  %v588_v28 = vand.u32 65535, %v587_v13 }
 0x137   : > { %v591_v7 = vcvt.s32.f32 %v589_v14  ;;  %v590_v31 = vcvt.s32.f32 %v588_v28 }
 0x139   : > { %592 = vmin.xlane.f32.xlu1 %v591_v7 }
 0x13a   : > { %v1997_v55 = vpop.eup %1996 }
 0x13b   : > { %v2172_v15 = vpop.xlane.xlu0 %559 }
 0x13c   : > { %vm566_vm3 = vcmp.eq.f32.partialorder %v2155_v54, %v2172_v15 }
 0x13d   : > { %v570_v16 = vsel %vm566_vm3, %v2164_v0, 16 }
 0x13e   : > { %v602_v17 = vsel %vm551_vm0, %v570_v16, 2147483647  ;;  %v1999_v63 = vpop.eup %1998 }
 0x13f   : > { %v604_v18 = vshra.s32 %v602_v17, 16  ;;  %v603_v33 = vand.u32 65535, %v602_v17 }
 0x141   : > { %v606_v19 = vcvt.s32.f32 %v604_v18  ;;  %v605_v36 = vcvt.s32.f32 %v603_v33 }
 0x142   : > { %v2178_v20 = vpop.xlane.xlu1 %562 }
 0x143   : > { %vm567_vm4 = vcmp.eq.f32.partialorder %v2159_v62, %v2178_v20  ;;  %607 = vmin.xlane.f32.xlu0 %v606_v19 }
 0x144   : > { %v571_v21 = vsel %vm567_vm4, %v2164_v0, 16 }
 0x145   : > { %v617_v22 = vsel %vm551_vm0, %v571_v21, 2147483647 }
 0x146   : > { %v619_v23 = vshra.s32 %v617_v22, 16  ;;  %v618_v38 = vand.u32 65535, %v617_v22 }
 0x148   : > { %v621_v24 = vcvt.s32.f32 %v619_v23  ;;  %v620_v41 = vcvt.s32.f32 %v618_v38 }
 0x14a   : > { %622 = vmin.xlane.f32.xlu1 %v621_v24 }
 0x1c2   : > { %v578_v26 = vpop.xlane.xlu0 %577 }
 0x1c3   : > { %vm579_vm5 = vcmp.eq.f32.partialorder %v576_v11, %v578_v26  ;;  %v584_v45 = vcvt.f32.s32 %v578_v26 }
 0x1c4   : > { %v580_v29 = vsel %vm579_vm5, %v575_v27, inf }
 0x1c5   : > { %581 = vmin.xlane.f32.xlu0 %v580_v29  ;;  %v585_v47 = vshll.u32 %v584_v45, 16 }
 0x1c6   : > { %v593_v30 = vpop.xlane.xlu1 %592 }
 0x1c7   : > { %vm594_vm6 = vcmp.eq.f32.partialorder %v591_v7, %v593_v30  ;;  %v599_v48 = vcvt.f32.s32 %v593_v30 }
 0x1c8   : > { %v595_v32 = vsel %vm594_vm6, %v590_v31, inf }
 0x1c9   : > { %596 = vmin.xlane.f32.xlu1 %v595_v32  ;;  %v600_v52 = vshll.u32 %v599_v48, 16 }
 0x1d0   : > { %v608_v35 = vpop.xlane.xlu0 %607 }
 0x1d1   : > { %vm609_vm7 = vcmp.eq.f32.partialorder %v606_v19, %v608_v35 }
 0x1d2   : > { %v610_v37 = vsel %vm609_vm7, %v605_v36, inf }
 0x1d3   : > { %611 = vmin.xlane.f32.xlu0 %v610_v37 }
 0x1d7   : > { %v623_v39 = vpop.xlane.xlu1 %622 }
 0x1d8   : > { %vm624_vm8 = vcmp.eq.f32.partialorder %v621_v24, %v623_v39  ;;  %v629_v14 = vcvt.f32.s32 %v623_v39 }
 0x1d9   : > { %v625_v42 = vsel %vm624_vm8, %v620_v41, inf }
 0x1da   : > { %626 = vmin.xlane.f32.xlu1 %v625_v42  ;;  %v630_v17 = vshll.u32 %v629_v14, 16 }
 0x252   : > { %v582_v46 = vpop.xlane.xlu0 %581 }
 0x253   : > { %v583_v49 = vcvt.f32.s32 %v582_v46 }
 0x255   : > { %v586_v50 = vadd.s32 %v585_v47, %v583_v49 }
 0x256   : > { %v597_v51 = vpop.xlane.xlu1 %596 }
 0x257   : > { %v598_v53 = vcvt.f32.s32 %v597_v51  ;;  %vm632_vm9 = vcmp.eq.s32.totalorder %v2164_v0, %v586_v50 }
 0x258   : > { %v2186_v56 = vsel %vm632_vm9, inf, %v2147_v34  ;;  %v1741_v58 = vsel %vm632_vm9, 1.0, %v2055_v57  ;;  %v614_v34 = vcvt.f32.s32 %v608_v35 }
 0x259   : > { %v601_v59 = vadd.s32 %v600_v52, %v598_v53  ;;  %v668_v60 = vsel %vm551_vm0, %v2186_v56, inf  ;;  %v2191_v61 = vmul.f32 %v1997_v55, %v1741_v58 }
 0x25a   : > { %669 = vmin.xlane.f32.xlu0 %v668_v60  ;;  %v615_v10 = vshll.u32 %v614_v34, 16 }
 0x25b   : > { %vm633_vm10 = vcmp.eq.s32.totalorder %v2164_v0, %v601_v59 }
 0x25c   : > { %v2195_v1 = vsel %vm633_vm10, inf, %v2151_v40  ;;  %v1742_v3 = vsel %vm633_vm10, 1.0, %v2055_v57 }
 0x25d   : > { %v671_v4 = vsel %vm551_vm0, %v2195_v1, inf  ;;  %v2200_v5 = vmul.f32 %v1999_v63, %v1742_v3 }
 0x25e   : > { %672 = vmin.xlane.f32.xlu1 %v671_v4 }
 0x260   : > { %v612_v6 = vpop.xlane.xlu0 %611 }
 0x261   : > { %v613_v11 = vcvt.f32.s32 %v612_v6 }
 0x263   : > { %v2202_v13 = vadd.s32 %v615_v10, %v613_v11 }
 0x265   : > { %vm634_vm11 = vcmp.eq.s32.totalorder %v2164_v0, %v2202_v13 }
 0x266   : > { %v2210_v40 = vsel %vm634_vm11, inf, %v2155_v54 }
 0x267   : > { %v627_v7 = vpop.xlane.xlu1 %626  ;;  %v674_v16 = vsel %vm551_vm0, %v2210_v40, inf }
 0x268   : > { %v628_v18 = vcvt.f32.s32 %v627_v7  ;;  %675 = vmin.xlane.f32.xlu0 %v674_v16 }
 0x26a   : > { %v2214_v19 = vadd.s32 %v630_v17, %v628_v18  ;;  %v638_v17 = vadd.f32 1e-08, %v2172_v15 }
 0x26c   : > { %vm635_vm12 = vcmp.eq.s32.totalorder %v2164_v0, %v2214_v19 }
 0x26d   : > { %v2222_v21 = vsel %vm635_vm12, inf, %v2159_v62 }
 0x26e   : > { %v677_v54 = vsel %vm551_vm0, %v2222_v21, inf }
 0x26f   : > { %678 = vmin.xlane.f32.xlu1 %v677_v54 }
 0x2e7   : > { %v670_v22 = vpop.xlane.xlu0 %669 }
 0x2e8   : > { %vm680_vm13 = vcmp.eq.f32.partialorder %v2186_v56, %v670_v22  ;;  %v752_v3 = vadd.f32 1e-08, %v670_v22 }
 0x2e9   : > { %v684_v23 = vsel %vm680_vm13, %v2164_v0, 16 }
 0x2ea   : > { %v688_v24 = vsel %vm551_vm0, %v684_v23, 2147483647  ;;  %2000 = vrcp.f32 %v752_v3 }
 0x2eb   : > { %v673_v25 = vpop.xlane.xlu1 %672  ;;  %v690_v26 = vshra.s32 %v688_v24, 16  ;;  %v689_v43 = vand.u32 65535, %v688_v24 }
 0x2ec   : > { %vm681_vm14 = vcmp.eq.f32.partialorder %v2195_v1, %v673_v25  ;;  %v753_v34 = vadd.f32 1e-08, %v673_v25 }
 0x2ed   : > { %v685_v27 = vsel %vm681_vm14, %v2164_v0, 16  ;;  %v692_v28 = vcvt.s32.f32 %v690_v26  ;;  %v691_v45 = vcvt.s32.f32 %v689_v43 }
 0x2ee   : > { %v703_v62 = vsel %vm551_vm0, %v685_v27, 2147483647  ;;  %2002 = vrcp.f32 %v753_v34 }
 0x2ef   : > { %693 = vmin.xlane.f32.xlu0 %v692_v28  ;;  %v705_v29 = vshra.s32 %v703_v62, 16  ;;  %v704_v46 = vand.u32 65535, %v703_v62  ;;  %2004 = vrcp.f32 %v638_v17 }
 0x2f1   : > { %v707_v30 = vcvt.s32.f32 %v705_v29  ;;  %v706_v49 = vcvt.s32.f32 %v704_v46 }
 0x2f3   : > { %708 = vmin.xlane.f32.xlu1 %v707_v30 }
 0x2f4   : > { %v2001_v23 = vpop.eup %2000 }
 0x2f5   : > { %v676_v31 = vpop.xlane.xlu0 %675 }
 0x2f6   : > { %vm682_vm15 = vcmp.eq.f32.partialorder %v2210_v40, %v676_v31  ;;  %v754_v24 = vadd.f32 1e-08, %v676_v31 }
 0x2f7   : > { %v686_v32 = vsel %vm682_vm15, %v2164_v0, 16 }
 0x2f8   : > { %v718_v33 = vsel %vm551_vm0, %v686_v32, 2147483647  ;;  %v2003_v62 = vpop.eup %2002  ;;  %2006 = vrcp.f32 %v754_v24 }
 0x2f9   : > { %v720_v35 = vshra.s32 %v718_v33, 16  ;;  %v719_v51 = vand.u32 65535, %v718_v33  ;;  %v639_v33 = vadd.f32 1e-08, %v2178_v20  ;;  %v2005_v43 = vpop.eup %2004 }
 0x2fb   : > { %v722_v36 = vcvt.s32.f32 %v720_v35  ;;  %v721_v53 = vcvt.s32.f32 %v719_v51  ;;  %2008 = vrcp.f32 %v639_v33  ;;  %v1744_v51 = vsel %vm635_vm12, 1.0, %v2055_v57 }
 0x2fc   : > { %v2235_v37 = vpop.xlane.xlu1 %678 }
 0x2fd   : > { %vm683_vm1 = vcmp.eq.f32.partialorder %v2222_v21, %v2235_v37  ;;  %723 = vmin.xlane.f32.xlu0 %v722_v36  ;;  %v755_v35 = vadd.f32 1e-08, %v2235_v37 }
 0x2fe   : > { %v687_v38 = vsel %vm683_vm1, %v2164_v0, 16 }
 0x2ff   : > { %v733_v39 = vsel %vm551_vm0, %v687_v38, 2147483647  ;;  %2010 = vrcp.f32 %v755_v35 }
 0x300   : > { %v735_v41 = vshra.s32 %v733_v39, 16  ;;  %v734_v58 = vand.u32 65535, %v733_v39 }
 0x302   : > { %v737_v42 = vcvt.s32.f32 %v735_v41  ;;  %v736_v60 = vcvt.s32.f32 %v734_v58  ;;  %v1743_v41 = vsel %vm634_vm11, 1.0, %v2055_v57  ;;  %v2007_v20 = vpop.eup %2006 }
 0x304   : > { %738 = vmin.xlane.f32.xlu1 %v737_v42 }
 0x37c   : > { %v694_v44 = vpop.xlane.xlu0 %693 }
 0x37d   : > { %vm695_vm2 = vcmp.eq.f32.partialorder %v692_v28, %v694_v44  ;;  %v700_v4 = vcvt.f32.s32 %v694_v44  ;;  %v658_v44 = vmul.f32 %v2005_v43, %v1743_v41 }
 0x37e   : > { %v696_v47 = vsel %vm695_vm2, %v691_v45, inf }
 0x37f   : > { %697 = vmin.xlane.f32.xlu0 %v696_v47  ;;  %v701_v10 = vshll.u32 %v700_v4, 16 }
 0x380   : > { %v709_v48 = vpop.xlane.xlu1 %708 }
 0x381   : > { %vm710_vm3 = vcmp.eq.f32.partialorder %v707_v30, %v709_v48  ;;  %v715_v11 = vcvt.f32.s32 %v709_v48 }
 0x382   : > { %v711_v50 = vsel %vm710_vm3, %v706_v49, inf }
 0x383   : > { %712 = vmin.xlane.f32.xlu1 %v711_v50  ;;  %v716_v18 = vshll.u32 %v715_v11, 16 }
 0x38a   : > { %v724_v52 = vpop.xlane.xlu0 %723 }
 0x38b   : > { %vm725_vm4 = vcmp.eq.f32.partialorder %v722_v36, %v724_v52 }
 0x38c   : > { %v726_v55 = vsel %vm725_vm4, %v721_v53, inf }
 0x38d   : > { %727 = vmin.xlane.f32.xlu0 %v726_v55 }
 0x391   : > { %v739_v59 = vpop.xlane.xlu1 %738 }
 0x392   : > { %vm740_vm5 = vcmp.eq.f32.partialorder %v737_v42, %v739_v59  ;;  %v745_v42 = vcvt.f32.s32 %v739_v59 }
 0x393   : > { %v741_v63 = vsel %vm740_vm5, %v736_v60, inf }
 0x394   : > { %742 = vmin.xlane.f32.xlu1 %v741_v63  ;;  %v746_v48 = vshll.u32 %v745_v42, 16 }
 0x40c   : > { %v698_v6 = vpop.xlane.xlu0 %697 }
 0x40d   : > { %v699_v14 = vcvt.f32.s32 %v698_v6 }
 0x40f   : > { %v702_v7 = vadd.s32 %v701_v10, %v699_v14 }
 0x410   : > { %v713_v16 = vpop.xlane.xlu1 %712 }
 0x411   : > { %v714_v54 = vcvt.f32.s32 %v713_v16  ;;  %vm748_vm6 = vcmp.eq.s32.totalorder %v2164_v0, %v702_v7 }
 0x412   : > { %v780_v22 = vsel %vm748_vm6, inf, %v2186_v56  ;;  %v1745_v25 = vsel %vm748_vm6, 1.0, %v2055_v57  ;;  %v730_v56 = vcvt.f32.s32 %v724_v52  ;;  %v2009_v52 = vpop.eup %2008 }
 0x413   : > { %v717_v26 = vadd.s32 %v716_v18, %v714_v54  ;;  %v784_v27 = vsel %vm551_vm0, %v780_v22, inf  ;;  %v772_v28 = vmul.f32 %v2001_v23, %v1745_v25  ;;  %v659_v58 = vmul.f32 %v2009_v52, %v1744_v51 }
 0x414   : > { %785 = vmin.xlane.f32.xlu0 %v784_v27  ;;  %v731_v38 = vshll.u32 %v730_v56, 16 }
 0x415   : > { %vm749_vm7 = vcmp.eq.s32.totalorder %v2164_v0, %v717_v26  ;;  %v2248_v15 = vadd.f32 %v772_v28, %v2191_v61 }
 0x416   : > { %v781_v29 = vsel %vm749_vm7, inf, %v2195_v1  ;;  %v1746_v30 = vsel %vm749_vm7, 1.0, %v2055_v57 }
 0x417   : > { %v787_v31 = vsel %vm551_vm0, %v781_v29, inf  ;;  %v773_v32 = vmul.f32 %v2003_v62, %v1746_v30 }
 0x418   : > { %788 = vmin.xlane.f32.xlu1 %v787_v31 }
 0x419   : > { %v2256_v36 = vadd.f32 %v773_v32, %v2200_v5 }
 0x41a   : > { %v728_v61 = vpop.xlane.xlu0 %727 }
 0x41b   : > { %v729_v39 = vcvt.f32.s32 %v728_v61 }
 0x41d   : > { %v732_v1 = vadd.s32 %v731_v38, %v729_v39 }
 0x41f   : > { %vm750_vm8 = vcmp.eq.s32.totalorder %v2164_v0, %v732_v1 }
 0x420   : > { %v782_v37 = vsel %vm750_vm8, inf, %v2210_v40  ;;  %v1747_v5 = vsel %vm750_vm8, 1.0, %v2055_v57  ;;  %v2011_v40 = vpop.eup %2010 }
 0x421   : > { %v743_v45 = vpop.xlane.xlu1 %742  ;;  %v790_v46 = vsel %vm551_vm0, %v782_v37, inf  ;;  %v774_v47 = vmul.f32 %v2007_v20, %v1747_v5 }
 0x422   : > { %v744_v49 = vcvt.f32.s32 %v743_v45  ;;  %791 = vmin.xlane.f32.xlu0 %v790_v46 }
 0x423   : > { %v2266_v50 = vadd.f32 %v774_v47, %v658_v44 }
 0x424   : > { %v747_v13 = vadd.s32 %v746_v48, %v744_v49 }
 0x426   : > { %vm751_vm9 = vcmp.eq.s32.totalorder %v2164_v0, %v747_v13 }
 0x427   : > { %v783_v53 = vsel %vm751_vm9, inf, %v2222_v21  ;;  %v1748_v55 = vsel %vm751_vm9, 1.0, %v2055_v57 }
 0x428   : > { %v793_v59 = vsel %vm551_vm0, %v783_v53, inf  ;;  %v775_v60 = vmul.f32 %v2011_v40, %v1748_v55 }
 0x429   : > { %794 = vmin.xlane.f32.xlu1 %v793_v59 }
 0x42a   : > { %v2276_v63 = vadd.f32 %v775_v60, %v659_v58 }
 0x4a1   : > { %v786_v3 = vpop.xlane.xlu0 %785 }
 0x4a2   : > { %vm796_vm10 = vcmp.eq.f32.partialorder %v780_v22, %v786_v3  ;;  %v868_v20 = vadd.f32 1e-08, %v786_v3 }
 0x4a3   : > { %v800_v19 = vsel %vm796_vm10, %v2164_v0, 16 }
 0x4a4   : > { %v804_v34 = vsel %vm551_vm0, %v800_v19, 2147483647  ;;  %2012 = vrcp.f32 %v868_v20  ;;  %v1939_v20 = vld [vmem:[%s2533_s4 + $0x60] ss:$8 sps:$4 sm:$0xff]  }
 0x4a5   : > { %v789_v4 = vpop.xlane.xlu1 %788  ;;  %v806_v6 = vshra.s32 %v804_v34, 16  ;;  %v805_v28 = vand.u32 65535, %v804_v34 }
 0x4a6   : > { %vm797_vm11 = vcmp.eq.f32.partialorder %v781_v29, %v789_v4 }
 0x4a7   : > { %v801_v21 = vsel %vm797_vm11, %v2164_v0, 16  ;;  %v808_v10 = vcvt.s32.f32 %v806_v6  ;;  %v807_v29 = vcvt.s32.f32 %v805_v28 }
 0x4a8   : > { %v819_v11 = vsel %vm551_vm0, %v801_v21, 2147483647 }
 0x4a9   : > { %809 = vmin.xlane.f32.xlu0 %v808_v10  ;;  %v821_v14 = vshra.s32 %v819_v11, 16  ;;  %v820_v30 = vand.u32 65535, %v819_v11 }
 0x4ab   : > { %v823_v7 = vcvt.s32.f32 %v821_v14  ;;  %v822_v32 = vcvt.s32.f32 %v820_v30 }
 0x4ad   : > { %824 = vmin.xlane.f32.xlu1 %v823_v7 }
 0x4ae   : > { %v2013_v52 = vpop.eup %2012 }
 0x4af   : > { %v792_v16 = vpop.xlane.xlu0 %791 }
 0x4b0   : > { %vm798_vm12 = vcmp.eq.f32.partialorder %v782_v37, %v792_v16  ;;  %v869_v37 = vadd.f32 1e-08, %v789_v4  ;;  %v870_v40 = vadd.f32 1e-08, %v792_v16 }
 0x4b1   : > { %v802_v17 = vsel %vm798_vm12, %v2164_v0, 16 }
 0x4b2   : > { %v834_v18 = vsel %vm551_vm0, %v802_v17, 2147483647  ;;  %2014 = vrcp.f32 %v869_v37  ;;  %v1940_v37 = vld [vmem:[%s2533_s4 + $0x74] ss:$8 sps:$4 sm:$0xff]  }
 0x4b3   : > { %v836_v54 = vshra.s32 %v834_v18, 16  ;;  %v835_v35 = vand.u32 65535, %v834_v18  ;;  %2016 = vrcp.f32 %v870_v40  ;;  %v1960_v40 = vld [vmem:[%s2533_s4 + $0xc0] ss:$8 sps:$4 sm:$0xff]  }
 0x4b5   : > { %v838_v23 = vcvt.s32.f32 %v836_v54  ;;  %v837_v38 = vcvt.s32.f32 %v835_v35  ;;  %v1928_v35 = vld [vmem:[%s2533_s4 + $0x34] ss:$8 sps:$4 sm:$0xff]  }
 0x4b6   : > { %v795_v24 = vpop.xlane.xlu1 %794 }
 0x4b7   : > { %vm799_vm13 = vcmp.eq.f32.partialorder %v783_v53, %v795_v24  ;;  %839 = vmin.xlane.f32.xlu0 %v838_v23  ;;  %v871_v6 = vadd.f32 1e-08, %v795_v24 }
 0x4b8   : > { %v803_v22 = vsel %vm799_vm13, %v2164_v0, 16 }
 0x4b9   : > { %v849_v25 = vsel %vm551_vm0, %v803_v22, 2147483647  ;;  %2018 = vrcp.f32 %v871_v6 }
 0x4ba   : > { %v851_v26 = vshra.s32 %v849_v25, 16  ;;  %v850_v1 = vand.u32 65535, %v849_v25 }
 0x4bc   : > { %v853_v27 = vcvt.s32.f32 %v851_v26  ;;  %v852_v42 = vcvt.s32.f32 %v850_v1  ;;  %v2015_v60 = vpop.eup %2014  ;;  %v1933_v1 = vld [vmem:[%s2533_s4 + $0x40] ss:$8 sps:$4 sm:$0xff]  }
 0x4bd   : > { %v2017_v17 = vpop.eup %2016 }
 0x4be   : > { %854 = vmin.xlane.f32.xlu1 %v853_v27 }
 0x536   : > { %v810_v62 = vpop.xlane.xlu0 %809 }
 0x537   : > { %vm811_vm14 = vcmp.eq.f32.partialorder %v808_v10, %v810_v62  ;;  %v816_v5 = vcvt.f32.s32 %v810_v62 }
 0x538   : > { %v812_v56 = vsel %vm811_vm14, %v807_v29, inf }
 0x539   : > { %813 = vmin.xlane.f32.xlu0 %v812_v56  ;;  %v817_v45 = vshll.u32 %v816_v5, 16  ;;  %v1922_v56 = vld [vmem:[%s2533_s4 + $0x14] ss:$8 sps:$4 sm:$0xff]   ;;  %v1942_v5 = vld [vmem:[%s2533_s4 + $0x70] ss:$8 sps:$4 sm:$0xff]  }
 0x53a   : > { %v825_v31 = vpop.xlane.xlu1 %824 }
 0x53b   : > { %vm826_vm15 = vcmp.eq.f32.partialorder %v823_v7, %v825_v31  ;;  %v831_v46 = vcvt.f32.s32 %v825_v31  ;;  %v1924_v31 = vld [vmem:[%s2533_s4 + $0x10] ss:$8 sps:$4 sm:$0xff]  }
 0x53c   : > { %v827_v33 = vsel %vm826_vm15, %v822_v32, inf  ;;  %v1925_v32 = vld [vmem:[%s2533_s4 + $0x24] ss:$8 sps:$4 sm:$0xff]  }
 0x53d   : > { %828 = vmin.xlane.f32.xlu1 %v827_v33  ;;  %v832_v13 = vshll.u32 %v831_v46, 16  ;;  %v1927_v33 = vld [vmem:[%s2533_s4 + $0x20] ss:$8 sps:$4 sm:$0xff]   ;;  %v1946_v46 = vld [vmem:[%s2533_s4 + $0x94] ss:$8 sps:$4 sm:$0xff]  }
 0x544   : > { %v840_v61 = vpop.xlane.xlu0 %839 }
 0x545   : > { %vm841_vm1 = vcmp.eq.f32.partialorder %v838_v23, %v840_v61  ;;  %v846_v19 = vcvt.f32.s32 %v840_v61  ;;  %v1957_v61 = vld [vmem:[%s2534_s5 + $0x4] ss:$8 sps:$4 sm:$0xff]  }
 0x546   : > { %v842_v39 = vsel %vm841_vm1, %v837_v38, inf  ;;  %v1930_v38 = vld [vmem:[%s2533_s4 + $0x30] ss:$8 sps:$4 sm:$0xff]  }
 0x547   : > { %843 = vmin.xlane.f32.xlu0 %v842_v39  ;;  %v847_v11 = vshll.u32 %v846_v19, 16  ;;  %v1931_v39 = vld [vmem:[%s2533_s4 + $0x44] ss:$8 sps:$4 sm:$0xff]  }
 0x54b   : > { %v855_v41 = vpop.xlane.xlu1 %854 }
 0x54c   : > { %vm856_vm2 = vcmp.eq.f32.partialorder %v853_v27, %v855_v41  ;;  %v861_v16 = vcvt.f32.s32 %v855_v41  ;;  %v2019_v27 = vpop.eup %2018  ;;  %v1934_v41 = vld [vmem:[%s2533_s4 + $0x54] ss:$8 sps:$4 sm:$0xff]  }
 0x54d   : > { %v857_v43 = vsel %vm856_vm2, %v852_v42, inf  ;;  %v1936_v42 = vld [vmem:[%s2533_s4 + $0x50] ss:$8 sps:$4 sm:$0xff]  }
 0x54e   : > { %858 = vmin.xlane.f32.xlu1 %v857_v43  ;;  %v1937_v43 = vld [vmem:[%s2533_s4 + $0x64] ss:$8 sps:$4 sm:$0xff]  }
 0x5c6   : > { %v814_v44 = vpop.xlane.xlu0 %813 }
 0x5c7   : > { %v815_v47 = vcvt.f32.s32 %v814_v44  ;;  %v1943_v44 = vld [vmem:[%s2533_s4 + $0x84] ss:$8 sps:$4 sm:$0xff]  }
 0x5c9   : > { %v818_v48 = vadd.s32 %v817_v45, %v815_v47  ;;  %v1945_v45 = vld [vmem:[%s2533_s4 + $0x80] ss:$8 sps:$4 sm:$0xff]   ;;  %v1948_v47 = vld [vmem:[%s2533_s4 + $0x90] ss:$8 sps:$4 sm:$0xff]  }
 0x5ca   : > { %v829_v49 = vpop.xlane.xlu1 %828 }
 0x5cb   : > { %vm864_vm3 = vcmp.eq.s32.totalorder %v2164_v0, %v818_v48  ;;  %v830_v51 = vcvt.f32.s32 %v829_v49  ;;  %v1949_v48 = vld [vmem:[%s2533_s4 + $0xa4] ss:$8 sps:$4 sm:$0xff]   ;;  %v1951_v49 = vld [vmem:[%s2533_s4 + $0xa0] ss:$8 sps:$4 sm:$0xff]  }
 0x5cc   : > { %v1749_v53 = vsel %vm864_vm3, 1.0, %v2055_v57 }
 0x5cd   : > { %v833_v55 = vadd.s32 %v832_v13, %v830_v51  ;;  %v888_v58 = vmul.f32 %v2013_v52, %v1749_v53  ;;  %v1952_v13 = vld [vmem:[%s2533_s4 + $0xb4] ss:$8 sps:$4 sm:$0xff]   ;;  %v1954_v51 = vld [vmem:[%s2533_s4 + $0xb0] ss:$8 sps:$4 sm:$0xff]   ;;  %v1958_v52 = vld [vmem:[%s2533_s4 + $0xc4] ss:$8 sps:$4 sm:$0xff]  }
 0x5ce   : > { %v1964_v53 = vld [vmem:[%s2533_s4 + $0xd4] ss:$8 sps:$4 sm:$0xff]  }
 0x5cf   : > { %vm865_vm4 = vcmp.eq.s32.totalorder %v2164_v0, %v833_v55  ;;  %v2290_v59 = vadd.f32 %v888_v58, %v2248_v15  ;;  %v1966_v55 = vld [vmem:[%s2533_s4 + $0xd0] ss:$8 sps:$4 sm:$0xff]   ;;  %v1970_v58 = vld [vmem:[%s2533_s4 + $0xe4] ss:$8 sps:$4 sm:$0xff]  }
 0x5d0   : > { %v1750_v3 = vsel %vm865_vm4, 1.0, %v2055_v57 }
 0x5d1   : > { %v896_v34 = vsel %vm551_vm0, %v2290_v59, 0.0  ;;  %v889_v4 = vmul.f32 %v2015_v60, %v1750_v3 }
 0x5d2   : > { %897 = vadd.xlane.f32.xlu0 %v896_v34 }
 0x5d3   : > { %v2296_v21 = vadd.f32 %v889_v4, %v2256_v36  ;;  %v862_v36 = vshll.u32 %v861_v16, 16  ;;  %v1967_v16 = vld [vmem:[%s2534_s5 + $0x20] ss:$8 sps:$4 sm:$0xff]  }
 0x5d4   : > { %v844_v10 = vpop.xlane.xlu0 %843 }
 0x5d5   : > { %v845_v14 = vcvt.f32.s32 %v844_v10  ;;  %v899_v15 = vsel %vm551_vm0, %v2296_v21, 0.0 }
 0x5d6   : > { %900 = vadd.xlane.f32.xlu1 %v899_v15  ;;  %v1963_v15 = vld [vmem:[%s2534_s5 + $0x14] ss:$8 sps:$4 sm:$0xff]  }
 0x5d7   : > { %v848_v7 = vadd.s32 %v847_v11, %v845_v14  ;;  %v1955_v11 = vld [vmem:[%s2534_s5] ss:$8 sps:$4 sm:$0xff]  }
 0x5d9   : > { %vm866_vm5 = vcmp.eq.s32.totalorder %v2164_v0, %v848_v7 }
 0x5da   : > { %v1751_v18 = vsel %vm866_vm5, 1.0, %v2055_v57 }
 0x5db   : > { %v859_v54 = vpop.xlane.xlu1 %858  ;;  %v890_v23 = vmul.f32 %v2017_v17, %v1751_v18 }
 0x5dc   : > { %v860_v24 = vcvt.f32.s32 %v859_v54 }
 0x5dd   : > { %v2303_v22 = vadd.f32 %v890_v23, %v2266_v50  ;;  %v1919_v50 = vld [vmem:[%s2533_s4 + $0x4] ss:$8 sps:$4 sm:$0xff]  }
 0x5de   : > { %v863_v25 = vadd.s32 %v862_v36, %v860_v24  ;;  %1305 = vmatprep.subr.bf16.mxu1 %v1919_v50  ;;  %v1972_v24 = vld [vmem:[%s2533_s4 + $0xe0] ss:$8 sps:$4 sm:$0xff]   ;;  %v1985_v50 = vld [vmem:[%s2536_s7 + $0x10] sm:$0xff]  }
 0x5df   : > { %v902_v26 = vsel %vm551_vm0, %v2303_v22, 0.0 }
 0x5e0   : > { %vm867_vm6 = vcmp.eq.s32.totalorder %v2164_v0, %v863_v25  ;;  %903 = vadd.xlane.f32.xlu0 %v902_v26  ;;  %v1915_v0 = vld [vmem:[%s424_s24 + $0x4] ss:$8 sps:$4 sm:$0xff]   ;;  %v1975_v25 = vld [vmem:[%s2534_s5 + $0x34] ss:$8 sps:$4 sm:$0xff]   ;;  %v1973_v26 = vld [vmem:[%s2534_s5 + $0x30] ss:$8 sps:$4 sm:$0xff]  }
 0x5e1   : > { %v1752_v28 = vsel %vm867_vm6, 1.0, %v2055_v57  ;;  %v1918_v57 = vld [vmem:[%s424_s24] ss:$8 sps:$4 sm:$0xff]   ;;  %934 = vmatprep.subr.bf16.mxu0 %v1915_v0 }
 0x5e2   : > { %v891_v62 = vmul.f32 %v2019_v27, %v1752_v28  ;;  %935 = vmatpush1.bf16.msra.mxu0 %v1918_v57  ;;  %v1978_v27 = vld [vmem:[%s2533_s4 + $0xf0] ss:$8 sps:$4 sm:$0xff]   ;;  %v1917_v28 = vld [vmem:[%s2325_s27] sm:$0xff]   ;;  %v1982_v0 = vld [vmem:[%s2536_s7 + $0x48] sm:$0xff]  }
 0x5e3   : > { %1092 = vmatprep.subr.bf16.mxu0 %v1957_v61  ;;  %v1984_v57 = vld [vmem:[%s2536_s7 + $0x50] sm:$0xff]  }
 0x5e4   : > { %v2310_v29 = vadd.f32 %v891_v62, %v2276_v63  ;;  %v1921_v63 = vld [vmem:[%s2533_s4] ss:$8 sps:$4 sm:$0xff]  }
 0x5e5   : > { %1306 = vmatpush1.bf16.msra.mxu1 %v1921_v63  ;;  %v1979_v62 = vld [vmem:[%s2325_s27 + $0x8] sm:$0xff]   ;;  %v1986_v63 = vld [vmem:[%s2536_s7 + $0x58] sm:$0xff]  }
 0x5e6   : > { %v905_v30 = vsel %vm551_vm0, %v2310_v29, 0.0  ;;  %1307 = vmatprep.subr.bf16.mxu1 %v1922_v56  ;;  %v1987_v56 = vld [vmem:[%s2536_s7 + $0x18] sm:$0xff]  }
 0x5e7   : > { %906 = vadd.xlane.f32.xlu1 %v905_v30  ;;  %v1981_v30 = vld [vmem:[%s2536_s7] sm:$0xff]  }
 0x5e9   : > { %1308 = vmatpush1.bf16.msra.mxu1 %v1924_v31  ;;  %v1988_v31 = vld [vmem:[%s2536_s7 + $0x60] sm:$0xff]  }
 0x5ea   : > { %1309 = vmatprep.subr.bf16.mxu1 %v1925_v32  ;;  %v1989_v32 = vld [vmem:[%s2536_s7 + $0x20] sm:$0xff]  }
 0x5ed   : > { %1310 = vmatpush1.bf16.msra.mxu1 %v1927_v33 }
 0x5ee   : > { %1311 = vmatprep.subr.bf16.mxu1 %v1928_v35 }
 0x5f1   : > { %1312 = vmatpush1.bf16.msra.mxu1 %v1930_v38 }
 0x5f2   : > { %1313 = vmatprep.subr.bf16.mxu1 %v1931_v39 }
 0x5f5   : > { %1314 = vmatpush1.bf16.msra.mxu1 %v1933_v1 }
 0x5f6   : > { %1315 = vmatprep.subr.bf16.mxu1 %v1934_v41 }
 0x5f9   : > { %1316 = vmatpush1.bf16.msra.mxu1 %v1936_v42 }
 0x5fa   : > { %1317 = vmatprep.subr.bf16.mxu1 %v1937_v43 }
 0x5fd   : > { %1318 = vmatpush1.bf16.msra.mxu1 %v1939_v20 }
 0x5fe   : > { %1319 = vmatprep.subr.bf16.mxu1 %v1940_v37 }
 0x601   : > { %1320 = vmatpush1.bf16.msra.mxu1 %v1942_v5 }
 0x602   : > { %1321 = vmatprep.subr.bf16.mxu1 %v1943_v44  ;;  %v1990_v44 = vld [vmem:[%s2536_s7 + $0x68] sm:$0xff]  }
 0x605   : > { %1322 = vmatpush1.bf16.msra.mxu1 %v1945_v45 }
 0x606   : > { %1323 = vmatprep.subr.bf16.mxu1 %v1946_v46  ;;  %v1991_v46 = vld [vmem:[%s2536_s7 + $0x28] sm:$0xff]  }
 0x609   : > { %1324 = vmatpush1.bf16.msra.mxu1 %v1948_v47 }
 0x60a   : > { %1325 = vmatprep.subr.bf16.mxu1 %v1949_v48 }
 0x60d   : > { %1326 = vmatpush1.bf16.msra.mxu1 %v1951_v49 }
 0x60e   : > { %1327 = vmatprep.subr.bf16.mxu1 %v1952_v13  ;;  %v1992_v13 = vld [vmem:[%s2536_s7 + $0x70] sm:$0xff]  }
 0x611   : > { %1328 = vmatpush1.bf16.msra.mxu1 %v1954_v51  ;;  %v1993_v51 = vld [vmem:[%s2536_s7 + $0x30] sm:$0xff]  }
 0x612   : > { %1329 = vmatprep.subr.bf16.mxu1 %v1958_v52  ;;  %v1994_v52 = vld [vmem:[%s2536_s7 + $0x78] sm:$0xff]  }
 0x615   : > { %1330 = vmatpush1.bf16.msra.mxu1 %v1960_v40  ;;  %v1995_v40 = vld [vmem:[%s2536_s7 + $0x38] sm:$0xff]  }
 0x616   : > { %1331 = vmatprep.subr.bf16.mxu1 %v1964_v53 }
 0x619   : > { %1332 = vmatpush1.bf16.msra.mxu1 %v1966_v55 }
 0x61a   : > { %1333 = vmatprep.subr.bf16.mxu1 %v1970_v58 }
 0x61d   : > { %1334 = vmatpush1.bf16.msra.mxu1 %v1972_v24 }
 0x65f   : > { %v898_v60 = vpop.xlane.xlu0 %897 }
 0x660   : > { %2020 = vrcp.f32 %v898_v60 }
 0x663   : > { %v901_v3 = vpop.xlane.xlu1 %900 }
 0x664   : > { %2022 = vrcp.f32 %v901_v3  ;;  %v1358_v3 = vld [vmem:[%s2535_s6] sm:$0x3] }
 0x66a   : > { %v2021_v19 = vpop.eup %2020 }
 0x66b   : > { %v912_v4 = vmul.f32 %v2021_v19, %v2290_v59  ;;  %v1961_v59 = vld [vmem:[%s2534_s5 + $0x10] ss:$8 sps:$4 sm:$0xff]   ;;  %v1363_v19 = vrot.slane %v1358_v3, %v475_v12 }
 0x66d   : > { %v904_v10 = vpop.xlane.xlu0 %903 }
 0x66e   : > { %v2023_v34 = vpop.eup %2022  ;;  %2024 = vrcp.f32 %v904_v10 }
 0x66f   : > { %v913_v6 = vmul.f32 %v2023_v34, %v2296_v21  ;;  %v1969_v21 = vld [vmem:[%s2534_s5 + $0x24] ss:$8 sps:$4 sm:$0xff]  }
 0x671   : > { %v916_v14 = vpack.c.bf16 %v913_v6, %v912_v4  ;;  %v1367_v4 = vrot.slane %v1358_v3, %v499_v9 }
 0x673   : > { %1755 = vmatmul.mubr.msk.bf16.vlgmr.msra.gmra.mrb[0].mxu0 %vm551_vm0, %v916_v14 }
 0x674   : > { %v907_v7 = vpop.xlane.xlu1 %906  ;;  %976 = vmatprep.mubr.bf16.mxu0 %v2054_v2  ;;  %1093 = vmatpush1.bf16.msra.mxu0 %v1955_v11 }
 0x675   : > { %2026 = vrcp.f32 %v907_v7  ;;  %1094 = vmatprep.subr.bf16.mxu0 %v1963_v15 }
 0x678   : > { %1095 = vmatpush1.bf16.msra.mxu0 %v1961_v59  ;;  %v2025_v17 = vpop.eup %2024 }
 0x679   : > { %1096 = vmatprep.subr.bf16.mxu0 %v1969_v21  ;;  %v914_v54 = vmul.f32 %v2025_v17, %v2303_v22  ;;  %v1976_v22 = vld [vmem:[%s2533_s4 + $0xf4] ss:$8 sps:$4 sm:$0xff]  }
 0x67a   : > { %1335 = vmatprep.subr.bf16.mxu1 %v1976_v22 }
 0x67b   : > { %1336 = vmatpush1.bf16.msra.mxu1 %v1978_v27 }
 0x67c   : > { %1097 = vmatpush1.bf16.msra.mxu0 %v1967_v16 }
 0x67d   : > { %1098 = vmatprep.subr.bf16.mxu0 %v1975_v25 }
 0x67f   : > { %v2027_v18 = vpop.eup %2026 }
 0x680   : > { %v915_v23 = vmul.f32 %v2027_v18, %v2310_v29  ;;  %1099 = vmatpush1.bf16.msra.mxu0 %v1973_v26  ;;  %v1980_v29 = vld [vmem:[%s2536_s7 + $0x40] sm:$0xff]  }
 0x681   : > { %1843 = vmatprep.subr.bf16.mxu0 %v1980_v29 }
 0x682   : > { %v917_v36 = vpack.c.bf16 %v915_v23, %v914_v54 }
 0x684   : > { %1756 = vmatmul.mubr.msk.bf16.gmra.mrb[4].mxu0 %vm551_vm0, %v917_v36  ;;  %vm1085_vm0 = vcmask 523264  }
 0x685   : > { %1124 = vmatprep.mubr.bf16.mxu0 %v2054_v2 }
 0x68c   : > { %1767 = vmatmul.mubr.msk.bf16.vlgmr.msra.gmra.mrb[8].mxu0 %vm1085_vm0, %v1917_v28 }
 0x68d   : > { %1134 = vmatprep.mubr.bf16.mxu0 %v2054_v2  ;;  %1844 = vmatpush3.bf16.msra.mxu0 %v1981_v30  ;;  %v1983_v2 = vld [vmem:[%s2536_s7 + $0x8] sm:$0xff]  }
 0x68e   : > { %1845 = vmatprep.subr.bf16.mxu0 %v1982_v0 }
 0x691   : > { %1846 = vmatpush3.bf16.msra.mxu0 %v1983_v2 }
 0x692   : > { %1847 = vmatprep.subr.bf16.mxu0 %v1984_v57 }
 0x694   : > { %1768 = vmatmul.mubr.msk.bf16.gmra.mrb[12].mxu0 %vm1085_vm0, %v1979_v62 }
 0x695   : > { %1848 = vmatpush3.bf16.msra.mxu0 %v1985_v50 }
 0x696   : > { %1849 = vmatprep.subr.bf16.mxu0 %v1986_v63 }
 0x699   : > { %1850 = vmatpush3.bf16.msra.mxu0 %v1987_v56 }
 0x69a   : > { %1851 = vmatprep.subr.bf16.mxu0 %v1988_v31 }
 0x69d   : > { %1852 = vmatpush3.bf16.msra.mxu0 %v1989_v32 }
 0x69e   : > { %1853 = vmatprep.subr.bf16.mxu0 %v1990_v44 }
 0x6a1   : > { %1854 = vmatpush3.bf16.msra.mxu0 %v1991_v46 }
 0x6a2   : > { %1855 = vmatprep.subr.bf16.mxu0 %v1992_v13 }
 0x6a5   : > { %1856 = vmatpush3.bf16.msra.mxu0 %v1993_v51 }
 0x6a6   : > { %1857 = vmatprep.subr.bf16.mxu0 %v1994_v52 }
 0x6a9   : > { %1858 = vmatpush3.bf16.msra.mxu0 %v1995_v40 }
 0x746   : > { %v968_v33 = vpop.f32.mrb[0].mxu0 }
 0x747   : > { %v970_v35 = vpop.f32.mrb[1].mxu0 }
 0x748   : > { %v972_v61 = vpop.f32.mrb[2].mxu0 }
 0x749   : > { %v987_v38 = vpack.c.bf16 %v972_v61, %v968_v33  ;;  %v974_v39 = vpop.f32.mrb[3].mxu0  ;;  %v1801_v61 = vld [vmem:[%s2537_s8] ss:$0 sm:$0xff] }
 0x74a   : > { %v988_v1 = vpack.c.bf16 %v974_v39, %v970_v35 }
 0x74c   : > { %1337 = vmatprep.mubr.bf16.mxu1 %v988_v1 }
 0x74d   : > { %1338 = vmatmul.mubr.bf16.vlgmr.msra.gmra.mrb[0].mxu1 %v987_v38 }
 0x757   : > { %v978_v41 = vpop.f32.mrb[4].mxu0 }
 0x758   : > { %v980_v42 = vpop.f32.mrb[5].mxu0 }
 0x759   : > { %v982_v43 = vpop.f32.mrb[6].mxu0 }
 0x75a   : > { %v989_v20 = vpack.c.bf16 %v982_v43, %v978_v41  ;;  %v984_v37 = vpop.f32.mrb[7].mxu0 }
 0x75b   : > { %v990_v5 = vpack.c.bf16 %v984_v37, %v980_v42 }
 0x75d   : > { %1347 = vmatprep.mubr.bf16.mxu1 %v990_v5 }
 0x75e   : > { %1348 = vmatmul.mubr.bf16.gmra.mrb[4].mxu1 %v989_v20 }
 0x75f   : > { %v1126_v45 = vpop.f32.mrb[8].mxu0 }
 0x760   : > { %v1128_v47 = vpop.f32.mrb[9].mxu0 }
 0x761   : > { %v1130_v48 = vpop.f32.mrb[10].mxu0 }
 0x762   : > { %v1132_v49 = vpop.f32.mrb[11].mxu0 }
 0x767   : > { %v1136_v53 = vpop.f32.mrb[12].mxu0 }
 0x768   : > { %v1138_v55 = vpop.f32.mrb[13].mxu0 }
 0x769   : > { %v1140_v58 = vpop.f32.mrb[14].mxu0 }
 0x76a   : > { %v1142_v60 = vpop.f32.mrb[15].mxu0 }
 0x820   : > { %v1339_v34 = vpop.f32.mrb[0].mxu1 }
 0x821   : > { %v1340_v6 = vadd.f32 %v1339_v34, %v1126_v45  ;;  %v1341_v10 = vpop.f32.mrb[1].mxu1 }
 0x822   : > { %v1342_v11 = vadd.f32 %v1341_v10, %v1128_v47  ;;  %v1343_v14 = vpop.f32.mrb[2].mxu1 }
 0x823   : > { %v1370_v15 = vadd.f32 %v1363_v19, %v1340_v6  ;;  %v1344_v7 = vadd.f32 %v1343_v14, %v1130_v48  ;;  %v1345_v59 = vpop.f32.mrb[3].mxu1 }
 0x824   : > { %v1371_v21 = vadd.f32 %v1367_v4, %v1342_v11  ;;  %v1346_v16 = vadd.f32 %v1345_v59, %v1132_v49 }
 0x825   : > { %v1372_v17 = vadd.f32 %v1363_v19, %v1344_v7  ;;  %v1378_v54 = vmax.f32 %v1370_v15, 0.0 }
 0x826   : > { %v1373_v18 = vadd.f32 %v1367_v4, %v1346_v16  ;;  %v1379_v36 = vmax.f32 %v1371_v21, 0.0 }
 0x827   : > { %v1380_v23 = vmax.f32 %v1372_v17, 0.0 }
 0x828   : > { %v1381_v24 = vmax.f32 %v1373_v18, 0.0 }
 0x829   : > { %v1386_v12 = vpack.c.bf16 %v1380_v23, %v1378_v54 }
 0x82a   : > { %v1387_v25 = vpack.c.bf16 %v1381_v24, %v1379_v36 }
 0x82c   : > { %1557 = vmatprep.mubr.bf16.mxu0 %v1387_v25 }
 0x82d   : > { %1558 = vmatmul.mubr.bf16.vlgmr.msra.gmra.mrb[16].mxu0 %v1386_v12 }
 0x831   : > { %v1349_v8 = vpop.f32.mrb[4].mxu1 }
 0x832   : > { %v1350_v9 = vadd.f32 %v1349_v8, %v1136_v53  ;;  %v1351_v22 = vpop.f32.mrb[5].mxu1 }
 0x833   : > { %v1352_v26 = vadd.f32 %v1351_v22, %v1138_v55  ;;  %v1353_v27 = vpop.f32.mrb[6].mxu1 }
 0x834   : > { %v1374_v28 = vadd.f32 %v1363_v19, %v1350_v9  ;;  %v1354_v62 = vadd.f32 %v1353_v27, %v1140_v58  ;;  %v1355_v29 = vpop.f32.mrb[7].mxu1 }
 0x835   : > { %v1375_v30 = vadd.f32 %v1367_v4, %v1352_v26  ;;  %v1356_v0 = vadd.f32 %v1355_v29, %v1142_v60 }
 0x836   : > { %v1376_v2 = vadd.f32 %v1363_v19, %v1354_v62  ;;  %v1382_v50 = vmax.f32 %v1374_v28, 0.0 }
 0x837   : > { %v1377_v57 = vadd.f32 %v1367_v4, %v1356_v0  ;;  %v1383_v56 = vmax.f32 %v1375_v30, 0.0 }
 0x838   : > { %v1384_v63 = vmax.f32 %v1376_v2, 0.0 }
 0x839   : > { %v1385_v31 = vmax.f32 %v1377_v57, 0.0 }
 0x83a   : > { %v1388_v32 = vpack.c.bf16 %v1384_v63, %v1382_v50 }
 0x83b   : > { %v1389_v33 = vpack.c.bf16 %v1385_v31, %v1383_v56 }
 0x83d   : > { %1565 = vmatprep.mubr.bf16.mxu0 %v1389_v33 }
 0x83e   : > { %1566 = vmatmul.mubr.bf16.gmra.mrb[20].mxu0 %v1388_v32 }
 0x900   : > { %v1859_v35 = vpop.f32.mrb[16].mxu0 }
 0x901   : > { %v1860_v38 = vpop.f32.mrb[17].mxu0 }
 0x902   : > { %v1861_v39 = vadd.f32 %v1860_v38, %v1859_v35  ;;  %v1862_v1 = vpop.f32.mrb[18].mxu0 }
 0x903   : > { %v1863_v41 = vpop.f32.mrb[19].mxu0 }
 0x904   : > { %v1560_v42 = vadd.f32 %v1861_v39, %v1801_v61  ;;  %v1864_v43 = vadd.f32 %v1863_v41, %v1862_v1 }
 0x906   : > { %v1563_v20 = vadd.f32 %v1864_v43, %v1801_v61  ;;  %v1574_v37 = vmax.f32 %v1560_v42, 0.0 }
 0x908   : > { %v1575_v5 = vmax.f32 %v1563_v20, 0.0 }
 0x90a   : > { %v1835_v44 = vpack.c.bf16 %v1575_v5, %v1574_v37 }
 0x90c   : > { %1836 = vst [vmem:[%s443_s14] sm:$0xff] %v1835_v44  }
 0x911   : > { %v1865_v45 = vpop.f32.mrb[20].mxu0 }
 0x912   : > { %v1866_v46 = vpop.f32.mrb[21].mxu0 }
 0x913   : > { %v1867_v47 = vadd.f32 %v1866_v46, %v1865_v45  ;;  %v1868_v48 = vpop.f32.mrb[22].mxu0 }
 0x914   : > { %v1869_v49 = vpop.f32.mrb[23].mxu0 }
 0x915   : > { %v1568_v13 = vadd.f32 %v1867_v47, %v1801_v61  ;;  %v1870_v51 = vadd.f32 %v1869_v49, %v1868_v48 }
 0x917   : > { %v1571_v52 = vadd.f32 %v1870_v51, %v1801_v61  ;;  %v1576_v40 = vmax.f32 %v1568_v13, 0.0 }
 0x919   : > { %v1577_v53 = vmax.f32 %v1571_v52, 0.0 }
 0x91b   : > { %v1840_v55 = vpack.c.bf16 %v1577_v53, %v1576_v40 }
 0x91d   : > { %1842 = vst [vmem:[%s443_s14 + $0x8] sm:$0xff] %v1840_v55  }
 0x91e PF: > { %s19_s11 = sadd.s32 1, %s2050_s11   ;;  %s2539_s30 = smov %s2046_s10 }
 0x91f   : > { %p16_p5 = scmp.ge.s32.totalorder %s19_s11, 4   ;;  %s2540_s10 = smov %s2542_s12 }
 0x921   :  { %18 = sbr.rel (!%p16_p5) target bundleno = 2 (0x2), region = 95 }

// kernel: decoder_forward.7
= control target key start
LH: loop header
LB: loop body
LE: loop exit
PB: predicated region body
PF: predicated region fallthrough
CT: control target
= control target key end

     0   :  { %s2921_s25 = smov 0   ;;  %s2923_s26 = smov 0   ;;  %s3648_s0 = inlined_call_operand.vmem [shape: f32[2,64,3], index: 0, kind: input, shape index: {}]   ;;  %s3649_s1 = inlined_call_operand.vmem [shape: f32[2,3,32], index: 1, kind: input, shape index: {}]   ;;  %s3650_s2 = inlined_call_operand.vmem [shape: bf16[2,32,128], index: 2, kind: input, shape index: {}]   ;;  %s3651_s3 = inlined_call_operand.vmem [shape: bf16[128,128], index: 3, kind: input, shape index: {}]   ;;  %s3652_s4 = inlined_call_operand.vmem [shape: f32[1,128], index: 4, kind: input, shape index: {}]   ;;  %s3653_s5 = inlined_call_operand.vmem [shape: bf16[128,128], index: 5, kind: input, shape index: {}]   ;;  %s3654_s6 = inlined_call_operand.vmem [shape: f32[1,128], index: 6, kind: input, shape index: {}]   ;;  %s3655_s7 = inlined_call_operand.vmem [shape: bf16[128,128], index: 7, kind: input, shape index: {}]   ;;  %s3656_s8 = inlined_call_operand.vmem [shape: f32[1,128], index: 8, kind: input, shape index: {}]   ;;  %s3657_s9 = inlined_call_operand.vmem [shape: bf16[128,128], index: 9, kind: input, shape index: {}]   ;;  %s3658_s10 = inlined_call_operand.vmem [shape: f32[1,128], index: 10, kind: input, shape index: {}]   ;;  %s3659_s11 = inlined_call_operand.vmem [shape: bf16[128,128], index: 11, kind: input, shape index: {}]   ;;  %s3660_s12 = inlined_call_operand.vmem [shape: f32[1,128], index: 12, kind: input, shape index: {}]   ;;  %s3661_s13 = inlined_call_operand.vmem [shape: f32[2,64,128], index: 13, kind: output, shape index: {}]  }
   0x1   :  { %s2925_s27 = smov 0  }
   0x2 LB: > { %s35_s28 = sadd.s32 1, %s2841_s26  ;;  %p2390_p0 = scmp.ge.s32.totalorder %s2845_s27, 1  ;;  %s2845_s27 = sphi %s2925_s27, %s23_s27   ;;  %s2841_s26 = sphi %s2923_s26, %s3663_s26   ;;  %s2837_s25 = sphi %s2921_s25, %s3662_s25  }
   0x3   : > { %p37_p1 = scmp.ge.s32.totalorder %s35_s28, 2  ;;  %p427_p2 = scmp.lt.s32.totalorder %s2845_s27, 3 }
   0x5   : > { %s3665_s28 = smov (%p37_p1, %s35_s28), 0  ;;  %p428_p3 = pnand %p2390_p0, %p427_p2 }
   0x6   : > { %p489_p4 = scmp.lt.s32.totalorder (!%p428_p3), %s2837_s25, 1  ;;  %v2847_v0 = vmov (!%p428_p3), 2   ;;  %v2848_v1 = vmov (!%p428_p3), 1   ;;  %v2849_v4 = vmov (!%p428_p3), 0   ;;  %v571_v11 = vlaneseq (!%p428_p3) }
   0x7   : > { %431 = sbr.rel (%p428_p3) target bundleno = 3025 (0xbd1), region = 72  ;;  %2708 = vset.pattern.permute.xlu0 (!%p428_p3), %v2847_v0  ;;  %2704 = vset.pattern.permute.xlu1 (!%p428_p3), %v2848_v1  ;;  %vm713_vm0 = vcmask (!%p428_p3), 261120  }
   0x8   : > { %v572_v12 = vshrl.u32 (!%p428_p3), %v571_v11, 7 }
   0xa   : > { %v661_v13 = vsub.s32 (!%p428_p3), 2, %v572_v12  ;;  %v617_v16 = vsub.s32 (!%p428_p3), 1, %v572_v12  ;;  %v573_v18 = vsub.s32 (!%p428_p3), 0, %v572_v12 }
   0xe   : > { %s3667_s25 = smov (!%p489_p4, %s2837_s25), 1 }
   0xf   : > { %s2475_s29 = sshll.u32 %s3667_s25, 6  ;;  %s2393_s16 = sshll.u32 %s3667_s25, 2 }
  0x10   : > { %s2947_s15 = scalar_lea.vmem %s3648_s0, %s2475_s29  ;;  %s501_s19 = scalar_lea.vmem %s3649_s1, %s2393_s16 }
  0x11   : > { %v519_v2 = vld [vmem:[%s2947_s15 + $0x8] sm:$0xff]  ;;  %v518_v3 = vld [vmem:[%s2947_s15] sm:$0xff]  ;;  %v521_v5 = vld [vmem:[%s2947_s15 + $0x18] sm:$0xff]  ;;  %s2476_s20 = sshll.u32 %s3667_s25, 4 }
  0x12   : > { %632 = vperm.xlu0 %2708, %v519_v2   ;;  %584 = vperm.xlu1 %2704, %v518_v3   ;;  %v520_v6 = vld [vmem:[%s2947_s15 + $0x10] sm:$0xff]  ;;  %v522_v7 = vld [vmem:[%s2947_s15 + $0x20] sm:$0xff]  ;;  %v523_v8 = vld [vmem:[%s2947_s15 + $0x28] sm:$0xff]  ;;  %s506_s23 = scalar_lea.vmem %s3650_s2, %s2476_s20  ;;  %s515_s20 = scalar_lea.vmem %s3661_s13, %s2475_s29 }
  0x13   : > { %v524_v9 = vld [vmem:[%s2947_s15 + $0x30] sm:$0xff]  ;;  %v525_v10 = vld [vmem:[%s2947_s15 + $0x38] sm:$0xff]  ;;  %v526_v17 = vld [vmem:[%s501_s19] sm:$0x7] }
  0x14   : > { %v2962_v19 = vrot.slane %v526_v17, %v661_v13  ;;  %v2964_v22 = vrot.slane %v526_v17, %v617_v16  ;;  %v2966_v23 = vrot.slane %v526_v17, %v573_v18 }
  0x16   : > { %2709 = vset.pattern.permute.xlu0 %v2849_v4  ;;  %588 = vperm.xlu1 %2704, %v519_v2  }
  0x17   : > { %533 = vperm.xlu0 %2709, %v518_v3  }
  0x1a   : > { %2705 = vset.pattern.permute.xlu1 %v2849_v4 }
  0x1b   : > { %538 = vperm.xlu0 %2709, %v519_v2   ;;  %548 = vperm.xlu1 %2705, %v521_v5  }
  0x1f   : > { %543 = vperm.xlu0 %2709, %v520_v6   ;;  %2706 = vset.pattern.permute.xlu1 %v2848_v1 }
  0x20   : > { %596 = vperm.xlu1 %2706, %v521_v5  }
  0x23   : > { %553 = vperm.xlu0 %2709, %v522_v7  }
  0x24   : > { %2707 = vset.pattern.permute.xlu1 %v2847_v0 }
  0x25   : > { %628 = vperm.xlu1 %2707, %v518_v3  }
  0x27   : > { %2710 = vset.pattern.permute.xlu0 %v2848_v1 }
  0x28   : > { %592 = vperm.xlu0 %2710, %v520_v6  }
  0x29   : > { %636 = vperm.xlu1 %2707, %v520_v6  }
  0x2c   : > { %604 = vperm.xlu0 %2710, %v523_v8  }
  0x2d   : > { %640 = vperm.xlu1 %2707, %v521_v5  }
  0x30   : > { %608 = vperm.xlu0 %2710, %v524_v9  }
  0x31   : > { %2711 = vset.pattern.permute.xlu1 %v2849_v4 }
  0x32   : > { %558 = vperm.xlu1 %2711, %v523_v8  }
  0x34   : > { %2715 = vset.pattern.permute.xlu0 %v2847_v0 }
  0x35   : > { %644 = vperm.xlu0 %2715, %v522_v7  }
  0x36   : > { %2712 = vset.pattern.permute.xlu1 %v2848_v1 }
  0x37   : > { %600 = vperm.xlu1 %2712, %v522_v7  }
  0x39   : > { %656 = vperm.xlu0 %2715, %v525_v10  }
  0x3b   : > { %2713 = vset.pattern.permute.xlu1 %v2849_v4 }
  0x3c   : > { %563 = vperm.xlu1 %2713, %v524_v9  }
  0x40   : > { %568 = vperm.xlu1 %2713, %v525_v10  }
  0x44   : > { %2714 = vset.pattern.permute.xlu1 %v2848_v1 }
  0x45   : > { %612 = vperm.xlu1 %2714, %v525_v10  }
  0x49   : > { %2716 = vset.pattern.permute.xlu1 %v2847_v0 }
  0x4a   : > { %648 = vperm.xlu1 %2716, %v523_v8  }
  0x4e   : > { %652 = vperm.xlu1 %2716, %v524_v9  }
  0x91   : > { %v585_v14 = vpop.permute.xlu1 %584  ;;  %v633_v15 = vpop.permute.xlu0 %632 }
  0x92   : > { %v664_v24 = vsub.f32 %v633_v15, %v2962_v19  ;;  %v619_v36 = vsub.f32 %v585_v14, %v2964_v22 }
  0x94   : > { %v696_v29 = vmul.f32 %v664_v24, %v664_v24  ;;  %v679_v43 = vmul.f32 %v619_v36, %v619_v36 }
  0x95   : > { %v589_v20 = vpop.permute.xlu1 %588 }
  0x96   : > { %v534_v21 = vpop.permute.xlu0 %533  ;;  %v620_v25 = vsub.f32 %v589_v20, %v2964_v22 }
  0x97   : > { %v575_v33 = vsub.f32 %v534_v21, %v2966_v23 }
  0x98   : > { %v680_v30 = vmul.f32 %v620_v25, %v620_v25 }
  0x99   : > { %v671_v39 = vmul.f32 %v575_v33, %v575_v33 }
  0x9a   : > { %v539_v26 = vpop.permute.xlu0 %538  ;;  %v549_v27 = vpop.permute.xlu1 %548 }
  0x9b   : > { %v576_v28 = vsub.f32 %v539_v26, %v2966_v23  ;;  %v687_v45 = vadd.f32 %v679_v43, %v671_v39  ;;  %v578_v52 = vsub.f32 %v549_v27, %v2966_v23 }
  0x9d   : > { %v672_v31 = vmul.f32 %v576_v28, %v576_v28  ;;  %v674_v62 = vmul.f32 %v578_v52, %v578_v52 }
  0x9e   : > { %v544_v32 = vpop.permute.xlu0 %543 }
  0x9f   : > { %v688_v34 = vadd.f32 %v680_v30, %v672_v31  ;;  %v597_v35 = vpop.permute.xlu1 %596  ;;  %v577_v41 = vsub.f32 %v544_v32, %v2966_v23 }
  0xa0   : > { %v622_v46 = vsub.f32 %v597_v35, %v2964_v22 }
  0xa1   : > { %v2973_v37 = vadd.f32 %v696_v29, %v688_v34  ;;  %v673_v49 = vmul.f32 %v577_v41, %v577_v41 }
  0xa2   : > { %v554_v38 = vpop.permute.xlu0 %553  ;;  %v682_v56 = vmul.f32 %v622_v46, %v622_v46 }
  0xa3   : > { %v717_v40 = vsel %vm713_vm0, %v2973_v37, inf  ;;  %v579_v9 = vsub.f32 %v554_v38, %v2966_v23 }
  0xa4   : > { %718 = vmin.xlane.f32.xlu0 %v717_v40  ;;  %v629_v42 = vpop.permute.xlu1 %628  ;;  %v690_v1 = vadd.f32 %v682_v56, %v674_v62 }
  0xa5   : > { %v663_v44 = vsub.f32 %v629_v42, %v2962_v19  ;;  %v675_v14 = vmul.f32 %v579_v9, %v579_v9 }
  0xa7   : > { %v695_v47 = vmul.f32 %v663_v44, %v663_v44  ;;  %v593_v48 = vpop.permute.xlu0 %592 }
  0xa8   : > { %v621_v50 = vsub.f32 %v593_v48, %v2964_v22  ;;  %v637_v51 = vpop.permute.xlu1 %636 }
  0xa9   : > { %v2982_v53 = vadd.f32 %v695_v47, %v687_v45  ;;  %v665_v54 = vsub.f32 %v637_v51, %v2962_v19 }
  0xaa   : > { %v681_v55 = vmul.f32 %v621_v50, %v621_v50 }
  0xab   : > { %v697_v57 = vmul.f32 %v665_v54, %v665_v54  ;;  %v714_v58 = vsel %vm713_vm0, %v2982_v53, inf  ;;  %v605_v59 = vpop.permute.xlu0 %604 }
  0xac   : > { %v689_v60 = vadd.f32 %v681_v55, %v673_v49  ;;  %715 = vmin.xlane.f32.xlu1 %v714_v58  ;;  %v641_v61 = vpop.permute.xlu1 %640  ;;  %v624_v25 = vsub.f32 %v605_v59, %v2964_v22 }
  0xad   : > { %v666_v63 = vsub.f32 %v641_v61, %v2962_v19 }
  0xae   : > { %v2988_v0 = vadd.f32 %v697_v57, %v689_v60  ;;  %v684_v31 = vmul.f32 %v624_v25, %v624_v25 }
  0xaf   : > { %v698_v2 = vmul.f32 %v666_v63, %v666_v63  ;;  %v609_v3 = vpop.permute.xlu0 %608 }
  0xb0   : > { %v720_v4 = vsel %vm713_vm0, %v2988_v0, inf  ;;  %v625_v33 = vsub.f32 %v609_v3, %v2964_v22 }
  0xb1   : > { %v2992_v5 = vadd.f32 %v698_v2, %v690_v1  ;;  %721 = vmin.xlane.f32.xlu0 %v720_v4  ;;  %v559_v6 = vpop.permute.xlu1 %558 }
  0xb2   : > { %v580_v26 = vsub.f32 %v559_v6, %v2966_v23  ;;  %v685_v42 = vmul.f32 %v625_v33, %v625_v33 }
  0xb3   : > { %v723_v7 = vsel %vm713_vm0, %v2992_v5, inf }
  0xb4   : > { %724 = vmin.xlane.f32.xlu1 %v723_v7  ;;  %v645_v8 = vpop.permute.xlu0 %644  ;;  %v676_v32 = vmul.f32 %v580_v26, %v580_v26 }
  0xb5   : > { %v667_v10 = vsub.f32 %v645_v8, %v2962_v19 }
  0xb6   : > { %v601_v12 = vpop.permute.xlu1 %600  ;;  %v692_v41 = vadd.f32 %v684_v31, %v676_v32 }
  0xb7   : > { %v623_v13 = vsub.f32 %v601_v12, %v2964_v22  ;;  %v699_v16 = vmul.f32 %v667_v10, %v667_v10 }
  0xb8   : > { %v657_v29 = vpop.permute.xlu0 %656 }
  0xb9   : > { %v683_v15 = vmul.f32 %v623_v13, %v623_v13  ;;  %v670_v36 = vsub.f32 %v657_v29, %v2962_v19 }
  0xbb   : > { %v691_v17 = vadd.f32 %v683_v15, %v675_v14  ;;  %v564_v18 = vpop.permute.xlu1 %563  ;;  %v702_v45 = vmul.f32 %v670_v36, %v670_v36 }
  0xbc   : > { %v581_v34 = vsub.f32 %v564_v18, %v2966_v23 }
  0xbd   : > { %v2999_v20 = vadd.f32 %v699_v16, %v691_v17 }
  0xbe   : > { %v677_v43 = vmul.f32 %v581_v34, %v581_v34 }
  0xbf   : > { %v569_v21 = vpop.permute.xlu1 %568  ;;  %v726_v24 = vsel %vm713_vm0, %v2999_v20, inf }
  0xc0   : > { %727 = vmin.xlane.f32.xlu0 %v726_v24  ;;  %v582_v30 = vsub.f32 %v569_v21, %v2966_v23  ;;  %v693_v49 = vadd.f32 %v685_v42, %v677_v43 }
  0xc2   : > { %v678_v39 = vmul.f32 %v582_v30, %v582_v30 }
  0xc4   : > { %v613_v27 = vpop.permute.xlu1 %612 }
  0xc5   : > { %v626_v28 = vsub.f32 %v613_v27, %v2964_v22 }
  0xc7   : > { %v686_v35 = vmul.f32 %v626_v28, %v626_v28 }
  0xc9   : > { %v649_v38 = vpop.permute.xlu1 %648  ;;  %v694_v44 = vadd.f32 %v686_v35, %v678_v39 }
  0xca   : > { %v668_v40 = vsub.f32 %v649_v38, %v2962_v19 }
  0xcb   : > { %v3014_v23 = vadd.f32 %v702_v45, %v694_v44 }
  0xcc   : > { %v700_v46 = vmul.f32 %v668_v40, %v668_v40 }
  0xcd   : > { %v653_v47 = vpop.permute.xlu1 %652  ;;  %v735_v54 = vsel %vm713_vm0, %v3014_v23, inf }
  0xce   : > { %v3011_v48 = vadd.f32 %v700_v46, %v692_v41  ;;  %v669_v22 = vsub.f32 %v653_v47, %v2962_v19  ;;  %v3025_v19 = vand.u32 127, %v571_v11 }
  0xd0   : > { %v701_v50 = vmul.f32 %v669_v22, %v669_v22  ;;  %v729_v51 = vsel %vm713_vm0, %v3011_v48, inf }
  0xd1   : > { %730 = vmin.xlane.f32.xlu1 %v729_v51 }
  0xd2   : > { %v3018_v52 = vadd.f32 %v701_v50, %v693_v49 }
  0xd4   : > { %v732_v55 = vsel %vm713_vm0, %v3018_v52, inf }
  0xd5   : > { %736 = vmin.xlane.f32.xlu1 %v735_v54  ;;  %733 = vmin.xlane.f32.xlu0 %v732_v55 }
 0x131   : > { %v3027_v56 = vpop.xlane.xlu0 %718 }
 0x132   : > { %vm739_vm1 = vcmp.eq.f32.partialorder %v2973_v37, %v3027_v56 }
 0x133   : > { %v747_v57 = vsel %vm739_vm1, %v3025_v19, 32 }
 0x134   : > { %v769_v58 = vsel %vm713_vm0, %v747_v57, 2147483647 }
 0x135   : > { %v771_v59 = vshra.s32 %v769_v58, 16  ;;  %v770_v39 = vand.u32 65535, %v769_v58 }
 0x137   : > { %v773_v60 = vcvt.s32.f32 %v771_v59  ;;  %v772_v41 = vcvt.s32.f32 %v770_v39 }
 0x139   : > { %774 = vmin.xlane.f32.xlu1 %v773_v60  ;;  %v3033_v61 = vpop.xlane.xlu1 %715 }
 0x13a   : > { %vm738_vm2 = vcmp.eq.f32.partialorder %v2982_v53, %v3033_v61 }
 0x13b   : > { %v746_v11 = vsel %vm738_vm2, %v3025_v19, 32 }
 0x13c   : > { %v754_v62 = vsel %vm713_vm0, %v746_v11, 2147483647 }
 0x13d   : > { %v756_v63 = vshra.s32 %v754_v62, 16  ;;  %v755_v43 = vand.u32 65535, %v754_v62 }
 0x13e   : > { %v3039_v1 = vpop.xlane.xlu0 %721 }
 0x13f   : > { %vm740_vm3 = vcmp.eq.f32.partialorder %v2988_v0, %v3039_v1  ;;  %v758_v2 = vcvt.s32.f32 %v756_v63  ;;  %v757_v45 = vcvt.s32.f32 %v755_v43 }
 0x140   : > { %v748_v3 = vsel %vm740_vm3, %v3025_v19, 32 }
 0x141   : > { %759 = vmin.xlane.f32.xlu0 %v758_v2  ;;  %v3044_v4 = vpop.xlane.xlu1 %724  ;;  %v784_v6 = vsel %vm713_vm0, %v748_v3, 2147483647 }
 0x142   : > { %vm741_vm4 = vcmp.eq.f32.partialorder %v2992_v5, %v3044_v4  ;;  %v786_v7 = vshra.s32 %v784_v6, 16  ;;  %v785_v46 = vand.u32 65535, %v784_v6 }
 0x143   : > { %v749_v8 = vsel %vm741_vm4, %v3025_v19, 32 }
 0x144   : > { %v788_v9 = vcvt.s32.f32 %v786_v7  ;;  %v799_v10 = vsel %vm713_vm0, %v749_v8, 2147483647  ;;  %v787_v50 = vcvt.s32.f32 %v785_v46 }
 0x145   : > { %v801_v12 = vshra.s32 %v799_v10, 16  ;;  %v800_v22 = vand.u32 65535, %v799_v10 }
 0x146   : > { %789 = vmin.xlane.f32.xlu0 %v788_v9 }
 0x147   : > { %v803_v13 = vcvt.s32.f32 %v801_v12  ;;  %v802_v55 = vcvt.s32.f32 %v800_v22 }
 0x149   : > { %804 = vmin.xlane.f32.xlu1 %v803_v13 }
 0x14d   : > { %v3051_v14 = vpop.xlane.xlu0 %727 }
 0x14e   : > { %vm742_vm5 = vcmp.eq.f32.partialorder %v2999_v20, %v3051_v14 }
 0x14f   : > { %v750_v15 = vsel %vm742_vm5, %v3025_v19, 32 }
 0x150   : > { %v814_v16 = vsel %vm713_vm0, %v750_v15, 2147483647 }
 0x151   : > { %v816_v17 = vshra.s32 %v814_v16, 16  ;;  %v815_v58 = vand.u32 65535, %v814_v16  ;;  %v883_v16 = vadd.f32 1e-08, %v3027_v56  ;;  %v2850_v56 = vmov 0.0  }
 0x153   : > { %v818_v18 = vcvt.s32.f32 %v816_v17  ;;  %2759 = vrcp.f32 %v883_v16 }
 0x155   : > { %819 = vmin.xlane.f32.xlu0 %v818_v18 }
 0x15e   : > { %v3057_v21 = vpop.xlane.xlu1 %730 }
 0x15f   : > { %vm743_vm6 = vcmp.eq.f32.partialorder %v3011_v48, %v3057_v21 }
 0x160   : > { %v751_v24 = vsel %vm743_vm6, %v3025_v19, 32 }
 0x161   : > { %v829_v25 = vsel %vm713_vm0, %v751_v24, 2147483647 }
 0x162   : > { %v3063_v26 = vpop.xlane.xlu0 %733  ;;  %v3065_v27 = vpop.xlane.xlu1 %736  ;;  %v831_v28 = vshra.s32 %v829_v25, 16  ;;  %v830_v62 = vand.u32 65535, %v829_v25 }
 0x163   : > { %vm744_vm7 = vcmp.eq.f32.partialorder %v3018_v52, %v3063_v26  ;;  %vm745_vm8 = vcmp.eq.f32.partialorder %v3014_v23, %v3065_v27 }
 0x164   : > { %v752_v29 = vsel %vm744_vm7, %v3025_v19, 32  ;;  %v753_v30 = vsel %vm745_vm8, %v3025_v19, 32  ;;  %v833_v31 = vcvt.s32.f32 %v831_v28 }
 0x165   : > { %v844_v32 = vsel %vm713_vm0, %v752_v29, 2147483647  ;;  %v859_v33 = vsel %vm713_vm0, %v753_v30, 2147483647  ;;  %v884_v30 = vadd.f32 1e-08, %v3039_v1 }
 0x166   : > { %834 = vmin.xlane.f32.xlu1 %v833_v31  ;;  %v846_v34 = vshra.s32 %v844_v32, 16  ;;  %v861_v35 = vshra.s32 %v859_v33, 16  ;;  %v845_v3 = vand.u32 65535, %v844_v32  ;;  %v860_v6 = vand.u32 65535, %v859_v33  ;;  %v2760_v32 = vpop.eup %2759 }
 0x168   : > { %v848_v36 = vcvt.s32.f32 %v846_v34  ;;  %v863_v38 = vcvt.s32.f32 %v861_v35  ;;  %v847_v10 = vcvt.s32.f32 %v845_v3  ;;  %v862_v12 = vcvt.s32.f32 %v860_v6 }
 0x16a   : > { %849 = vmin.xlane.f32.xlu0 %v848_v36  ;;  %864 = vmin.xlane.f32.xlu1 %v863_v38 }
 0x1c6   : > { %v775_v40 = vpop.xlane.xlu1 %774 }
 0x1c7   : > { %vm776_vm9 = vcmp.eq.f32.partialorder %v773_v60, %v775_v40  ;;  %v817_v60 = vcvt.s32.f32 %v815_v58  ;;  %v781_v17 = vcvt.f32.s32 %v775_v40 }
 0x1c8   : > { %v777_v42 = vsel %vm776_vm9, %v772_v41, inf }
 0x1c9   : > { %778 = vmin.xlane.f32.xlu1 %v777_v42  ;;  %v782_v25 = vshll.u32 %v781_v17, 16 }
 0x1ce   : > { %v3075_v44 = vpop.xlane.xlu0 %759 }
 0x1cf   : > { %vm761_vm10 = vcmp.eq.f32.partialorder %v758_v2, %v3075_v44  ;;  %v832_v2 = vcvt.s32.f32 %v830_v62 }
 0x1d0   : > { %v762_v47 = vsel %vm761_vm10, %v757_v45, inf }
 0x1d1   : > { %763 = vmin.xlane.f32.xlu0 %v762_v47 }
 0x1d3   : > { %v3078_v49 = vpop.xlane.xlu0 %789 }
 0x1d4   : > { %vm791_vm11 = vcmp.eq.f32.partialorder %v788_v9, %v3078_v49  ;;  %v796_v40 = vcvt.f32.s32 %v3078_v49 }
 0x1d5   : > { %v792_v51 = vsel %vm791_vm11, %v787_v50, inf }
 0x1d6   : > { %793 = vmin.xlane.f32.xlu0 %v792_v51  ;;  %v3081_v54 = vpop.xlane.xlu1 %804 }
 0x1d7   : > { %vm806_vm12 = vcmp.eq.f32.partialorder %v803_v13, %v3081_v54 }
 0x1d8   : > { %v807_v57 = vsel %vm806_vm12, %v802_v55, inf }
 0x1d9   : > { %808 = vmin.xlane.f32.xlu1 %v807_v57 }
 0x1e2   : > { %v3084_v59 = vpop.xlane.xlu0 %819 }
 0x1e3   : > { %vm821_vm13 = vcmp.eq.f32.partialorder %v818_v18, %v3084_v59  ;;  %v882_v18 = vadd.f32 1e-08, %v3033_v61 }
 0x1e4   : > { %v822_v11 = vsel %vm821_vm13, %v817_v60, inf  ;;  %v886_v60 = vadd.f32 1e-08, %v3051_v14  ;;  %v826_v14 = vcvt.f32.s32 %v3084_v59  ;;  %v887_v59 = vadd.f32 1e-08, %v3057_v21 }
 0x1e5   : > { %823 = vmin.xlane.f32.xlu0 %v822_v11  ;;  %2761 = vrcp.f32 %v882_v18 }
 0x1e6   : > { %2763 = vrcp.f32 %v884_v30 }
 0x1ef   : > { %v2762_v43 = vpop.eup %2761 }
 0x1f0   : > { %v2764_v55 = vpop.eup %2763 }
 0x1f3   : > { %v3087_v63 = vpop.xlane.xlu1 %834 }
 0x1f4   : > { %vm836_vm14 = vcmp.eq.f32.partialorder %v833_v31, %v3087_v63  ;;  %v766_v31 = vcvt.f32.s32 %v3075_v44  ;;  %v797_v44 = vshll.u32 %v796_v40, 16 }
 0x1f5   : > { %v837_v7 = vsel %vm836_vm14, %v832_v2, inf }
 0x1f6   : > { %838 = vmin.xlane.f32.xlu1 %v837_v7  ;;  %v767_v1 = vshll.u32 %v766_v31, 16 }
 0x1f7   : > { %v3090_v8 = vpop.xlane.xlu0 %849  ;;  %v3092_v9 = vpop.xlane.xlu1 %864 }
 0x1f8   : > { %vm851_vm15 = vcmp.eq.f32.partialorder %v848_v36, %v3090_v8  ;;  %vm866_vm1 = vcmp.eq.f32.partialorder %v863_v38, %v3092_v9  ;;  %v885_v36 = vadd.f32 1e-08, %v3044_v4 }
 0x1f9   : > { %v852_v13 = vsel %vm851_vm15, %v847_v10, inf  ;;  %v867_v15 = vsel %vm866_vm1, %v862_v12, inf  ;;  %v827_v12 = vshll.u32 %v826_v14, 16 }
 0x1fa   : > { %853 = vmin.xlane.f32.xlu0 %v852_v13  ;;  %868 = vmin.xlane.f32.xlu1 %v867_v15  ;;  %2765 = vrcp.f32 %v885_v36 }
 0x1fb   : > { %2767 = vrcp.f32 %v886_v60 }
 0x1fc   : > { %2769 = vrcp.f32 %v887_v59 }
 0x204   : > { %v2766_v2 = vpop.eup %2765 }
 0x205   : > { %v2768_v16 = vpop.eup %2767 }
 0x206   : > { %v2770_v21 = vpop.eup %2769 }
 0x256   : > { %v779_v24 = vpop.xlane.xlu1 %778 }
 0x257   : > { %v780_v28 = vcvt.f32.s32 %v779_v24 }
 0x259   : > { %v783_v29 = vadd.s32 %v782_v25, %v780_v28  ;;  %v841_v25 = vcvt.f32.s32 %v3087_v63  ;;  %v856_v28 = vcvt.f32.s32 %v3090_v8 }
 0x25b   : > { %vm875_vm2 = vcmp.eq.s32.totalorder %v3025_v19, %v783_v29  ;;  %v842_v30 = vshll.u32 %v841_v25, 16 }
 0x25c   : > { %v3102_v33 = vsel %vm875_vm2, inf, %v2973_v37  ;;  %v2399_v34 = vsel %vm875_vm2, 1.0, %v2850_v56  ;;  %v811_v37 = vcvt.f32.s32 %v3081_v54 }
 0x25d   : > { %v949_v61 = vsel %vm713_vm0, %v3102_v33, inf  ;;  %v3107_v35 = vmul.f32 %v2760_v32, %v2399_v34  ;;  %v857_v34 = vshll.u32 %v856_v28, 16 }
 0x25e   : > { %v764_v38 = vpop.xlane.xlu0 %763  ;;  %950 = vmin.xlane.f32.xlu1 %v949_v61  ;;  %v812_v51 = vshll.u32 %v811_v37, 16 }
 0x25f   : > { %v765_v39 = vcvt.f32.s32 %v764_v38 }
 0x261   : > { %v768_v41 = vadd.s32 %v767_v1, %v765_v39 }
 0x263   : > { %v794_v42 = vpop.xlane.xlu0 %793  ;;  %vm874_vm3 = vcmp.eq.s32.totalorder %v3025_v19, %v768_v41 }
 0x264   : > { %v795_v45 = vcvt.f32.s32 %v794_v42  ;;  %v3114_v46 = vsel %vm874_vm3, inf, %v2982_v53  ;;  %v2398_v4 = vsel %vm874_vm3, 1.0, %v2850_v56 }
 0x265   : > { %v946_v47 = vsel %vm713_vm0, %v3114_v46, inf  ;;  %v3119_v22 = vmul.f32 %v2762_v43, %v2398_v4 }
 0x266   : > { %v798_v49 = vadd.s32 %v797_v44, %v795_v45  ;;  %947 = vmin.xlane.f32.xlu0 %v946_v47  ;;  %v809_v50 = vpop.xlane.xlu1 %808 }
 0x267   : > { %v810_v54 = vcvt.f32.s32 %v809_v50 }
 0x268   : > { %vm876_vm4 = vcmp.eq.s32.totalorder %v3025_v19, %v798_v49 }
 0x269   : > { %v813_v57 = vadd.s32 %v812_v51, %v810_v54  ;;  %v3123_v58 = vsel %vm876_vm4, inf, %v2988_v0  ;;  %v2400_v53 = vsel %vm876_vm4, 1.0, %v2850_v56 }
 0x26a   : > { %v952_v11 = vsel %vm713_vm0, %v3123_v58, inf  ;;  %v3129_v62 = vmul.f32 %v2764_v55, %v2400_v53 }
 0x26b   : > { %953 = vmin.xlane.f32.xlu0 %v952_v11  ;;  %vm877_vm5 = vcmp.eq.s32.totalorder %v3025_v19, %v813_v57 }
 0x26c   : > { %v3133_v3 = vsel %vm877_vm5, inf, %v2992_v5  ;;  %v2401_v6 = vsel %vm877_vm5, 1.0, %v2850_v56 }
 0x26d   : > { %v955_v0 = vsel %vm713_vm0, %v3133_v3, inf  ;;  %v3138_v7 = vmul.f32 %v2766_v2, %v2401_v6 }
 0x26e   : > { %956 = vmin.xlane.f32.xlu1 %v955_v0 }
 0x272   : > { %v824_v10 = vpop.xlane.xlu0 %823 }
 0x273   : > { %v825_v13 = vcvt.f32.s32 %v824_v10 }
 0x275   : > { %v828_v15 = vadd.s32 %v827_v12, %v825_v13 }
 0x277   : > { %vm878_vm6 = vcmp.eq.s32.totalorder %v3025_v19, %v828_v15 }
 0x278   : > { %v3143_v5 = vsel %vm878_vm6, inf, %v2999_v20  ;;  %v2402_v17 = vsel %vm878_vm6, 1.0, %v2850_v56  ;;  %v871_v20 = vcvt.f32.s32 %v3092_v9 }
 0x279   : > { %v958_v18 = vsel %vm713_vm0, %v3143_v5, inf  ;;  %v3148_v24 = vmul.f32 %v2768_v16, %v2402_v17 }
 0x27a   : > { %959 = vmin.xlane.f32.xlu0 %v958_v18  ;;  %v872_v38 = vshll.u32 %v871_v20, 16 }
 0x283   : > { %v839_v29 = vpop.xlane.xlu1 %838 }
 0x284   : > { %v840_v31 = vcvt.f32.s32 %v839_v29 }
 0x286   : > { %v843_v32 = vadd.s32 %v842_v30, %v840_v31 }
 0x287   : > { %v854_v61 = vpop.xlane.xlu0 %853  ;;  %v869_v36 = vpop.xlane.xlu1 %868 }
 0x288   : > { %v855_v1 = vcvt.f32.s32 %v854_v61  ;;  %v870_v39 = vcvt.f32.s32 %v869_v36  ;;  %vm879_vm7 = vcmp.eq.s32.totalorder %v3025_v19, %v843_v32 }
 0x289   : > { %v3156_v40 = vsel %vm879_vm7, inf, %v3011_v48  ;;  %v2403_v63 = vsel %vm879_vm7, 1.0, %v2850_v56 }
 0x28a   : > { %v3159_v8 = vadd.s32 %v857_v34, %v855_v1  ;;  %v3161_v41 = vadd.s32 %v872_v38, %v870_v39  ;;  %v961_v9 = vsel %vm713_vm0, %v3156_v40, inf  ;;  %v3165_v37 = vmul.f32 %v2770_v21, %v2403_v63 }
 0x28b   : > { %962 = vmin.xlane.f32.xlu1 %v961_v9 }
 0x28c   : > { %vm880_vm8 = vcmp.eq.s32.totalorder %v3025_v19, %v3159_v8  ;;  %vm881_vm9 = vcmp.eq.s32.totalorder %v3025_v19, %v3161_v41 }
 0x28d   : > { %v3175_v48 = vsel %vm880_vm8, inf, %v3018_v52  ;;  %v3181_v42 = vsel %vm881_vm9, inf, %v3014_v23 }
 0x28e   : > { %v964_v43 = vsel %vm713_vm0, %v3175_v48, inf  ;;  %v967_v44 = vsel %vm713_vm0, %v3181_v42, inf }
 0x28f   : > { %965 = vmin.xlane.f32.xlu0 %v964_v43  ;;  %968 = vmin.xlane.f32.xlu1 %v967_v44 }
 0x2eb   : > { %v3187_v45 = vpop.xlane.xlu1 %950 }
 0x2ec   : > { %vm971_vm10 = vcmp.eq.f32.partialorder %v3102_v33, %v3187_v45 }
 0x2ed   : > { %v979_v52 = vsel %vm971_vm10, %v3025_v19, 32 }
 0x2ee   : > { %v1001_v4 = vsel %vm713_vm0, %v979_v52, 2147483647 }
 0x2ef   : > { %v1003_v47 = vshra.s32 %v1001_v4, 16  ;;  %v1002_v63 = vand.u32 65535, %v1001_v4 }
 0x2f1   : > { %v1005_v23 = vcvt.s32.f32 %v1003_v47  ;;  %v1004_v43 = vcvt.s32.f32 %v1002_v63 }
 0x2f3   : > { %v3193_v49 = vpop.xlane.xlu0 %947  ;;  %1006 = vmin.xlane.f32.xlu1 %v1005_v23 }
 0x2f4   : > { %vm970_vm11 = vcmp.eq.f32.partialorder %v3114_v46, %v3193_v49 }
 0x2f5   : > { %v978_v50 = vsel %vm970_vm11, %v3025_v19, 32 }
 0x2f6   : > { %v986_v51 = vsel %vm713_vm0, %v978_v50, 2147483647 }
 0x2f7   : > { %v988_v54 = vshra.s32 %v986_v51, 16  ;;  %v987_v52 = vand.u32 65535, %v986_v51 }
 0x2f8   : > { %v3199_v55 = vpop.xlane.xlu0 %953 }
 0x2f9   : > { %vm972_vm12 = vcmp.eq.f32.partialorder %v3123_v58, %v3199_v55  ;;  %v990_v57 = vcvt.s32.f32 %v988_v54  ;;  %v989_v50 = vcvt.s32.f32 %v987_v52 }
 0x2fa   : > { %v980_v53 = vsel %vm972_vm12, %v3025_v19, 32 }
 0x2fb   : > { %991 = vmin.xlane.f32.xlu0 %v990_v57  ;;  %v3204_v60 = vpop.xlane.xlu1 %956  ;;  %v1016_v11 = vsel %vm713_vm0, %v980_v53, 2147483647 }
 0x2fc   : > { %vm973_vm13 = vcmp.eq.f32.partialorder %v3133_v3, %v3204_v60  ;;  %v1018_v2 = vshra.s32 %v1016_v11, 16  ;;  %v1017_v54 = vand.u32 65535, %v1016_v11 }
 0x2fd   : > { %v981_v6 = vsel %vm973_vm13, %v3025_v19, 32 }
 0x2fe   : > { %v1020_v0 = vcvt.s32.f32 %v1018_v2  ;;  %v1031_v14 = vsel %vm713_vm0, %v981_v6, 2147483647 }
 0x2ff   : > { %v1033_v10 = vshra.s32 %v1031_v14, 16  ;;  %v1032_v2 = vand.u32 65535, %v1031_v14 }
 0x300   : > { %1021 = vmin.xlane.f32.xlu0 %v1020_v0 }
 0x301   : > { %v1035_v12 = vcvt.s32.f32 %v1033_v10  ;;  %v1019_v10 = vcvt.s32.f32 %v1017_v54  ;;  %v1116_v54 = vadd.f32 1e-08, %v3199_v55 }
 0x303   : > { %1036 = vmin.xlane.f32.xlu1 %v1035_v12 }
 0x307   : > { %v3211_v13 = vpop.xlane.xlu0 %959 }
 0x308   : > { %vm974_vm14 = vcmp.eq.f32.partialorder %v3143_v5, %v3211_v13 }
 0x309   : > { %v982_v15 = vsel %vm974_vm14, %v3025_v19, 32 }
 0x30a   : > { %v1046_v16 = vsel %vm713_vm0, %v982_v15, 2147483647 }
 0x30b   : > { %v1048_v17 = vshra.s32 %v1046_v16, 16 }
 0x30d   : > { %v1050_v18 = vcvt.s32.f32 %v1048_v17  ;;  %v1047_v17 = vand.u32 65535, %v1046_v16 }
 0x30f   : > { %1051 = vmin.xlane.f32.xlu0 %v1050_v18  ;;  %v1049_v11 = vcvt.s32.f32 %v1047_v17 }
 0x318   : > { %v3217_v59 = vpop.xlane.xlu1 %962 }
 0x319   : > { %vm975_vm15 = vcmp.eq.f32.partialorder %v3156_v40, %v3217_v59 }
 0x31a   : > { %v983_v25 = vsel %vm975_vm15, %v3025_v19, 32 }
 0x31b   : > { %v1061_v28 = vsel %vm713_vm0, %v983_v25, 2147483647 }
 0x31c   : > { %v3223_v29 = vpop.xlane.xlu0 %965  ;;  %v3225_v30 = vpop.xlane.xlu1 %968  ;;  %v1063_v20 = vshra.s32 %v1061_v28, 16  ;;  %v1062_v25 = vand.u32 65535, %v1061_v28 }
 0x31d   : > { %vm976_vm1 = vcmp.eq.f32.partialorder %v3175_v48, %v3223_v29  ;;  %vm977_vm2 = vcmp.eq.f32.partialorder %v3181_v42, %v3225_v30 }
 0x31e   : > { %v984_v31 = vsel %vm976_vm1, %v3025_v19, 32  ;;  %v985_v32 = vsel %vm977_vm2, %v3025_v19, 32  ;;  %v1065_v34 = vcvt.s32.f32 %v1063_v20 }
 0x31f   : > { %v1076_v61 = vsel %vm713_vm0, %v984_v31, 2147483647  ;;  %v1091_v36 = vsel %vm713_vm0, %v985_v32, 2147483647 }
 0x320   : > { %1066 = vmin.xlane.f32.xlu1 %v1065_v34  ;;  %v1078_v38 = vshra.s32 %v1076_v61, 16  ;;  %v1093_v1 = vshra.s32 %v1091_v36, 16  ;;  %v1077_v31 = vand.u32 65535, %v1076_v61  ;;  %v1092_v32 = vand.u32 65535, %v1091_v36 }
 0x321   : > { %v1115_v61 = vadd.f32 1e-08, %v3187_v45  ;;  %v1114_v36 = vadd.f32 1e-08, %v3193_v49 }
 0x322   : > { %v1080_v39 = vcvt.s32.f32 %v1078_v38  ;;  %v1095_v21 = vcvt.s32.f32 %v1093_v1  ;;  %v1079_v1 = vcvt.s32.f32 %v1077_v31  ;;  %v1094_v63 = vcvt.s32.f32 %v1092_v32 }
 0x323   : > { %2771 = vrcp.f32 %v1115_v61  ;;  %v1118_v61 = vadd.f32 1e-08, %v3211_v13 }
 0x324   : > { %1081 = vmin.xlane.f32.xlu0 %v1080_v39  ;;  %1096 = vmin.xlane.f32.xlu1 %v1095_v21  ;;  %2773 = vrcp.f32 %v1114_v36 }
 0x325   : > { %2775 = vrcp.f32 %v1116_v54 }
 0x380   : > { %v1007_v9 = vpop.xlane.xlu1 %1006 }
 0x381   : > { %vm1008_vm3 = vcmp.eq.f32.partialorder %v1005_v23, %v1007_v9  ;;  %v1034_v23 = vcvt.s32.f32 %v1032_v2  ;;  %v1117_v2 = vadd.f32 1e-08, %v3204_v60 }
 0x382   : > { %v1009_v44 = vsel %vm1008_vm3, %v1004_v43, inf }
 0x383   : > { %1010 = vmin.xlane.f32.xlu1 %v1009_v44  ;;  %2777 = vrcp.f32 %v1117_v2 }
 0x384   : > { %2779 = vrcp.f32 %v1118_v61 }
 0x388   : > { %v992_v47 = vpop.xlane.xlu0 %991 }
 0x389   : > { %vm993_vm4 = vcmp.eq.f32.partialorder %v990_v57, %v992_v47 }
 0x38a   : > { %v994_v53 = vsel %vm993_vm4, %v989_v50, inf }
 0x38b   : > { %995 = vmin.xlane.f32.xlu0 %v994_v53 }
 0x38d   : > { %v3235_v6 = vpop.xlane.xlu0 %1021 }
 0x38e   : > { %vm1023_vm5 = vcmp.eq.f32.partialorder %v1020_v0, %v3235_v6  ;;  %v1064_v0 = vcvt.s32.f32 %v1062_v25 }
 0x38f   : > { %v1024_v15 = vsel %vm1023_vm5, %v1019_v10, inf }
 0x390   : > { %1025 = vmin.xlane.f32.xlu0 %v1024_v15  ;;  %v3238_v4 = vpop.xlane.xlu1 %1036 }
 0x391   : > { %vm1038_vm6 = vcmp.eq.f32.partialorder %v1035_v12, %v3238_v4 }
 0x392   : > { %v1039_v51 = vsel %vm1038_vm6, %v1034_v23, inf  ;;  %v1028_v23 = vcvt.f32.s32 %v3235_v6 }
 0x393   : > { %1040 = vmin.xlane.f32.xlu1 %v1039_v51  ;;  %v1043_v51 = vcvt.f32.s32 %v3238_v4 }
 0x39c   : > { %v3241_v57 = vpop.xlane.xlu0 %1051 }
 0x39d   : > { %vm1053_vm7 = vcmp.eq.f32.partialorder %v1050_v18, %v3241_v57 }
 0x39e   : > { %v1054_v14 = vsel %vm1053_vm7, %v1049_v11, inf }
 0x39f   : > { %1055 = vmin.xlane.f32.xlu0 %v1054_v14  ;;  %v1029_v14 = vshll.u32 %v1028_v23, 16  ;;  %v1120_v23 = vadd.f32 1e-08, %v3223_v29 }
 0x3ad   : > { %v3244_v20 = vpop.xlane.xlu1 %1066 }
 0x3ae   : > { %vm1068_vm10 = vcmp.eq.f32.partialorder %v1065_v34, %v3244_v20  ;;  %v1013_v34 = vcvt.f32.s32 %v1007_v9 }
 0x3af   : > { %v1069_v38 = vsel %vm1068_vm10, %v1064_v0, inf }
 0x3b0   : > { %1070 = vmin.xlane.f32.xlu1 %v1069_v38  ;;  %v1014_v44 = vshll.u32 %v1013_v34, 16  ;;  %v1044_v38 = vshll.u32 %v1043_v51, 16 }
 0x3b1   : > { %v3247_v12 = vpop.xlane.xlu0 %1081  ;;  %v3249_v16 = vpop.xlane.xlu1 %1096 }
 0x3b2   : > { %vm1083_vm11 = vcmp.eq.f32.partialorder %v1080_v39, %v3247_v12  ;;  %vm1098_vm12 = vcmp.eq.f32.partialorder %v1095_v21, %v3249_v16  ;;  %v998_v39 = vcvt.f32.s32 %v992_v47  ;;  %v2772_v21 = vpop.eup %2771 }
 0x3b3   : > { %v1084_v18 = vsel %vm1083_vm11, %v1079_v1, inf  ;;  %v1099_v28 = vsel %vm1098_vm12, %v1094_v63, inf  ;;  %v2774_v11 = vpop.eup %2773 }
 0x3b4   : > { %1085 = vmin.xlane.f32.xlu0 %v1084_v18  ;;  %1100 = vmin.xlane.f32.xlu1 %v1099_v28  ;;  %v999_v15 = vshll.u32 %v998_v39, 16  ;;  %v2776_v63 = vpop.eup %2775 }
 0x410   : > { %v1011_v43 = vpop.xlane.xlu1 %1010 }
 0x411   : > { %v1012_v52 = vcvt.f32.s32 %v1011_v43 }
 0x413   : > { %v1015_v50 = vadd.s32 %v1014_v44, %v1012_v52 }
 0x415   : > { %vm1107_vm13 = vcmp.eq.s32.totalorder %v3025_v19, %v1015_v50  ;;  %v1058_v50 = vcvt.f32.s32 %v3241_v57 }
 0x416   : > { %v3258_v53 = vsel %vm1107_vm13, inf, %v3102_v33  ;;  %v2407_v45 = vsel %vm1107_vm13, 1.0, %v2850_v56 }
 0x417   : > { %v1181_v9 = vsel %vm713_vm0, %v3258_v53, inf  ;;  %v1155_v49 = vmul.f32 %v2772_v21, %v2407_v45  ;;  %v1059_v21 = vshll.u32 %v1058_v50, 16 }
 0x418   : > { %v996_v10 = vpop.xlane.xlu0 %995  ;;  %1182 = vmin.xlane.f32.xlu1 %v1181_v9 }
 0x419   : > { %v997_v55 = vcvt.f32.s32 %v996_v10  ;;  %v3265_v47 = vadd.f32 %v1155_v49, %v3107_v35 }
 0x41b   : > { %v1000_v33 = vadd.s32 %v999_v15, %v997_v55  ;;  %v888_v15 = vadd.f32 1e-08, %v3063_v26  ;;  %v889_v55 = vadd.f32 1e-08, %v3065_v27  ;;  %v2404_v27 = vsel %vm880_vm8, 1.0, %v2850_v56 }
 0x41d   : > { %v1026_v17 = vpop.xlane.xlu0 %1025  ;;  %vm1106_vm14 = vcmp.eq.s32.totalorder %v3025_v19, %v1000_v33  ;;  %v1073_v33 = vcvt.f32.s32 %v3244_v20 }
 0x41e   : > { %v1027_v60 = vcvt.f32.s32 %v1026_v17  ;;  %v3271_v25 = vsel %vm1106_vm14, inf, %v3114_v46  ;;  %v2406_v0 = vsel %vm1106_vm14, 1.0, %v2850_v56  ;;  %v1103_v17 = vcvt.f32.s32 %v3249_v16 }
 0x41f   : > { %v1178_v35 = vsel %vm713_vm0, %v3271_v25, inf  ;;  %v1154_v31 = vmul.f32 %v2774_v11, %v2406_v0  ;;  %v2405_v16 = vsel %vm881_vm9, 1.0, %v2850_v56 }
 0x420   : > { %v1030_v6 = vadd.s32 %v1029_v14, %v1027_v60  ;;  %1179 = vmin.xlane.f32.xlu0 %v1178_v35  ;;  %v1041_v32 = vpop.xlane.xlu1 %1040  ;;  %v1104_v20 = vshll.u32 %v1103_v17, 16 }
 0x421   : > { %v1042_v4 = vcvt.f32.s32 %v1041_v32  ;;  %v3277_v1 = vadd.f32 %v1154_v31, %v3119_v22  ;;  %v2778_v22 = vpop.eup %2777 }
 0x422   : > { %vm1108_vm15 = vcmp.eq.s32.totalorder %v3025_v19, %v1030_v6  ;;  %v2780_v9 = vpop.eup %2779 }
 0x423   : > { %v1045_v18 = vadd.s32 %v1044_v38, %v1042_v4  ;;  %v3281_v46 = vsel %vm1108_vm15, inf, %v3123_v58  ;;  %v2408_v28 = vsel %vm1108_vm15, 1.0, %v2850_v56 }
 0x424   : > { %v1184_v34 = vsel %vm713_vm0, %v3281_v46, inf  ;;  %v1156_v36 = vmul.f32 %v2776_v63, %v2408_v28 }
 0x425   : > { %1185 = vmin.xlane.f32.xlu0 %v1184_v34  ;;  %vm1109_vm1 = vcmp.eq.s32.totalorder %v3025_v19, %v1045_v18 }
 0x426   : > { %v3289_v43 = vsel %vm1109_vm1, inf, %v3133_v3  ;;  %v2409_v44 = vsel %vm1109_vm1, 1.0, %v2850_v56  ;;  %v3293_v58 = vadd.f32 %v1156_v36, %v3129_v62 }
 0x427   : > { %v1187_v52 = vsel %vm713_vm0, %v3289_v43, inf  ;;  %v1157_v13 = vmul.f32 %v2778_v22, %v2409_v44 }
 0x428   : > { %1188 = vmin.xlane.f32.xlu1 %v1187_v52 }
 0x429   : > { %v3299_v54 = vadd.f32 %v1157_v13, %v3138_v7  ;;  %v1119_v7 = vadd.f32 1e-08, %v3217_v59  ;;  %v1088_v59 = vcvt.f32.s32 %v3247_v12 }
 0x42b   : > { %2781 = vrcp.f32 %v1119_v7  ;;  %v1089_v29 = vshll.u32 %v1088_v59, 16 }
 0x42c   : > { %v1056_v39 = vpop.xlane.xlu0 %1055  ;;  %2783 = vrcp.f32 %v888_v15 }
 0x42d   : > { %v1057_v3 = vcvt.f32.s32 %v1056_v39  ;;  %2785 = vrcp.f32 %v889_v55 }
 0x42e   : > { %2787 = vrcp.f32 %v1120_v23 }
 0x42f   : > { %v1060_v45 = vadd.s32 %v1059_v21, %v1057_v3 }
 0x431   : > { %vm1110_vm2 = vcmp.eq.s32.totalorder %v3025_v19, %v1060_v45 }
 0x432   : > { %v3303_v62 = vsel %vm1110_vm2, inf, %v3143_v5  ;;  %v2410_v49 = vsel %vm1110_vm2, 1.0, %v2850_v56  ;;  %v1121_v5 = vadd.f32 1e-08, %v3225_v30 }
 0x433   : > { %v1190_v2 = vsel %vm713_vm0, %v3303_v62, inf  ;;  %v1158_v10 = vmul.f32 %v2780_v9, %v2410_v49 }
 0x434   : > { %1191 = vmin.xlane.f32.xlu0 %v1190_v2  ;;  %2789 = vrcp.f32 %v1121_v5 }
 0x435   : > { %v3310_v57 = vadd.f32 %v1158_v10, %v3148_v24  ;;  %v1074_v24 = vshll.u32 %v1073_v33, 16  ;;  %v2782_v12 = vpop.eup %2781 }
 0x436   : > { %v2784_v31 = vpop.eup %2783 }
 0x437   : > { %v2786_v63 = vpop.eup %2785  ;;  %v928_v18 = vmul.f32 %v2784_v31, %v2404_v27 }
 0x438   : > { %v2788_v28 = vpop.eup %2787  ;;  %v929_v61 = vmul.f32 %v2786_v63, %v2405_v16 }
 0x43d   : > { %v1071_v51 = vpop.xlane.xlu1 %1070 }
 0x43e   : > { %v1072_v26 = vcvt.f32.s32 %v1071_v51  ;;  %v2790_v41 = vpop.eup %2789 }
 0x440   : > { %v1075_v11 = vadd.s32 %v1074_v24, %v1072_v26 }
 0x441   : > { %v1086_v30 = vpop.xlane.xlu0 %1085  ;;  %v1101_v14 = vpop.xlane.xlu1 %1100 }
 0x442   : > { %v1087_v60 = vcvt.f32.s32 %v1086_v30  ;;  %v1102_v0 = vcvt.f32.s32 %v1101_v14  ;;  %vm1111_vm3 = vcmp.eq.s32.totalorder %v3025_v19, %v1075_v11 }
 0x443   : > { %v3329_v35 = vsel %vm1111_vm3, inf, %v3156_v40  ;;  %v2411_v8 = vsel %vm1111_vm3, 1.0, %v2850_v56 }
 0x444   : > { %v1090_v6 = vadd.s32 %v1089_v29, %v1087_v60  ;;  %v1105_v32 = vadd.s32 %v1104_v20, %v1102_v0  ;;  %v1193_v38 = vsel %vm713_vm0, %v3329_v35, inf  ;;  %v1159_v4 = vmul.f32 %v2782_v12, %v2411_v8 }
 0x445   : > { %1194 = vmin.xlane.f32.xlu1 %v1193_v38 }
 0x446   : > { %vm1112_vm8 = vcmp.eq.s32.totalorder %v3025_v19, %v1090_v6  ;;  %vm1113_vm9 = vcmp.eq.s32.totalorder %v3025_v19, %v1105_v32  ;;  %v3337_v40 = vadd.f32 %v1159_v4, %v3165_v37 }
 0x447   : > { %v1176_v34 = vsel %vm1112_vm8, inf, %v3175_v48  ;;  %v2412_v36 = vsel %vm1112_vm8, 1.0, %v2850_v56  ;;  %v1177_v22 = vsel %vm1113_vm9, inf, %v3181_v42  ;;  %v2413_v44 = vsel %vm1113_vm9, 1.0, %v2850_v56 }
 0x448   : > { %v1196_v52 = vsel %vm713_vm0, %v1176_v34, inf  ;;  %v1160_v13 = vmul.f32 %v2788_v28, %v2412_v36  ;;  %v1199_v50 = vsel %vm713_vm0, %v1177_v22, inf  ;;  %v1161_v39 = vmul.f32 %v2790_v41, %v2413_v44 }
 0x449   : > { %1197 = vmin.xlane.f32.xlu0 %v1196_v52  ;;  %1200 = vmin.xlane.f32.xlu1 %v1199_v50 }
 0x44a   : > { %v3345_v21 = vadd.f32 %v1160_v13, %v928_v18  ;;  %v3347_v37 = vadd.f32 %v1161_v39, %v929_v61 }
 0x4a5   : > { %v3349_v3 = vpop.xlane.xlu1 %1182 }
 0x4a6   : > { %vm1203_vm4 = vcmp.eq.f32.partialorder %v3258_v53, %v3349_v3 }
 0x4a7   : > { %v1211_v48 = vsel %vm1203_vm4, %v3025_v19, 32 }
 0x4a8   : > { %v1233_v42 = vsel %vm713_vm0, %v1211_v48, 2147483647 }
 0x4a9   : > { %v1235_v45 = vshra.s32 %v1233_v42, 16  ;;  %v1234_v4 = vand.u32 65535, %v1233_v42 }
 0x4ab   : > { %v1237_v9 = vcvt.s32.f32 %v1235_v45  ;;  %v1236_v18 = vcvt.s32.f32 %v1234_v4 }
 0x4ad   : > { %v3355_v49 = vpop.xlane.xlu0 %1179  ;;  %1238 = vmin.xlane.f32.xlu1 %v1237_v9 }
 0x4ae   : > { %vm1202_vm5 = vcmp.eq.f32.partialorder %v3271_v25, %v3355_v49 }
 0x4af   : > { %v1210_v2 = vsel %vm1202_vm5, %v3025_v19, 32 }
 0x4b0   : > { %v1218_v10 = vsel %vm713_vm0, %v1210_v2, 2147483647 }
 0x4b1   : > { %v1220_v7 = vshra.s32 %v1218_v10, 16  ;;  %v1219_v61 = vand.u32 65535, %v1218_v10 }
 0x4b2   : > { %v3361_v15 = vpop.xlane.xlu0 %1185 }
 0x4b3   : > { %vm1204_vm6 = vcmp.eq.f32.partialorder %v3281_v46, %v3361_v15  ;;  %v1222_v53 = vcvt.s32.f32 %v1220_v7 }
 0x4b4   : > { %v1212_v55 = vsel %vm1204_vm6, %v3025_v19, 32 }
 0x4b5   : > { %1223 = vmin.xlane.f32.xlu0 %v1222_v53  ;;  %v3366_v23 = vpop.xlane.xlu1 %1188  ;;  %v1248_v5 = vsel %vm713_vm0, %v1212_v55, 2147483647 }
 0x4b6   : > { %vm1205_vm7 = vcmp.eq.f32.partialorder %v3289_v43, %v3366_v23  ;;  %v1250_v25 = vshra.s32 %v1248_v5, 16  ;;  %v1249_v36 = vand.u32 65535, %v1248_v5 }
 0x4b7   : > { %v1213_v33 = vsel %vm1205_vm7, %v3025_v19, 32 }
 0x4b8   : > { %v1252_v59 = vcvt.s32.f32 %v1250_v25  ;;  %v1263_v51 = vsel %vm713_vm0, %v1213_v33, 2147483647  ;;  %v1251_v13 = vcvt.s32.f32 %v1249_v36 }
 0x4b9   : > { %v1265_v24 = vshra.s32 %v1263_v51, 16  ;;  %v1264_v44 = vand.u32 65535, %v1263_v51 }
 0x4ba   : > { %1253 = vmin.xlane.f32.xlu0 %v1252_v59 }
 0x4bb   : > { %v1267_v46 = vcvt.s32.f32 %v1265_v24  ;;  %v1266_v48 = vcvt.s32.f32 %v1264_v44 }
 0x4bd   : > { %1268 = vmin.xlane.f32.xlu1 %v1267_v46 }
 0x4c1   : > { %v3373_v17 = vpop.xlane.xlu0 %1191 }
 0x4c2   : > { %vm1206_vm10 = vcmp.eq.f32.partialorder %v3303_v62, %v3373_v17 }
 0x4c3   : > { %v1214_v26 = vsel %vm1206_vm10, %v3025_v19, 32 }
 0x4c4   : > { %v1278_v11 = vsel %vm713_vm0, %v1214_v26, 2147483647 }
 0x4c5   : > { %v1280_v43 = vshra.s32 %v1278_v11, 16  ;;  %v1279_v45 = vand.u32 65535, %v1278_v11 }
 0x4c7   : > { %v1282_v27 = vcvt.s32.f32 %v1280_v43  ;;  %v1281_v2 = vcvt.s32.f32 %v1279_v45  ;;  %v1347_v43 = vadd.f32 1e-08, %v3349_v3  ;;  %v1349_v3 = vadd.f32 1e-08, %v3366_v23 }
 0x4c9   : > { %1283 = vmin.xlane.f32.xlu0 %v1282_v27  ;;  %2791 = vrcp.f32 %v1347_v43 }
 0x4d2   : > { %v3379_v29 = vpop.xlane.xlu1 %1194 }
 0x4d3   : > { %vm1207_vm11 = vcmp.eq.f32.partialorder %v3329_v35, %v3379_v29 }
 0x4d4   : > { %v1215_v30 = vsel %vm1207_vm11, %v3025_v19, 32 }
 0x4d5   : > { %v1293_v14 = vsel %vm713_vm0, %v1215_v30, 2147483647  ;;  %v1346_v30 = vadd.f32 1e-08, %v3355_v49 }
 0x4d6   : > { %v3385_v20 = vpop.xlane.xlu0 %1197  ;;  %v3387_v60 = vpop.xlane.xlu1 %1200  ;;  %v1295_v62 = vshra.s32 %v1293_v14, 16  ;;  %v1294_v7 = vand.u32 65535, %v1293_v14 }
 0x4d7   : > { %vm1208_vm12 = vcmp.eq.f32.partialorder %v1176_v34, %v3385_v20  ;;  %vm1209_vm13 = vcmp.eq.f32.partialorder %v1177_v22, %v3387_v60  ;;  %v1221_v34 = vcvt.s32.f32 %v1219_v61  ;;  %2793 = vrcp.f32 %v1346_v30 }
 0x4d8   : > { %v1216_v0 = vsel %vm1208_vm12, %v3025_v19, 32  ;;  %v1217_v12 = vsel %vm1209_vm13, %v3025_v19, 32  ;;  %v1297_v16 = vcvt.s32.f32 %v1295_v62  ;;  %v1296_v5 = vcvt.s32.f32 %v1294_v7 }
 0x4d9   : > { %v1308_v35 = vsel %vm713_vm0, %v1216_v0, 2147483647  ;;  %v1323_v8 = vsel %vm713_vm0, %v1217_v12, 2147483647 }
 0x4da   : > { %1298 = vmin.xlane.f32.xlu1 %v1297_v16  ;;  %v1310_v31 = vshra.s32 %v1308_v35, 16  ;;  %v1325_v6 = vshra.s32 %v1323_v8, 16  ;;  %v1309_v25 = vand.u32 65535, %v1308_v35 }
 0x4dc   : > { %v1312_v32 = vcvt.s32.f32 %v1310_v31  ;;  %v1327_v38 = vcvt.s32.f32 %v1325_v6  ;;  %v1311_v24 = vcvt.s32.f32 %v1309_v25 }
 0x4de   : > { %1313 = vmin.xlane.f32.xlu0 %v1312_v32  ;;  %1328 = vmin.xlane.f32.xlu1 %v1327_v38 }
 0x53a   : > { %v1239_v63 = vpop.xlane.xlu1 %1238 }
 0x53b   : > { %vm1240_vm14 = vcmp.eq.f32.partialorder %v1237_v9, %v1239_v63 }
 0x53c   : > { %v1241_v28 = vsel %vm1240_vm14, %v1236_v18, inf }
 0x53d   : > { %1242 = vmin.xlane.f32.xlu1 %v1241_v28 }
 0x542   : > { %v1224_v41 = vpop.xlane.xlu0 %1223 }
 0x543   : > { %vm1225_vm15 = vcmp.eq.f32.partialorder %v1222_v53, %v1224_v41  ;;  %v1324_v53 = vand.u32 65535, %v1323_v8  ;;  %v1230_v35 = vcvt.f32.s32 %v1224_v41  ;;  %v2792_v8 = vpop.eup %2791 }
 0x544   : > { %v1226_v22 = vsel %vm1225_vm15, %v1221_v34, inf  ;;  %v2794_v61 = vpop.eup %2793 }
 0x545   : > { %1227 = vmin.xlane.f32.xlu0 %v1226_v22 }
 0x547   : > { %v3395_v52 = vpop.xlane.xlu0 %1253 }
 0x548   : > { %vm1255_vm1 = vcmp.eq.f32.partialorder %v1252_v59, %v3395_v52 }
 0x549   : > { %v1256_v50 = vsel %vm1255_vm1, %v1251_v13, inf }
 0x54a   : > { %1257 = vmin.xlane.f32.xlu0 %v1256_v50  ;;  %v3398_v39 = vpop.xlane.xlu1 %1268 }
 0x54b   : > { %vm1270_vm2 = vcmp.eq.f32.partialorder %v1267_v46, %v3398_v39  ;;  %v1326_v46 = vcvt.s32.f32 %v1324_v53  ;;  %v1275_v28 = vcvt.f32.s32 %v3398_v39 }
 0x54c   : > { %v1271_v42 = vsel %vm1270_vm2, %v1266_v48, inf }
 0x54d   : > { %1272 = vmin.xlane.f32.xlu1 %v1271_v42 }
 0x556   : > { %v3401_v9 = vpop.xlane.xlu0 %1283 }
 0x557   : > { %vm1285_vm3 = vcmp.eq.f32.partialorder %v1282_v27, %v3401_v9  ;;  %v1245_v27 = vcvt.f32.s32 %v1239_v63  ;;  %v1260_v63 = vcvt.f32.s32 %v3395_v52  ;;  %v1276_v52 = vshll.u32 %v1275_v28, 16 }
 0x558   : > { %v1286_v10 = vsel %vm1285_vm3, %v1281_v2, inf  ;;  %v1350_v2 = vadd.f32 1e-08, %v3373_v17 }
 0x559   : > { %1287 = vmin.xlane.f32.xlu0 %v1286_v10  ;;  %v1246_v62 = vshll.u32 %v1245_v27, 16  ;;  %v1261_v41 = vshll.u32 %v1260_v63, 16 }
 0x567   : > { %v3404_v55 = vpop.xlane.xlu1 %1298 }
 0x568   : > { %vm1300_vm8 = vcmp.eq.f32.partialorder %v1297_v16, %v3404_v55  ;;  %v1348_v16 = vadd.f32 1e-08, %v3361_v15 }
 0x569   : > { %v1301_v33 = vsel %vm1300_vm8, %v1296_v5, inf }
 0x56a   : > { %1302 = vmin.xlane.f32.xlu1 %v1301_v33  ;;  %2795 = vrcp.f32 %v1348_v16  ;;  %v1290_v33 = vcvt.f32.s32 %v3401_v9  ;;  %v1351_v9 = vadd.f32 1e-08, %v3379_v29  ;;  %v2717_v29 = vld [vmem:[%s506_s23] sm:$0xff]  }
 0x56b   : > { %v3407_v59 = vpop.xlane.xlu0 %1313  ;;  %v3409_v51 = vpop.xlane.xlu1 %1328  ;;  %2797 = vrcp.f32 %v1349_v3  ;;  %2544 = vmatprep.subr.bf16.mxu0 %v2717_v29  ;;  %v2718_v3 = vld [vmem:[%s506_s23 + $0x8] sm:$0xff]  }
 0x56c   : > { %vm1330_vm9 = vcmp.eq.f32.partialorder %v1327_v38, %v3409_v51  ;;  %vm1315_vm4 = vcmp.eq.f32.partialorder %v1312_v32, %v3407_v59  ;;  %v1231_v38 = vshll.u32 %v1230_v35, 16  ;;  %2799 = vrcp.f32 %v1350_v2  ;;  %2545 = vmatpush3.bf16.msra.mxu0 %v2717_v29 }
 0x56d   : > { %v1316_v26 = vsel %vm1315_vm4, %v1311_v24, inf  ;;  %v1331_v11 = vsel %vm1330_vm9, %v1326_v46, inf  ;;  %2801 = vrcp.f32 %v1351_v9  ;;  %2546 = vmatprep.subr.bf16.mxu0 %v2718_v3 }
 0x56e   : > { %1317 = vmin.xlane.f32.xlu0 %v1316_v26  ;;  %1332 = vmin.xlane.f32.xlu1 %v1331_v11  ;;  %v1291_v26 = vshll.u32 %v1290_v33, 16 }
 0x570   : > { %2547 = vmatpush3.bf16.msra.mxu0 %v2718_v3 }
 0x574   : > { %v2796_v48 = vpop.eup %2795 }
 0x575   : > { %v2798_v7 = vpop.eup %2797 }
 0x576   : > { %v2800_v43 = vpop.eup %2799 }
 0x577   : > { %v2802_v63 = vpop.eup %2801 }
 0x5ca   : > { %v1243_v14 = vpop.xlane.xlu1 %1242 }
 0x5cb   : > { %v1244_v0 = vcvt.f32.s32 %v1243_v14 }
 0x5cd   : > { %v1247_v12 = vadd.s32 %v1246_v62, %v1244_v0  ;;  %v1352_v62 = vadd.f32 1e-08, %v3385_v20  ;;  %v1353_v0 = vadd.f32 1e-08, %v3387_v60  ;;  %v1335_v20 = vcvt.f32.s32 %v3409_v51 }
 0x5cf   : > { %vm1339_vm5 = vcmp.eq.s32.totalorder %v3025_v19, %v1247_v12  ;;  %v1305_v12 = vcvt.f32.s32 %v3404_v55  ;;  %2803 = vrcp.f32 %v1352_v62 }
 0x5d0   : > { %v2415_v31 = vsel %vm1339_vm5, 1.0, %v2850_v56  ;;  %2805 = vrcp.f32 %v1353_v0 }
 0x5d1   : > { %v1387_v6 = vmul.f32 %v2792_v8, %v2415_v31  ;;  %v1306_v35 = vshll.u32 %v1305_v12, 16 }
 0x5d2   : > { %v1228_v32 = vpop.xlane.xlu0 %1227 }
 0x5d3   : > { %v1229_v49 = vcvt.f32.s32 %v1228_v32  ;;  %v3420_v4 = vadd.f32 %v1387_v6, %v3265_v47  ;;  %v1336_v32 = vshll.u32 %v1335_v20, 16  ;;  %v2728_v20 = vld [vmem:[%s3653_s5 + $0x8] sm:$0xff]  }
 0x5d5   : > { %v1232_v18 = vadd.s32 %v1231_v38, %v1229_v49  ;;  %v1405_v15 = vsel %vm713_vm0, %v3420_v4, 0.0 }
 0x5d6   : > { %1406 = vadd.xlane.f32.xlu1 %v1405_v15 }
 0x5d7   : > { %vm1338_vm6 = vcmp.eq.s32.totalorder %v3025_v19, %v1232_v18  ;;  %v1258_v23 = vpop.xlane.xlu0 %1257 }
 0x5d8   : > { %v1259_v34 = vcvt.f32.s32 %v1258_v23  ;;  %v2414_v36 = vsel %vm1338_vm6, 1.0, %v2850_v56 }
 0x5d9   : > { %v1386_v47 = vmul.f32 %v2794_v61, %v2414_v36  ;;  %v2804_v28 = vpop.eup %2803 }
 0x5da   : > { %v1262_v22 = vadd.s32 %v1261_v41, %v1259_v34  ;;  %v1273_v44 = vpop.xlane.xlu1 %1272  ;;  %v2806_v61 = vpop.eup %2805 }
 0x5db   : > { %v1274_v13 = vcvt.f32.s32 %v1273_v44  ;;  %v3429_v50 = vadd.f32 %v1386_v47, %v3277_v1 }
 0x5dc   : > { %vm1340_vm7 = vcmp.eq.s32.totalorder %v3025_v19, %v1262_v22 }
 0x5dd   : > { %v1277_v39 = vadd.s32 %v1276_v52, %v1274_v13  ;;  %v1402_v42 = vsel %vm713_vm0, %v3429_v50, 0.0  ;;  %v2416_v45 = vsel %vm1340_vm7, 1.0, %v2850_v56  ;;  %v2722_v13 = vld [vmem:[%s3651_s3 + $0x18] sm:$0xff]  }
 0x5de   : > { %1403 = vadd.xlane.f32.xlu0 %v1402_v42  ;;  %v1388_v10 = vmul.f32 %v2796_v48, %v2416_v45  ;;  %v2723_v48 = vld [vmem:[%s3651_s3 + $0x20] sm:$0xff]   ;;  %v2725_v42 = vld [vmem:[%s3651_s3 + $0x30] sm:$0xff]  }
 0x5df   : > { %vm1341_vm10 = vcmp.eq.s32.totalorder %v3025_v19, %v1277_v39  ;;  %v2724_v39 = vld [vmem:[%s3651_s3 + $0x28] sm:$0xff]  }
 0x5e0   : > { %v2417_v53 = vsel %vm1341_vm10, 1.0, %v2850_v56  ;;  %v3439_v1 = vadd.f32 %v1388_v10, %v3293_v58 }
 0x5e1   : > { %v1389_v5 = vmul.f32 %v2798_v7, %v2417_v53 }
 0x5e2   : > { %v1408_v25 = vsel %vm713_vm0, %v3439_v1, 0.0 }
 0x5e3   : > { %1409 = vadd.xlane.f32.xlu0 %v1408_v25  ;;  %v3445_v17 = vadd.f32 %v1389_v5, %v3299_v54 }
 0x5e5   : > { %v1411_v24 = vsel %vm713_vm0, %v3445_v17, 0.0 }
 0x5e6   : > { %v1288_v46 = vpop.xlane.xlu0 %1287  ;;  %1412 = vadd.xlane.f32.xlu1 %v1411_v24 }
 0x5e7   : > { %v1289_v58 = vcvt.f32.s32 %v1288_v46 }
 0x5e9   : > { %v1292_v11 = vadd.s32 %v1291_v26, %v1289_v58 }
 0x5eb   : > { %vm1342_vm11 = vcmp.eq.s32.totalorder %v3025_v19, %v1292_v11 }
 0x5ec   : > { %v2418_v27 = vsel %vm1342_vm11, 1.0, %v2850_v56 }
 0x5ed   : > { %v1390_v30 = vmul.f32 %v2800_v43, %v2418_v27 }
 0x5ef   : > { %v3453_v54 = vadd.f32 %v1390_v30, %v3310_v57  ;;  %v1320_v57 = vcvt.f32.s32 %v3407_v59 }
 0x5f1   : > { %v1414_v14 = vsel %vm713_vm0, %v3453_v54, 0.0  ;;  %v1321_v31 = vshll.u32 %v1320_v57, 16 }
 0x5f2   : > { %1415 = vadd.xlane.f32.xlu0 %v1414_v14 }
 0x5f7   : > { %v1303_v16 = vpop.xlane.xlu1 %1302 }
 0x5f8   : > { %v1304_v8 = vcvt.f32.s32 %v1303_v16 }
 0x5fa   : > { %v1307_v60 = vadd.s32 %v1306_v35, %v1304_v8  ;;  %v2726_v35 = vld [vmem:[%s3651_s3 + $0x38] sm:$0xff]   ;;  %v2729_v8 = vld [vmem:[%s3653_s5 + $0x10] sm:$0xff]  }
 0x5fb   : > { %v1318_v55 = vpop.xlane.xlu0 %1317  ;;  %v1333_v6 = vpop.xlane.xlu1 %1332 }
 0x5fc   : > { %vm1343_vm12 = vcmp.eq.s32.totalorder %v3025_v19, %v1307_v60  ;;  %v1319_v38 = vcvt.f32.s32 %v1318_v55  ;;  %v1334_v49 = vcvt.f32.s32 %v1333_v6  ;;  %v2730_v60 = vld [vmem:[%s3653_s5 + $0x18] sm:$0xff]   ;;  %v2732_v55 = vld [vmem:[%s3653_s5 + $0x28] sm:$0xff]  }
 0x5fd   : > { %v2419_v59 = vsel %vm1343_vm12, 1.0, %v2850_v56 }
 0x5fe   : > { %v1322_v18 = vadd.s32 %v1321_v31, %v1319_v38  ;;  %v1337_v15 = vadd.s32 %v1336_v32, %v1334_v49  ;;  %v1391_v51 = vmul.f32 %v2802_v63, %v2419_v59  ;;  %v2731_v31 = vld [vmem:[%s3653_s5 + $0x20] sm:$0xff]  }
 0x600   : > { %vm1344_vm13 = vcmp.eq.s32.totalorder %v3025_v19, %v1322_v18  ;;  %vm1345_vm14 = vcmp.eq.s32.totalorder %v3025_v19, %v1337_v15  ;;  %v3471_v23 = vadd.f32 %v1391_v51, %v3337_v40 }
 0x601   : > { %v2420_v41 = vsel %vm1344_vm13, 1.0, %v2850_v56  ;;  %v2421_v34 = vsel %vm1345_vm14, 1.0, %v2850_v56  ;;  %v2719_v56 = vld [vmem:[%s3651_s3] sm:$0xff]  }
 0x602   : > { %v1417_v36 = vsel %vm713_vm0, %v3471_v23, 0.0  ;;  %v1392_v47 = vmul.f32 %v2804_v28, %v2420_v41  ;;  %v1393_v22 = vmul.f32 %v2806_v61, %v2421_v34  ;;  %2556 = vmatprep.subr.bf16.mxu1 %v2719_v56  ;;  %v2733_v61 = vld [vmem:[%s3653_s5 + $0x30] sm:$0xff]   ;;  %v2734_v41 = vld [vmem:[%s3653_s5 + $0x38] sm:$0xff]   ;;  %v2735_v34 = vld [vmem:[%s3655_s7] sm:$0xff]  }
 0x603   : > { %1418 = vadd.xlane.f32.xlu1 %v1417_v36  ;;  %2557 = vmatpush3.bf16.msra.mxu1 %v2719_v56  ;;  %v2736_v36 = vld [vmem:[%s3655_s7 + $0x8] sm:$0xff]  }
 0x604   : > { %v3478_v44 = vadd.f32 %v1392_v47, %v3345_v21  ;;  %v3481_v52 = vadd.f32 %v1393_v22, %v3347_v37  ;;  %v2720_v21 = vld [vmem:[%s3651_s3 + $0x8] sm:$0xff]   ;;  %v2721_v37 = vld [vmem:[%s3651_s3 + $0x10] sm:$0xff]   ;;  %v2738_v22 = vld [vmem:[%s3655_s7 + $0x18] sm:$0xff]  }
 0x605   : > { %2558 = vmatprep.subr.bf16.mxu1 %v2720_v21  ;;  %v2737_v47 = vld [vmem:[%s3655_s7 + $0x10] sm:$0xff]  }
 0x606   : > { %v1420_v19 = vsel %vm713_vm0, %v3478_v44, 0.0  ;;  %v1423_v40 = vsel %vm713_vm0, %v3481_v52, 0.0 }
 0x607   : > { %1421 = vadd.xlane.f32.xlu0 %v1420_v19  ;;  %1424 = vadd.xlane.f32.xlu1 %v1423_v40  ;;  %v2428_v19 = vld [vmem:[%s3652_s4] ss:$0 sm:$0xff] }
 0x608   : > { %2559 = vmatpush3.bf16.msra.mxu1 %v2720_v21 }
 0x609   : > { %2560 = vmatprep.subr.bf16.mxu1 %v2721_v37 }
 0x60c   : > { %2561 = vmatpush3.bf16.msra.mxu1 %v2721_v37 }
 0x60d   : > { %2562 = vmatprep.subr.bf16.mxu1 %v2722_v13 }
 0x610   : > { %2563 = vmatpush3.bf16.msra.mxu1 %v2722_v13 }
 0x611   : > { %2564 = vmatprep.subr.bf16.mxu1 %v2723_v48 }
 0x614   : > { %2565 = vmatpush3.bf16.msra.mxu1 %v2723_v48 }
 0x615   : > { %2566 = vmatprep.subr.bf16.mxu1 %v2724_v39 }
 0x618   : > { %2567 = vmatpush3.bf16.msra.mxu1 %v2724_v39 }
 0x619   : > { %2568 = vmatprep.subr.bf16.mxu1 %v2725_v42 }
 0x61c   : > { %2569 = vmatpush3.bf16.msra.mxu1 %v2725_v42 }
 0x61d   : > { %2570 = vmatprep.subr.bf16.mxu1 %v2726_v35 }
 0x620   : > { %2571 = vmatpush3.bf16.msra.mxu1 %v2726_v35  ;;  %v2437_v35 = vld [vmem:[%s3654_s6] ss:$0 sm:$0xff] }
 0x621   : > { %2604 = vmatprep.subr.bf16.mxu1 %v2735_v34 }
 0x663   : > { %v1407_v45 = vpop.xlane.xlu1 %1406 }
 0x664   : > { %2807 = vrcp.f32 %v1407_v45 }
 0x66b   : > { %v1404_v2 = vpop.xlane.xlu0 %1403 }
 0x66c   : > { %2809 = vrcp.f32 %v1404_v2 }
 0x66e   : > { %v2808_v53 = vpop.eup %2807 }
 0x66f   : > { %v1435_v33 = vmul.f32 %v2808_v53, %v3420_v4 }
 0x670   : > { %v1410_v10 = vpop.xlane.xlu0 %1409 }
 0x671   : > { %2811 = vrcp.f32 %v1410_v10 }
 0x673   : > { %v1413_v7 = vpop.xlane.xlu1 %1412 }
 0x674   : > { %2813 = vrcp.f32 %v1413_v7 }
 0x676   : > { %v2810_v5 = vpop.eup %2809 }
 0x677   : > { %v1434_v25 = vmul.f32 %v2810_v5, %v3429_v50 }
 0x679   : > { %v1442_v24 = vpack.c.bf16 %v1435_v33, %v1434_v25 }
 0x67b   : > { %2548 = vmatprep.mubr.msk.bf16.mxu0 %vm713_vm0, %v1442_v24  ;;  %v2812_v46 = vpop.eup %2811 }
 0x67c   : > { %v1436_v58 = vmul.f32 %v2812_v46, %v3439_v1 }
 0x67e   : > { %v2814_v26 = vpop.eup %2813 }
 0x67f   : > { %v1437_v11 = vmul.f32 %v2814_v26, %v3445_v17  ;;  %v1416_v27 = vpop.xlane.xlu0 %1415 }
 0x680   : > { %2815 = vrcp.f32 %v1416_v27 }
 0x681   : > { %v1443_v43 = vpack.c.bf16 %v1437_v11, %v1436_v58 }
 0x683   : > { %2549 = vmatmul.mubr.msk.bf16.vlgmr.msra.gmra.mrb[0].mxu0 %vm713_vm0, %v1443_v43 }
 0x68a   : > { %v2816_v4 = vpop.eup %2815 }
 0x68b   : > { %v1438_v62 = vmul.f32 %v2816_v4, %v3453_v54  ;;  %v2727_v54 = vld [vmem:[%s3653_s5] sm:$0xff]  }
 0x68c   : > { %2580 = vmatprep.subr.bf16.mxu0 %v2727_v54 }
 0x68d   : > { %2581 = vmatpush3.bf16.msra.mxu0 %v2727_v54 }
 0x68e   : > { %2582 = vmatprep.subr.bf16.mxu0 %v2728_v20 }
 0x690   : > { %v1419_v30 = vpop.xlane.xlu1 %1418 }
 0x691   : > { %2817 = vrcp.f32 %v1419_v30  ;;  %2583 = vmatpush3.bf16.msra.mxu0 %v2728_v20 }
 0x692   : > { %2584 = vmatprep.subr.bf16.mxu0 %v2729_v8 }
 0x694   : > { %v1422_v9 = vpop.xlane.xlu0 %1421  ;;  %v1425_v50 = vpop.xlane.xlu1 %1424 }
 0x695   : > { %2819 = vrcp.f32 %v1422_v9  ;;  %2585 = vmatpush3.bf16.msra.mxu0 %v2729_v8 }
 0x696   : > { %2821 = vrcp.f32 %v1425_v50  ;;  %2586 = vmatprep.subr.bf16.mxu0 %v2730_v60 }
 0x699   : > { %2587 = vmatpush3.bf16.msra.mxu0 %v2730_v60 }
 0x69a   : > { %2588 = vmatprep.subr.bf16.mxu0 %v2731_v31 }
 0x69b   : > { %v2818_v14 = vpop.eup %2817 }
 0x69c   : > { %v1439_v0 = vmul.f32 %v2818_v14, %v3471_v23 }
 0x69d   : > { %2589 = vmatpush3.bf16.msra.mxu0 %v2731_v31 }
 0x69e   : > { %v1444_v1 = vpack.c.bf16 %v1439_v0, %v1438_v62  ;;  %2590 = vmatprep.subr.bf16.mxu0 %v2732_v55  ;;  %v2741_v62 = vld [vmem:[%s3655_s7 + $0x30] sm:$0xff]   ;;  %v2742_v0 = vld [vmem:[%s3655_s7 + $0x38] sm:$0xff]  }
 0x69f   : > { %v2820_v12 = vpop.eup %2819 }
 0x6a0   : > { %v2822_v17 = vpop.eup %2821  ;;  %2552 = vmatprep.mubr.msk.bf16.mxu0 %vm713_vm0, %v1444_v1  ;;  %v1440_v29 = vmul.f32 %v2820_v12, %v3478_v44  ;;  %v2739_v44 = vld [vmem:[%s3655_s7 + $0x20] sm:$0xff]   ;;  %v2744_v12 = vld [vmem:[%s3657_s9 + $0x8] sm:$0xff]  }
 0x6a1   : > { %v1441_v57 = vmul.f32 %v2822_v17, %v3481_v52  ;;  %2591 = vmatpush3.bf16.msra.mxu0 %v2732_v55  ;;  %v2740_v52 = vld [vmem:[%s3655_s7 + $0x28] sm:$0xff]   ;;  %v2743_v1 = vld [vmem:[%s3657_s9] sm:$0xff]   ;;  %v2745_v17 = vld [vmem:[%s3657_s9 + $0x10] sm:$0xff]  }
 0x6a2   : > { %2592 = vmatprep.subr.bf16.mxu0 %v2733_v61 }
 0x6a3   : > { %v1445_v16 = vpack.c.bf16 %v1441_v57, %v1440_v29  ;;  %v2746_v29 = vld [vmem:[%s3657_s9 + $0x18] sm:$0xff]   ;;  %v2747_v57 = vld [vmem:[%s3657_s9 + $0x20] sm:$0xff]  }
 0x6a5   : > { %2553 = vmatmul.mubr.msk.bf16.gmra.mrb[4].mxu0 %vm713_vm0, %v1445_v16  ;;  %v2748_v16 = vld [vmem:[%s3657_s9 + $0x28] sm:$0xff]  }
 0x6a6   : > { %2593 = vmatpush3.bf16.msra.mxu0 %v2733_v61 }
 0x6a7   : > { %2594 = vmatprep.subr.bf16.mxu0 %v2734_v41 }
 0x6aa   : > { %2595 = vmatpush3.bf16.msra.mxu0 %v2734_v41 }
 0x6ab   : > { %2628 = vmatprep.subr.bf16.mxu0 %v2743_v1 }
 0x756   : > { %v2550_v6 = vpop.f32.mrb[0].mxu0 }
 0x757   : > { %v1504_v3 = vpop.f32.mrb[1].mxu0 }
 0x758   : > { %v2551_v32 = vpop.f32.mrb[2].mxu0 }
 0x759   : > { %v1536_v38 = vpack.c.bf16 %v2551_v32, %v2550_v6  ;;  %v1507_v49 = vpop.f32.mrb[3].mxu0 }
 0x75a   : > { %v1535_v63 = vpack.c.bf16 %v1507_v49, %v1504_v3 }
 0x75c   : > { %2572 = vmatprep.mubr.bf16.mxu1 %v1535_v63 }
 0x75d   : > { %2573 = vmatmul.mubr.bf16.vlgmr.msra.gmra.mrb[0].mxu1 %v1536_v38 }
 0x75e   : > { %2605 = vmatpush3.bf16.msra.mxu1 %v2735_v34 }
 0x75f   : > { %2606 = vmatprep.subr.bf16.mxu1 %v2736_v36 }
 0x762   : > { %2607 = vmatpush3.bf16.msra.mxu1 %v2736_v36 }
 0x763   : > { %2608 = vmatprep.subr.bf16.mxu1 %v2737_v47 }
 0x766   : > { %2609 = vmatpush3.bf16.msra.mxu1 %v2737_v47 }
 0x767   : > { %2610 = vmatprep.subr.bf16.mxu1 %v2738_v22 }
 0x76a   : > { %2611 = vmatpush3.bf16.msra.mxu1 %v2738_v22 }
 0x76b   : > { %2612 = vmatprep.subr.bf16.mxu1 %v2739_v44 }
 0x76e   : > { %2613 = vmatpush3.bf16.msra.mxu1 %v2739_v44 }
 0x76f   : > { %2614 = vmatprep.subr.bf16.mxu1 %v2740_v52 }
 0x772   : > { %2615 = vmatpush3.bf16.msra.mxu1 %v2740_v52 }
 0x773   : > { %2616 = vmatprep.subr.bf16.mxu1 %v2741_v62 }
 0x776   : > { %2617 = vmatpush3.bf16.msra.mxu1 %v2741_v62 }
 0x777   : > { %2618 = vmatprep.subr.bf16.mxu1 %v2742_v0 }
 0x778   : > { %v2554_v59 = vpop.f32.mrb[4].mxu0 }
 0x779   : > { %v1520_v18 = vpop.f32.mrb[5].mxu0 }
 0x77a   : > { %v2555_v15 = vpop.f32.mrb[6].mxu0  ;;  %2619 = vmatpush3.bf16.msra.mxu1 %v2742_v0 }
 0x77b   : > { %v1538_v51 = vpack.c.bf16 %v2555_v15, %v2554_v59  ;;  %v1523_v28 = vpop.f32.mrb[7].mxu0 }
 0x77c   : > { %v1537_v23 = vpack.c.bf16 %v1523_v28, %v1520_v18 }
 0x77e   : > { %2576 = vmatprep.mubr.bf16.mxu1 %v1537_v23 }
 0x77f   : > { %2577 = vmatmul.mubr.bf16.gmra.mrb[4].mxu1 %v1538_v51 }
 0x830   : > { %v2574_v40 = vpop.f32.mrb[0].mxu1 }
 0x831   : > { %v1653_v56 = vadd.f32 %v2574_v40, %v2428_v19  ;;  %v1644_v21 = vpop.f32.mrb[1].mxu1 }
 0x832   : > { %v1645_v37 = vadd.f32 %v2428_v19, %v1644_v21  ;;  %v2575_v13 = vpop.f32.mrb[2].mxu1  ;;  %v2750_v21 = vld [vmem:[%s3657_s9 + $0x38] sm:$0xff]  }
 0x833   : > { %v1656_v48 = vadd.f32 %v2575_v13, %v2428_v19  ;;  %v1647_v39 = vpop.f32.mrb[3].mxu1  ;;  %v1677_v45 = vmax.f32 %v1653_v56, 0.0  ;;  %v2749_v56 = vld [vmem:[%s3657_s9 + $0x30] sm:$0xff]   ;;  %v2752_v13 = vld [vmem:[%s3659_s11 + $0x8] sm:$0xff]  }
 0x834   : > { %v1648_v42 = vadd.f32 %v2428_v19, %v1647_v39  ;;  %v1675_v10 = vmax.f32 %v1645_v37, 0.0  ;;  %v2751_v37 = vld [vmem:[%s3659_s11] sm:$0xff]   ;;  %v2754_v39 = vld [vmem:[%s3659_s11 + $0x18] sm:$0xff]  }
 0x835   : > { %v1678_v2 = vmax.f32 %v1656_v48, 0.0  ;;  %2652 = vmatprep.subr.bf16.mxu1 %v2751_v37  ;;  %v2753_v48 = vld [vmem:[%s3659_s11 + $0x10] sm:$0xff]  }
 0x836   : > { %v1676_v7 = vmax.f32 %v1648_v42, 0.0  ;;  %v2755_v42 = vld [vmem:[%s3659_s11 + $0x20] sm:$0xff]  }
 0x837   : > { %v1684_v53 = vpack.c.bf16 %v1678_v2, %v1677_v45  ;;  %v2756_v45 = vld [vmem:[%s3659_s11 + $0x28] sm:$0xff]   ;;  %v2446_v2 = vld [vmem:[%s3656_s8] ss:$0 sm:$0xff] }
 0x838   : > { %v1683_v5 = vpack.c.bf16 %v1676_v7, %v1675_v10 }
 0x83a   : > { %2596 = vmatprep.mubr.bf16.mxu0 %v1683_v5 }
 0x83b   : > { %2597 = vmatmul.mubr.bf16.vlgmr.msra.gmra.mrb[8].mxu0 %v1684_v53 }
 0x83c   : > { %2629 = vmatpush3.bf16.msra.mxu0 %v2743_v1 }
 0x83d   : > { %2630 = vmatprep.subr.bf16.mxu0 %v2744_v12 }
 0x840   : > { %2631 = vmatpush3.bf16.msra.mxu0 %v2744_v12 }
 0x841   : > { %2632 = vmatprep.subr.bf16.mxu0 %v2745_v17 }
 0x844   : > { %2633 = vmatpush3.bf16.msra.mxu0 %v2745_v17 }
 0x845   : > { %2634 = vmatprep.subr.bf16.mxu0 %v2746_v29 }
 0x848   : > { %2635 = vmatpush3.bf16.msra.mxu0 %v2746_v29 }
 0x849   : > { %2636 = vmatprep.subr.bf16.mxu0 %v2747_v57 }
 0x84c   : > { %2637 = vmatpush3.bf16.msra.mxu0 %v2747_v57 }
 0x84d   : > { %2638 = vmatprep.subr.bf16.mxu0 %v2748_v16 }
 0x850   : > { %2639 = vmatpush3.bf16.msra.mxu0 %v2748_v16 }
 0x851   : > { %2640 = vmatprep.subr.bf16.mxu0 %v2749_v56 }
 0x852   : > { %v2578_v25 = vpop.f32.mrb[4].mxu1 }
 0x853   : > { %v1669_v33 = vadd.f32 %v2578_v25, %v2428_v19  ;;  %v1660_v24 = vpop.f32.mrb[5].mxu1 }
 0x854   : > { %v1661_v46 = vadd.f32 %v2428_v19, %v1660_v24  ;;  %v2579_v26 = vpop.f32.mrb[6].mxu1  ;;  %2641 = vmatpush3.bf16.msra.mxu0 %v2749_v56 }
 0x855   : > { %v1672_v58 = vadd.f32 %v2579_v26, %v2428_v19  ;;  %v1663_v11 = vpop.f32.mrb[7].mxu1  ;;  %v1681_v27 = vmax.f32 %v1669_v33, 0.0  ;;  %2642 = vmatprep.subr.bf16.mxu0 %v2750_v21 }
 0x856   : > { %v1664_v43 = vadd.f32 %v2428_v19, %v1663_v11  ;;  %v1679_v9 = vmax.f32 %v1661_v46, 0.0 }
 0x857   : > { %v1682_v30 = vmax.f32 %v1672_v58, 0.0 }
 0x858   : > { %v1680_v50 = vmax.f32 %v1664_v43, 0.0  ;;  %2643 = vmatpush3.bf16.msra.mxu0 %v2750_v21 }
 0x859   : > { %v1686_v4 = vpack.c.bf16 %v1682_v30, %v1681_v27 }
 0x85a   : > { %v1685_v14 = vpack.c.bf16 %v1680_v50, %v1679_v9 }
 0x85c   : > { %2600 = vmatprep.mubr.bf16.mxu0 %v1685_v14 }
 0x85d   : > { %2601 = vmatmul.mubr.bf16.gmra.mrb[12].mxu0 %v1686_v4 }
 0x90e   : > { %v2598_v54 = vpop.f32.mrb[8].mxu0 }
 0x90f   : > { %v1801_v20 = vadd.f32 %v2598_v54, %v2437_v35  ;;  %v1792_v8 = vpop.f32.mrb[9].mxu0 }
 0x910   : > { %v1793_v60 = vadd.f32 %v2437_v35, %v1792_v8  ;;  %v2599_v31 = vpop.f32.mrb[10].mxu0  ;;  %v2758_v8 = vld [vmem:[%s3659_s11 + $0x38] sm:$0xff]  }
 0x911   : > { %v1804_v55 = vadd.f32 %v2599_v31, %v2437_v35  ;;  %v1795_v6 = vpop.f32.mrb[11].mxu0  ;;  %v1825_v32 = vmax.f32 %v1801_v20, 0.0  ;;  %v2757_v20 = vld [vmem:[%s3659_s11 + $0x30] sm:$0xff]  }
 0x912   : > { %v1796_v3 = vadd.f32 %v2437_v35, %v1795_v6  ;;  %v1823_v49 = vmax.f32 %v1793_v60, 0.0  ;;  %v2455_v60 = vld [vmem:[%s3658_s10] ss:$0 sm:$0xff] }
 0x913   : > { %v1826_v38 = vmax.f32 %v1804_v55, 0.0 }
 0x914   : > { %v1824_v63 = vmax.f32 %v1796_v3, 0.0 }
 0x915   : > { %v1832_v59 = vpack.c.bf16 %v1826_v38, %v1825_v32 }
 0x916   : > { %v1831_v18 = vpack.c.bf16 %v1824_v63, %v1823_v49 }
 0x918   : > { %2620 = vmatprep.mubr.bf16.mxu1 %v1831_v18 }
 0x919   : > { %2621 = vmatmul.mubr.bf16.vlgmr.msra.gmra.mrb[8].mxu1 %v1832_v59 }
 0x91a   : > { %2653 = vmatpush3.bf16.msra.mxu1 %v2751_v37 }
 0x91b   : > { %2654 = vmatprep.subr.bf16.mxu1 %v2752_v13 }
 0x91e   : > { %2655 = vmatpush3.bf16.msra.mxu1 %v2752_v13 }
 0x91f   : > { %2656 = vmatprep.subr.bf16.mxu1 %v2753_v48 }
 0x922   : > { %2657 = vmatpush3.bf16.msra.mxu1 %v2753_v48  ;;  %v2464_v48 = vld [vmem:[%s3660_s12] ss:$0 sm:$0xff] }
 0x923   : > { %2658 = vmatprep.subr.bf16.mxu1 %v2754_v39 }
 0x926   : > { %2659 = vmatpush3.bf16.msra.mxu1 %v2754_v39 }
 0x927   : > { %2660 = vmatprep.subr.bf16.mxu1 %v2755_v42 }
 0x92a   : > { %2661 = vmatpush3.bf16.msra.mxu1 %v2755_v42 }
 0x92b   : > { %2662 = vmatprep.subr.bf16.mxu1 %v2756_v45 }
 0x92e   : > { %2663 = vmatpush3.bf16.msra.mxu1 %v2756_v45 }
 0x92f   : > { %2664 = vmatprep.subr.bf16.mxu1 %v2757_v20 }
 0x930   : > { %v2602_v15 = vpop.f32.mrb[12].mxu0 }
 0x931   : > { %v1817_v51 = vadd.f32 %v2602_v15, %v2437_v35  ;;  %v1808_v28 = vpop.f32.mrb[13].mxu0 }
 0x932   : > { %v1809_v23 = vadd.f32 %v2437_v35, %v1808_v28  ;;  %v2603_v61 = vpop.f32.mrb[14].mxu0  ;;  %2665 = vmatpush3.bf16.msra.mxu1 %v2757_v20 }
 0x933   : > { %v1820_v41 = vadd.f32 %v2603_v61, %v2437_v35  ;;  %v1811_v34 = vpop.f32.mrb[15].mxu0  ;;  %v1829_v47 = vmax.f32 %v1817_v51, 0.0  ;;  %2666 = vmatprep.subr.bf16.mxu1 %v2758_v8 }
 0x934   : > { %v1812_v36 = vadd.f32 %v2437_v35, %v1811_v34  ;;  %v1827_v44 = vmax.f32 %v1809_v23, 0.0 }
 0x935   : > { %v1830_v22 = vmax.f32 %v1820_v41, 0.0 }
 0x936   : > { %v1828_v52 = vmax.f32 %v1812_v36, 0.0  ;;  %2667 = vmatpush3.bf16.msra.mxu1 %v2758_v8 }
 0x937   : > { %v1834_v19 = vpack.c.bf16 %v1830_v22, %v1829_v47 }
 0x938   : > { %v1833_v40 = vpack.c.bf16 %v1828_v52, %v1827_v44 }
 0x93a   : > { %2624 = vmatprep.mubr.bf16.mxu1 %v1833_v40 }
 0x93b   : > { %2625 = vmatmul.mubr.bf16.gmra.mrb[12].mxu1 %v1834_v19 }
 0x9ec   : > { %v2622_v10 = vpop.f32.mrb[8].mxu1 }
 0x9ed   : > { %v1949_v7 = vadd.f32 %v2622_v10, %v2446_v2  ;;  %v1940_v53 = vpop.f32.mrb[9].mxu1 }
 0x9ee   : > { %v1941_v5 = vadd.f32 %v2446_v2, %v1940_v53  ;;  %v2623_v25 = vpop.f32.mrb[10].mxu1 }
 0x9ef   : > { %v1952_v33 = vadd.f32 %v2623_v25, %v2446_v2  ;;  %v1943_v24 = vpop.f32.mrb[11].mxu1  ;;  %v1973_v26 = vmax.f32 %v1949_v7, 0.0 }
 0x9f0   : > { %v1944_v46 = vadd.f32 %v2446_v2, %v1943_v24  ;;  %v1971_v11 = vmax.f32 %v1941_v5, 0.0 }
 0x9f1   : > { %v1974_v58 = vmax.f32 %v1952_v33, 0.0 }
 0x9f2   : > { %v1972_v43 = vmax.f32 %v1944_v46, 0.0 }
 0x9f3   : > { %v1980_v27 = vpack.c.bf16 %v1974_v58, %v1973_v26 }
 0x9f4   : > { %v1979_v30 = vpack.c.bf16 %v1972_v43, %v1971_v11 }
 0x9f6   : > { %2644 = vmatprep.mubr.bf16.mxu0 %v1979_v30 }
 0x9f7   : > { %2645 = vmatmul.mubr.bf16.vlgmr.msra.gmra.mrb[16].mxu0 %v1980_v27 }
 0xa0e   : > { %v2626_v9 = vpop.f32.mrb[12].mxu1 }
 0xa0f   : > { %v1965_v50 = vadd.f32 %v2626_v9, %v2446_v2  ;;  %v1956_v4 = vpop.f32.mrb[13].mxu1 }
 0xa10   : > { %v1957_v14 = vadd.f32 %v2446_v2, %v1956_v4  ;;  %v2627_v62 = vpop.f32.mrb[14].mxu1 }
 0xa11   : > { %v1968_v0 = vadd.f32 %v2627_v62, %v2446_v2  ;;  %v1959_v1 = vpop.f32.mrb[15].mxu1  ;;  %v1977_v17 = vmax.f32 %v1965_v50, 0.0 }
 0xa12   : > { %v1960_v12 = vadd.f32 %v2446_v2, %v1959_v1  ;;  %v1975_v57 = vmax.f32 %v1957_v14, 0.0 }
 0xa13   : > { %v1978_v29 = vmax.f32 %v1968_v0, 0.0 }
 0xa14   : > { %v1976_v16 = vmax.f32 %v1960_v12, 0.0 }
 0xa15   : > { %v1982_v35 = vpack.c.bf16 %v1978_v29, %v1977_v17 }
 0xa16   : > { %v1981_v54 = vpack.c.bf16 %v1976_v16, %v1975_v57 }
 0xa18   : > { %2648 = vmatprep.mubr.bf16.mxu0 %v1981_v54 }
 0xa19   : > { %2649 = vmatmul.mubr.bf16.gmra.mrb[20].mxu0 %v1982_v35 }
 0xaca   : > { %v2646_v31 = vpop.f32.mrb[16].mxu0 }
 0xacb   : > { %v2097_v55 = vadd.f32 %v2646_v31, %v2455_v60  ;;  %v2088_v6 = vpop.f32.mrb[17].mxu0 }
 0xacc   : > { %v2089_v3 = vadd.f32 %v2455_v60, %v2088_v6  ;;  %v2647_v32 = vpop.f32.mrb[18].mxu0 }
 0xacd   : > { %v2100_v38 = vadd.f32 %v2647_v32, %v2455_v60  ;;  %v2091_v49 = vpop.f32.mrb[19].mxu0  ;;  %v2121_v59 = vmax.f32 %v2097_v55, 0.0 }
 0xace   : > { %v2092_v63 = vadd.f32 %v2455_v60, %v2091_v49  ;;  %v2119_v15 = vmax.f32 %v2089_v3, 0.0 }
 0xacf   : > { %v2122_v18 = vmax.f32 %v2100_v38, 0.0 }
 0xad0   : > { %v2120_v51 = vmax.f32 %v2092_v63, 0.0 }
 0xad1   : > { %v2128_v28 = vpack.c.bf16 %v2122_v18, %v2121_v59 }
 0xad2   : > { %v2127_v23 = vpack.c.bf16 %v2120_v51, %v2119_v15 }
 0xad4   : > { %2668 = vmatprep.mubr.bf16.mxu1 %v2127_v23 }
 0xad5   : > { %2669 = vmatmul.mubr.bf16.vlgmr.msra.gmra.mrb[16].mxu1 %v2128_v28 }
 0xaec   : > { %v2650_v61 = vpop.f32.mrb[20].mxu0 }
 0xaed   : > { %v2113_v41 = vadd.f32 %v2650_v61, %v2455_v60  ;;  %v2104_v34 = vpop.f32.mrb[21].mxu0 }
 0xaee   : > { %v2105_v36 = vadd.f32 %v2455_v60, %v2104_v34  ;;  %v2651_v47 = vpop.f32.mrb[22].mxu0 }
 0xaef   : > { %v2116_v22 = vadd.f32 %v2651_v47, %v2455_v60  ;;  %v2107_v44 = vpop.f32.mrb[23].mxu0  ;;  %v2125_v19 = vmax.f32 %v2113_v41, 0.0 }
 0xaf0   : > { %v2108_v52 = vadd.f32 %v2455_v60, %v2107_v44  ;;  %v2123_v56 = vmax.f32 %v2105_v36, 0.0 }
 0xaf1   : > { %v2126_v40 = vmax.f32 %v2116_v22, 0.0 }
 0xaf2   : > { %v2124_v21 = vmax.f32 %v2108_v52, 0.0 }
 0xaf3   : > { %v2130_v37 = vpack.c.bf16 %v2126_v40, %v2125_v19 }
 0xaf4   : > { %v2129_v13 = vpack.c.bf16 %v2124_v21, %v2123_v56 }
 0xaf6   : > { %2672 = vmatprep.mubr.bf16.mxu1 %v2129_v13 }
 0xaf7   : > { %2673 = vmatmul.mubr.bf16.gmra.mrb[20].mxu1 %v2130_v37 }
 0xba8   : > { %v2670_v39 = vpop.f32.mrb[16].mxu1 }
 0xba9   : > { %v2245_v42 = vadd.f32 %v2670_v39, %v2464_v48  ;;  %v2236_v45 = vpop.f32.mrb[17].mxu1 }
 0xbaa   : > { %v2237_v2 = vadd.f32 %v2464_v48, %v2236_v45  ;;  %v2671_v10 = vpop.f32.mrb[18].mxu1 }
 0xbab   : > { %2269 = vst [vmem:[%s515_s20 + $0x10] sm:$0xff] %v2245_v42  ;;  %v2248_v7 = vadd.f32 %v2671_v10, %v2464_v48  ;;  %v2239_v53 = vpop.f32.mrb[19].mxu1 }
 0xbac   : > { %2267 = vst [vmem:[%s515_s20] sm:$0xff] %v2237_v2  ;;  %v2240_v5 = vadd.f32 %v2464_v48, %v2239_v53 }
 0xbad   : > { %2270 = vst [vmem:[%s515_s20 + $0x18] sm:$0xff] %v2248_v7 }
 0xbae   : > { %2268 = vst [vmem:[%s515_s20 + $0x8] sm:$0xff] %v2240_v5 }
 0xbca   : > { %v2674_v25 = vpop.f32.mrb[20].mxu1 }
 0xbcb   : > { %v2261_v33 = vadd.f32 %v2674_v25, %v2464_v48  ;;  %v2252_v24 = vpop.f32.mrb[21].mxu1 }
 0xbcc   : > { %v2253_v46 = vadd.f32 %v2464_v48, %v2252_v24  ;;  %v2675_v26 = vpop.f32.mrb[22].mxu1 }
 0xbcd   : > { %2273 = vst [vmem:[%s515_s20 + $0x30] sm:$0xff] %v2261_v33  ;;  %v2264_v58 = vadd.f32 %v2675_v26, %v2464_v48  ;;  %v2255_v11 = vpop.f32.mrb[23].mxu1 }
 0xbce   : > { %2271 = vst [vmem:[%s515_s20 + $0x20] sm:$0xff] %v2253_v46  ;;  %v2256_v43 = vadd.f32 %v2464_v48, %v2255_v11 }
 0xbcf   : > { %2274 = vst [vmem:[%s515_s20 + $0x38] sm:$0xff] %v2264_v58 }
 0xbd0   : > { %2272 = vst [vmem:[%s515_s20 + $0x28] sm:$0xff] %v2256_v43 }
 0xbd1 PF: > { %s23_s27 = sadd.s32 1, %s2845_s27   ;;  %s3662_s25 = smov %s2841_s26 }
 0xbd2   : > { %p20_p5 = scmp.ge.s32.totalorder %s23_s27, 4   ;;  %s3663_s26 = smov %s3665_s28 }
 0xbd4   :  { %22 = sbr.rel (!%p20_p5) target bundleno = 2 (0x2), region = 108 }

</bundles_post_ra>
